<compile_context>
chip_gen: v7x
topology: tpu7x:2x2x1
jax: 0.10.0
libtpu: 0.0.40
codegen_flags: <defaults>
</compile_context>

<pallas_src>
import math
import functools

import jax
import jax.numpy as jnp
from jax.experimental import pallas as pl
from jax.experimental.pallas import tpu as pltpu


def _layer_norm(t, g, b, eps=1e-5):
    mu = jnp.mean(t, axis=-1, keepdims=True)
    var = jnp.mean((t - mu) ** 2, axis=-1, keepdims=True)
    return (t - mu) * jax.lax.rsqrt(var + eps) * g + b


def encoder_layer_kernel(
    x_ref, mask_ref,
    wqkv_ref, bqkv_ref, wo_ref, bo_ref, ln1g_ref, ln1b_ref,
    w1_ref, b1_ref, w2_ref, b2_ref, ln2g_ref, ln2b_ref,
    out_ref, *attn_refs,
    n_head, d_k,
):
    S = x_ref.shape[1]
    D = x_ref.shape[2]

    x = x_ref[0]                                               # (S, D) f32
    # additive attention bias, computed ONCE per grid step (mask streamed as bf16)
    bias = mask_ref[0].astype(jnp.float32) * jnp.float32(-1e9)  # (S, S) f32

    xb = x.astype(jnp.bfloat16)

    # --- fused QKV projection: ONE K=D, N=3D matmul (bf16 operands, f32 accum) ---
    # 1/sqrt(d_k) is pre-folded into the Q columns of wqkv / bqkv on the host.
    qkv = jnp.dot(xb, wqkv_ref[...], preferred_element_type=jnp.float32) + bqkv_ref[...]
    q = qkv[:, :D]
    k = qkv[:, D:2 * D]
    v = qkv[:, 2 * D:]

    # head-major relayout done in bf16 (half the relayout bytes vs f32).
    # TODO(synk): at production shapes keep activations head-major across layers or
    # flash-tile per (batch, head, q-block) so this relayout disappears entirely.
    qh = jnp.transpose(q.astype(jnp.bfloat16).reshape(S, n_head, d_k), (1, 0, 2))
    kh = jnp.transpose(k.astype(jnp.bfloat16).reshape(S, n_head, d_k), (1, 0, 2))
    vh = jnp.transpose(v.astype(jnp.bfloat16).reshape(S, n_head, d_k), (1, 0, 2))

    # --- attention scores for ALL heads in one batched contraction (no explicit .T)
    # TODO(synk): for d_k below the MXU native width (128 v5e / 256 v6e,v7x) pack
    # head groups (or pad d_k) so the contraction fills the MXU K dimension.
    scores = jnp.einsum('hqd,hkd->hqk', qh, kh,
                        preferred_element_type=jnp.float32)    # (H, S, S) f32
    scores = scores + bias[None, :, :]

    # --- softmax over keys, f32; EXACT normalization (parity with torch.softmax) ---
    m = jnp.max(scores, axis=-1, keepdims=True)
    p = jnp.exp(scores - m)
    s = jnp.sum(p, axis=-1, keepdims=True)
    a = p * pl.reciprocal(s, approx=False)                     # (H, S, S)

    if attn_refs:                                              # optional dense output
        attn_refs[0][0] = a.astype(attn_refs[0].dtype)

    # --- context (head-batched) + single K=D output projection --------------------
    ctx = jnp.einsum('hqk,hkd->hqd', a.astype(jnp.bfloat16), vh,
                     preferred_element_type=jnp.float32)       # (H, S, d_k)
    ctx = jnp.transpose(ctx.astype(jnp.bfloat16), (1, 0, 2)).reshape(S, D)
    proj = jnp.dot(ctx, wo_ref[...],
                   preferred_element_type=jnp.float32) + bo_ref[...]

    enc1 = _layer_norm(proj + x, ln1g_ref[...], ln1b_ref[...])  # residual + LN (f32)

    # --- position-wise feed-forward (Conv1d k=1 == per-position linear) -----------
    # FFN intermediate kept in bf16 to bound the (S, d_ff) slab.
    h1 = jnp.maximum(
        jnp.dot(enc1.astype(jnp.bfloat16), w1_ref[...],
                preferred_element_type=jnp.float32) + b1_ref[...],
        0.0,
    ).astype(jnp.bfloat16)
    h2 = jnp.dot(h1, w2_ref[...], preferred_element_type=jnp.float32) + b2_ref[...]
    out_ref[0] = _layer_norm(h2 + enc1, ln2g_ref[...], ln2b_ref[...]).astype(out_ref.dtype)


def encoder_layer(x, mask, params, *, n_head,
                  return_attn=True, attn_dtype=jnp.float32, out_dtype=jnp.float32):
    B, S, D = x.shape
    assert D % n_head == 0
    d_k = D // n_head
    d_ff = params["w1"].shape[1]
    scale = jnp.float32(1.0 / math.sqrt(d_k))

    # ---- host-side weight prep (one-time per parameter set) ----------------------
    # fused QKV weight/bias with the softmax scale folded into the Q columns;
    # matmul weights in bf16 (MXU native, half HBM/VMEM traffic); biases / LN in f32.
    wqkv = jnp.concatenate(
        [params["wq"] * scale, params["wk"], params["wv"]], axis=1).astype(jnp.bfloat16)
    bqkv = jnp.concatenate(
        [params["bq"] * scale, params["bk"], params["bv"]], axis=1).astype(jnp.float32)
    weights = [
        wqkv, bqkv,
        params["wo"].astype(jnp.bfloat16), params["bo"].astype(jnp.float32),
        params["ln1_g"].astype(jnp.float32), params["ln1_b"].astype(jnp.float32),
        params["w1"].astype(jnp.bfloat16), params["b1"].astype(jnp.float32),
        params["w2"].astype(jnp.bfloat16), params["b2"].astype(jnp.float32),
        params["ln2_g"].astype(jnp.float32), params["ln2_b"].astype(jnp.float32),
    ]

    # mask streamed at half width; in-kernel it becomes the f32 additive bias.
    # TODO(synk): for pure padding masks pass per-batch key lengths via
    # PrefetchScalarGridSpec(num_scalar_prefetch=1) and build the bias with iota.
    mask_lo = mask.astype(jnp.bfloat16)

    # explicit scoped-VMEM budget sized from the actual tiles (clamped so it stays
    # within v7x's 64 MiB physical VMEM).
    def nbytes(a):
        return int(a.size) * a.dtype.itemsize

    weight_bytes = sum(nbytes(w) for w in weights)
    block_bytes = (S * D * 4) + (S * S * 2) + (S * D * jnp.dtype(out_dtype).itemsize)
    if return_attn:
        block_bytes += n_head * S * S * jnp.dtype(attn_dtype).itemsize
    scratch_bytes = (4 * 3 * S * D) + (2 * 3 * S * d_k * n_head) \
        + (4 * 3 * n_head * S * S) + (2 * S * d_ff)
    est = 2 * (weight_bytes + block_bytes) + scratch_bytes      # x2: double buffering
    vmem_limit = int(min(64 * 2**20, max(32 * 2**20, 2 * est)))

    if return_attn:
        out_shape = (jax.ShapeDtypeStruct((B, S, D), out_dtype),
                     jax.ShapeDtypeStruct((B, n_head, S, S), attn_dtype))
        out_specs = (pl.BlockSpec((1, S, D), lambda b: (b, 0, 0)),
                     pl.BlockSpec((1, n_head, S, S), lambda b: (b, 0, 0, 0)))
    else:
        out_shape = jax.ShapeDtypeStruct((B, S, D), out_dtype)
        out_specs = pl.BlockSpec((1, S, D), lambda b: (b, 0, 0))

    kernel = functools.partial(encoder_layer_kernel, n_head=n_head, d_k=d_k)

    def run(single_buffer_weights):
        def w_spec(arr):
            nd = arr.ndim
            idx_map = lambda b, _nd=nd: (0,) * _nd
            if single_buffer_weights:
                # Weight blocks never change across the grid -> one VMEM buffer is
                # enough; default double-buffering would duplicate every weight byte.
                return pl.BlockSpec(arr.shape, idx_map, pipeline_mode=pl.Buffered(1))
            return pl.BlockSpec(arr.shape, idx_map)

        grid_spec = pltpu.PrefetchScalarGridSpec(
            num_scalar_prefetch=0,
            grid=(B,),
            in_specs=[
                pl.BlockSpec((1, S, D), lambda b: (b, 0, 0)),   # x
                pl.BlockSpec((1, S, S), lambda b: (b, 0, 0)),   # mask (bf16)
            ] + [w_spec(w) for w in weights],
            out_specs=out_specs,
        )
        return pl.pallas_call(
            kernel,
            out_shape=out_shape,
            grid_spec=grid_spec,
            compiler_params=pltpu.CompilerParams(
                dimension_semantics=("parallel",),
                vmem_limit_bytes=vmem_limit,
            ),
        )(x, mask_lo, *weights)

    try:
        result = run(single_buffer_weights=True)
    except Exception:
        # pipeline_mode=pl.Buffered(1) not supported by this jax/Mosaic version:
        # fall back to the default double-buffered weight blocks.
        result = run(single_buffer_weights=False)

    if return_attn:
        enc_out, attn = result
        return enc_out, attn
    return result


def encoder_layer_reference(x, mask, params, *, n_head):
    """Pure-JAX f32 reference mirroring the PyTorch module."""
    B, S, D = x.shape
    d_k = D // n_head
    q = x @ params["wq"] + params["bq"]
    k = x @ params["wk"] + params["bk"]
    v = x @ params["wv"] + params["bv"]

    def split(t):
        return jnp.transpose(t.reshape(B, S, n_head, d_k), (0, 2, 1, 3))

    qh, kh, vh = split(q), split(k), split(v)
    scores = jnp.einsum('bhqd,bhkd->bhqk', qh, kh) / math.sqrt(d_k)
    scores = scores + mask[:, None, :, :] * (-1e9)
    attn = jax.nn.softmax(scores, axis=-1)
    ctx = jnp.einsum('bhqk,bhkd->bhqd', attn, vh)
    ctx = jnp.transpose(ctx, (0, 2, 1, 3)).reshape(B, S, D)
    proj = ctx @ params["wo"] + params["bo"]
    enc1 = _layer_norm(proj + x, params["ln1_g"], params["ln1_b"])
    h1 = jax.nn.relu(enc1 @ params["w1"] + params["b1"])
    h2 = h1 @ params["w2"] + params["b2"]
    out = _layer_norm(h2 + enc1, params["ln2_g"], params["ln2_b"])
    return out, attn


def init_params(key, d_model, n_head, d_ff):
    ks = jax.random.split(key, 8)
    w = lambda k, shape: (0.02 * jax.random.normal(k, shape)).astype(jnp.float32)
    return {
        # MultiHeadAttention: W_Q, W_K, W_V (d_model -> n_head*d_k == d_model), fc
        "wq": w(ks[0], (d_model, d_model)), "bq": jnp.zeros((1, d_model), jnp.float32),
        "wk": w(ks[1], (d_model, d_model)), "bk": jnp.zeros((1, d_model), jnp.float32),
        "wv": w(ks[2], (d_model, d_model)), "bv": jnp.zeros((1, d_model), jnp.float32),
        "wo": w(ks[3], (d_model, d_model)), "bo": jnp.zeros((1, d_model), jnp.float32),
        "ln1_g": jnp.ones((1, d_model), jnp.float32),
        "ln1_b": jnp.zeros((1, d_model), jnp.float32),
        # PosWiseFeedForwardNet: Conv1d(d_model->d_ff,k=1), Conv1d(d_ff->d_model,k=1)
        "w1": w(ks[4], (d_model, d_ff)), "b1": jnp.zeros((1, d_ff), jnp.float32),
        "w2": w(ks[5], (d_ff, d_model)), "b2": jnp.zeros((1, d_model), jnp.float32),
        "ln2_g": jnp.ones((1, d_model), jnp.float32),
        "ln2_b": jnp.zeros((1, d_model), jnp.float32),
    }


if __name__ == "__main__":
    B, S, d_model, n_head, d_ff = 2, 8, 32, 4, 64

    key = jax.random.PRNGKey(0)
    k_x, k_p = jax.random.split(key)

    x = jax.random.normal(k_x, (B, S, d_model), dtype=jnp.float32)
    # padding-style self-attention mask: last 2 key positions are masked out
    mask = jnp.zeros((B, S, S), jnp.float32).at[:, :, -2:].set(1.0)

    params = init_params(k_p, d_model, n_head, d_ff)

    enc_out, attn = encoder_layer(x, mask, params, n_head=n_head)
    jax.block_until_ready((enc_out, attn))

    assert enc_out.shape == (B, S, d_model)
    assert attn.shape == (B, n_head, S, S)
    assert bool(jnp.all(jnp.isfinite(enc_out)))
    # exact softmax normalization: rows sum to 1, masked key columns are ~0
    assert bool(jnp.allclose(jnp.sum(attn, axis=-1), 1.0, atol=1e-3))
    assert bool(jnp.all(attn[..., -2:] < 1e-6))

    # parity vs. pure-JAX f32 reference (kernel runs bf16 MXU operands, f32 accum)
    enc_ref, attn_ref = encoder_layer_reference(x, mask, params, n_head=n_head)
    assert bool(jnp.allclose(enc_out, enc_ref, atol=3e-2, rtol=3e-2))
    assert bool(jnp.allclose(attn, attn_ref, atol=2e-2))

    print("KERNEL_OK")
</pallas_src>

<mosaic_0001>
module attributes {stable_mosaic.version = 11 : i64} {
  func.func @encoder_layer_kernel(%arg0: i32, %arg1: memref<1x8x32xf32, #tpu.memory_space<vmem>>, %arg2: memref<1x8x8xbf16, #tpu.memory_space<vmem>>, %arg3: memref<32x96xbf16, #tpu.memory_space<vmem>>, %arg4: memref<1x96xf32, #tpu.memory_space<vmem>>, %arg5: memref<32x32xbf16, #tpu.memory_space<vmem>>, %arg6: memref<1x32xf32, #tpu.memory_space<vmem>>, %arg7: memref<1x32xf32, #tpu.memory_space<vmem>>, %arg8: memref<1x32xf32, #tpu.memory_space<vmem>>, %arg9: memref<32x64xbf16, #tpu.memory_space<vmem>>, %arg10: memref<1x64xf32, #tpu.memory_space<vmem>>, %arg11: memref<64x32xbf16, #tpu.memory_space<vmem>>, %arg12: memref<1x32xf32, #tpu.memory_space<vmem>>, %arg13: memref<1x32xf32, #tpu.memory_space<vmem>>, %arg14: memref<1x32xf32, #tpu.memory_space<vmem>>, %arg15: memref<1x8x32xf32, #tpu.memory_space<vmem>>, %arg16: memref<1x4x8x8xf32, #tpu.memory_space<vmem>>) attributes {dimension_semantics = [#tpu.dimension_semantics<parallel>], iteration_bounds = array<i64: 2>, scalar_prefetch = 0 : i64, scratch_operands = 0 : i64, tpu.core_type = #tpu.core_type<tc>, window_params = [{transform_indices = @transform_0, window_bounds = array<i64: 1, 8, 32>}, {transform_indices = @transform_1, window_bounds = array<i64: 1, 8, 8>}, {pipeline_mode = #tpu.pipeline_mode<synchronous>, transform_indices = @transform_2, window_bounds = array<i64: 32, 96>}, {pipeline_mode = #tpu.pipeline_mode<synchronous>, transform_indices = @transform_3, window_bounds = array<i64: 1, 96>}, {pipeline_mode = #tpu.pipeline_mode<synchronous>, transform_indices = @transform_4, window_bounds = array<i64: 32, 32>}, {pipeline_mode = #tpu.pipeline_mode<synchronous>, transform_indices = @transform_5, window_bounds = array<i64: 1, 32>}, {pipeline_mode = #tpu.pipeline_mode<synchronous>, transform_indices = @transform_6, window_bounds = array<i64: 1, 32>}, {pipeline_mode = #tpu.pipeline_mode<synchronous>, transform_indices = @transform_7, window_bounds = array<i64: 1, 32>}, {pipeline_mode = #tpu.pipeline_mode<synchronous>, transform_indices = @transform_8, window_bounds = array<i64: 32, 64>}, {pipeline_mode = #tpu.pipeline_mode<synchronous>, transform_indices = @transform_9, window_bounds = array<i64: 1, 64>}, {pipeline_mode = #tpu.pipeline_mode<synchronous>, transform_indices = @transform_10, window_bounds = array<i64: 64, 32>}, {pipeline_mode = #tpu.pipeline_mode<synchronous>, transform_indices = @transform_11, window_bounds = array<i64: 1, 32>}, {pipeline_mode = #tpu.pipeline_mode<synchronous>, transform_indices = @transform_12, window_bounds = array<i64: 1, 32>}, {pipeline_mode = #tpu.pipeline_mode<synchronous>, transform_indices = @transform_13, window_bounds = array<i64: 1, 32>}, {transform_indices = @transform_14, window_bounds = array<i64: 1, 8, 32>}, {transform_indices = @transform_15, window_bounds = array<i64: 1, 4, 8, 8>}]} {
    %c0 = arith.constant 0 : index
    %c0_0 = arith.constant 0 : index
    %c0_1 = arith.constant 0 : index
    %0 = vector.load %arg1[%c0, %c0_0, %c0_1] : memref<1x8x32xf32, #tpu.memory_space<vmem>>, vector<1x8x32xf32>
    %1 = vector.shape_cast %0 : vector<1x8x32xf32> to vector<8x32xf32>
    %c0_2 = arith.constant 0 : index
    %c0_3 = arith.constant 0 : index
    %c0_4 = arith.constant 0 : index
    %2 = vector.load %arg2[%c0_2, %c0_3, %c0_4] : memref<1x8x8xbf16, #tpu.memory_space<vmem>>, vector<1x8x8xbf16>
    %3 = vector.shape_cast %2 : vector<1x8x8xbf16> to vector<8x8xbf16>
    %4 = arith.extf %3 : vector<8x8xbf16> to vector<8x8xf32>
    %cst = arith.constant -1.000000e+09 : f32
    %5 = vector.broadcast %cst : f32 to vector<8x8xf32>
    %6 = arith.mulf %4, %5 : vector<8x8xf32>
    %7 = arith.truncf %1 : vector<8x32xf32> to vector<8x32xbf16>
    %c0_5 = arith.constant 0 : index
    %c0_6 = arith.constant 0 : index
    %8 = vector.load %arg3[%c0_5, %c0_6] : memref<32x96xbf16, #tpu.memory_space<vmem>>, vector<32x96xbf16>
    %cst_7 = arith.constant dense<0.000000e+00> : vector<8x96xf32>
    %9 = tpu.matmul %7, %8, %cst_7 {dimension_numbers = #tpu.dot_dimension_numbers<[1], [0], [0], [1], [0, 0, 1, 1], [], []>} : vector<8x32xbf16>, vector<32x96xbf16>, vector<8x96xf32> -> vector<8x96xf32>
    %c0_8 = arith.constant 0 : index
    %c0_9 = arith.constant 0 : index
    %10 = vector.load %arg4[%c0_8, %c0_9] : memref<1x96xf32, #tpu.memory_space<vmem>>, vector<1x96xf32>
    %11 = vector.broadcast %10 : vector<1x96xf32> to vector<8x96xf32>
    %12 = arith.addf %9, %11 : vector<8x96xf32>
    %13 = vector.extract_strided_slice %12 {offsets = [0, 0], sizes = [8, 32], strides = [1, 1]} : vector<8x96xf32> to vector<8x32xf32>
    %14 = vector.extract_strided_slice %12 {offsets = [0, 32], sizes = [8, 32], strides = [1, 1]} : vector<8x96xf32> to vector<8x32xf32>
    %15 = vector.extract_strided_slice %12 {offsets = [0, 64], sizes = [8, 32], strides = [1, 1]} : vector<8x96xf32> to vector<8x32xf32>
    %16 = arith.truncf %13 : vector<8x32xf32> to vector<8x32xbf16>
    %17 = vector.shape_cast %16 : vector<8x32xbf16> to vector<8x4x8xbf16>
    %18 = tpu.transpose %17, [1, 0, 2] : vector<8x4x8xbf16> -> vector<4x8x8xbf16>
    %19 = arith.truncf %14 : vector<8x32xf32> to vector<8x32xbf16>
    %20 = vector.shape_cast %19 : vector<8x32xbf16> to vector<8x4x8xbf16>
    %21 = tpu.transpose %20, [1, 0, 2] : vector<8x4x8xbf16> -> vector<4x8x8xbf16>
    %22 = arith.truncf %15 : vector<8x32xf32> to vector<8x32xbf16>
    %23 = vector.shape_cast %22 : vector<8x32xbf16> to vector<8x4x8xbf16>
    %24 = tpu.transpose %23, [1, 0, 2] : vector<8x4x8xbf16> -> vector<4x8x8xbf16>
    "tpu.trace_start"() <{level = 10 : i32, message = "hqd,hkd->hqk"}> : () -> ()
    %cst_10 = arith.constant dense<0.000000e+00> : vector<4x8x8xf32>
    %25 = tpu.matmul %18, %21, %cst_10 {dimension_numbers = #tpu.dot_dimension_numbers<[2], [2], [1], [1], [0, 0, 0, 1, 1, 1], [0], [0]>} : vector<4x8x8xbf16>, vector<4x8x8xbf16>, vector<4x8x8xf32> -> vector<4x8x8xf32>
    "tpu.trace_stop"() : () -> ()
    %26 = vector.shape_cast %6 : vector<8x8xf32> to vector<1x8x8xf32>
    %27 = vector.broadcast %26 : vector<1x8x8xf32> to vector<4x8x8xf32>
    %28 = arith.addf %25, %27 : vector<4x8x8xf32>
    %cst_11 = arith.constant dense<0xFF800000> : vector<4x8xf32>
    %29 = vector.multi_reduction <maximumf>, %28, %cst_11 [2] : vector<4x8x8xf32> to vector<4x8xf32>
    %30 = vector.shape_cast %29 : vector<4x8xf32> to vector<4x8x1xf32>
    %31 = vector.broadcast %30 : vector<4x8x1xf32> to vector<4x8x8xf32>
    %32 = arith.subf %28, %31 : vector<4x8x8xf32>
    %33 = math.exp %32 : vector<4x8x8xf32>
    %cst_12 = arith.constant dense<0.000000e+00> : vector<4x8xf32>
    %34 = vector.multi_reduction <add>, %33, %cst_12 [2] : vector<4x8x8xf32> to vector<4x8xf32>
    %35 = vector.shape_cast %34 : vector<4x8xf32> to vector<4x8x1xf32>
    %36 = tpu.reciprocal %35 : vector<4x8x1xf32> -> vector<4x8x1xf32>
    %37 = vector.broadcast %36 : vector<4x8x1xf32> to vector<4x8x8xf32>
    %38 = arith.mulf %33, %37 : vector<4x8x8xf32>
    %c0_13 = arith.constant 0 : index
    %c0_14 = arith.constant 0 : index
    %c0_15 = arith.constant 0 : index
    %c0_16 = arith.constant 0 : index
    %39 = vector.load %arg16[%c0_13, %c0_14, %c0_15, %c0_16] : memref<1x4x8x8xf32, #tpu.memory_space<vmem>>, vector<1x4x8x8xf32>
    %40 = vector.shape_cast %39 : vector<1x4x8x8xf32> to vector<4x8x8xf32>
    %41 = vector.shape_cast %38 : vector<4x8x8xf32> to vector<1x4x8x8xf32>
    tpu.vector_store %arg16[%c0_13, %c0_14, %c0_15, %c0_16], %41 {strides = array<i32>} : memref<1x4x8x8xf32, #tpu.memory_space<vmem>>, vector<1x4x8x8xf32>,
    %42 = arith.truncf %38 : vector<4x8x8xf32> to vector<4x8x8xbf16>
    "tpu.trace_start"() <{level = 10 : i32, message = "hqk,hkd->hqd"}> : () -> ()
    %cst_17 = arith.constant dense<0.000000e+00> : vector<4x8x8xf32>
    %43 = tpu.matmul %42, %24, %cst_17 {dimension_numbers = #tpu.dot_dimension_numbers<[2], [1], [1], [2], [0, 0, 0, 1, 1, 2], [0], [0]>} : vector<4x8x8xbf16>, vector<4x8x8xbf16>, vector<4x8x8xf32> -> vector<4x8x8xf32>
    "tpu.trace_stop"() : () -> ()
    %44 = arith.truncf %43 : vector<4x8x8xf32> to vector<4x8x8xbf16>
    %45 = tpu.transpose %44, [1, 0, 2] : vector<4x8x8xbf16> -> vector<8x4x8xbf16>
    %46 = vector.shape_cast %45 : vector<8x4x8xbf16> to vector<8x32xbf16>
    %c0_18 = arith.constant 0 : index
    %c0_19 = arith.constant 0 : index
    %47 = vector.load %arg5[%c0_18, %c0_19] : memref<32x32xbf16, #tpu.memory_space<vmem>>, vector<32x32xbf16>
    %cst_20 = arith.constant dense<0.000000e+00> : vector<8x32xf32>
    %48 = tpu.matmul %46, %47, %cst_20 {dimension_numbers = #tpu.dot_dimension_numbers<[1], [0], [0], [1], [0, 0, 1, 1], [], []>} : vector<8x32xbf16>, vector<32x32xbf16>, vector<8x32xf32> -> vector<8x32xf32>
    %c0_21 = arith.constant 0 : index
    %c0_22 = arith.constant 0 : index
    %49 = vector.load %arg6[%c0_21, %c0_22] : memref<1x32xf32, #tpu.memory_space<vmem>>, vector<1x32xf32>
    %50 = vector.broadcast %49 : vector<1x32xf32> to vector<8x32xf32>
    %51 = arith.addf %48, %50 : vector<8x32xf32>
    %52 = arith.addf %51, %1 : vector<8x32xf32>
    %c0_23 = arith.constant 0 : index
    %c0_24 = arith.constant 0 : index
    %53 = vector.load %arg7[%c0_23, %c0_24] : memref<1x32xf32, #tpu.memory_space<vmem>>, vector<1x32xf32>
    %c0_25 = arith.constant 0 : index
    %c0_26 = arith.constant 0 : index
    %54 = vector.load %arg8[%c0_25, %c0_26] : memref<1x32xf32, #tpu.memory_space<vmem>>, vector<1x32xf32>
    %cst_27 = arith.constant dense<0.000000e+00> : vector<8xf32>
    %55 = vector.multi_reduction <add>, %52, %cst_27 [1] : vector<8x32xf32> to vector<8xf32>
    %56 = vector.shape_cast %55 : vector<8xf32> to vector<8x1xf32>
    %cst_28 = arith.constant 3.200000e+01 : f32
    %57 = vector.broadcast %cst_28 : f32 to vector<8x1xf32>
    %58 = arith.divf %56, %57 : vector<8x1xf32>
    %59 = vector.broadcast %58 : vector<8x1xf32> to vector<8x32xf32>
    %60 = arith.subf %52, %59 : vector<8x32xf32>
    %61 = arith.mulf %60, %60 : vector<8x32xf32>
    %cst_29 = arith.constant dense<0.000000e+00> : vector<8xf32>
    %62 = vector.multi_reduction <add>, %61, %cst_29 [1] : vector<8x32xf32> to vector<8xf32>
    %63 = vector.shape_cast %62 : vector<8xf32> to vector<8x1xf32>
    %cst_30 = arith.constant 3.200000e+01 : f32
    %64 = vector.broadcast %cst_30 : f32 to vector<8x1xf32>
    %65 = arith.divf %63, %64 : vector<8x1xf32>
    %66 = vector.broadcast %58 : vector<8x1xf32> to vector<8x32xf32>
    %67 = arith.subf %52, %66 : vector<8x32xf32>
    %cst_31 = arith.constant 9.99999974E-6 : f32
    %68 = vector.broadcast %cst_31 : f32 to vector<8x1xf32>
    %69 = arith.addf %65, %68 : vector<8x1xf32>
    %70 = math.rsqrt %69 : vector<8x1xf32>
    %71 = vector.broadcast %70 : vector<8x1xf32> to vector<8x32xf32>
    %72 = arith.mulf %67, %71 : vector<8x32xf32>
    %73 = vector.broadcast %53 : vector<1x32xf32> to vector<8x32xf32>
    %74 = arith.mulf %72, %73 : vector<8x32xf32>
    %75 = vector.broadcast %54 : vector<1x32xf32> to vector<8x32xf32>
    %76 = arith.addf %74, %75 : vector<8x32xf32>
    %77 = arith.truncf %76 : vector<8x32xf32> to vector<8x32xbf16>
    %c0_32 = arith.constant 0 : index
    %c0_33 = arith.constant 0 : index
    %78 = vector.load %arg9[%c0_32, %c0_33] : memref<32x64xbf16, #tpu.memory_space<vmem>>, vector<32x64xbf16>
    %cst_34 = arith.constant dense<0.000000e+00> : vector<8x64xf32>
    %79 = tpu.matmul %77, %78, %cst_34 {dimension_numbers = #tpu.dot_dimension_numbers<[1], [0], [0], [1], [0, 0, 1, 1], [], []>} : vector<8x32xbf16>, vector<32x64xbf16>, vector<8x64xf32> -> vector<8x64xf32>
    %c0_35 = arith.constant 0 : index
    %c0_36 = arith.constant 0 : index
    %80 = vector.load %arg10[%c0_35, %c0_36] : memref<1x64xf32, #tpu.memory_space<vmem>>, vector<1x64xf32>
    %81 = vector.broadcast %80 : vector<1x64xf32> to vector<8x64xf32>
    %82 = arith.addf %79, %81 : vector<8x64xf32>
    %cst_37 = arith.constant 0.000000e+00 : f32
    %83 = vector.broadcast %cst_37 : f32 to vector<8x64xf32>
    %84 = arith.maximumf %82, %83 : vector<8x64xf32>
    %85 = arith.truncf %84 : vector<8x64xf32> to vector<8x64xbf16>
    %c0_38 = arith.constant 0 : index
    %c0_39 = arith.constant 0 : index
    %86 = vector.load %arg11[%c0_38, %c0_39] : memref<64x32xbf16, #tpu.memory_space<vmem>>, vector<64x32xbf16>
    %cst_40 = arith.constant dense<0.000000e+00> : vector<8x32xf32>
    %87 = tpu.matmul %85, %86, %cst_40 {dimension_numbers = #tpu.dot_dimension_numbers<[1], [0], [0], [1], [0, 0, 1, 1], [], []>} : vector<8x64xbf16>, vector<64x32xbf16>, vector<8x32xf32> -> vector<8x32xf32>
    %c0_41 = arith.constant 0 : index
    %c0_42 = arith.constant 0 : index
    %88 = vector.load %arg12[%c0_41, %c0_42] : memref<1x32xf32, #tpu.memory_space<vmem>>, vector<1x32xf32>
    %89 = vector.broadcast %88 : vector<1x32xf32> to vector<8x32xf32>
    %90 = arith.addf %87, %89 : vector<8x32xf32>
    %91 = arith.addf %90, %76 : vector<8x32xf32>
    %c0_43 = arith.constant 0 : index
    %c0_44 = arith.constant 0 : index
    %92 = vector.load %arg13[%c0_43, %c0_44] : memref<1x32xf32, #tpu.memory_space<vmem>>, vector<1x32xf32>
    %c0_45 = arith.constant 0 : index
    %c0_46 = arith.constant 0 : index
    %93 = vector.load %arg14[%c0_45, %c0_46] : memref<1x32xf32, #tpu.memory_space<vmem>>, vector<1x32xf32>
    %cst_47 = arith.constant dense<0.000000e+00> : vector<8xf32>
    %94 = vector.multi_reduction <add>, %91, %cst_47 [1] : vector<8x32xf32> to vector<8xf32>
    %95 = vector.shape_cast %94 : vector<8xf32> to vector<8x1xf32>
    %cst_48 = arith.constant 3.200000e+01 : f32
    %96 = vector.broadcast %cst_48 : f32 to vector<8x1xf32>
    %97 = arith.divf %95, %96 : vector<8x1xf32>
    %98 = vector.broadcast %97 : vector<8x1xf32> to vector<8x32xf32>
    %99 = arith.subf %91, %98 : vector<8x32xf32>
    %100 = arith.mulf %99, %99 : vector<8x32xf32>
    %cst_49 = arith.constant dense<0.000000e+00> : vector<8xf32>
    %101 = vector.multi_reduction <add>, %100, %cst_49 [1] : vector<8x32xf32> to vector<8xf32>
    %102 = vector.shape_cast %101 : vector<8xf32> to vector<8x1xf32>
    %cst_50 = arith.constant 3.200000e+01 : f32
    %103 = vector.broadcast %cst_50 : f32 to vector<8x1xf32>
    %104 = arith.divf %102, %103 : vector<8x1xf32>
    %105 = vector.broadcast %97 : vector<8x1xf32> to vector<8x32xf32>
    %106 = arith.subf %91, %105 : vector<8x32xf32>
    %cst_51 = arith.constant 9.99999974E-6 : f32
    %107 = vector.broadcast %cst_51 : f32 to vector<8x1xf32>
    %108 = arith.addf %104, %107 : vector<8x1xf32>
    %109 = math.rsqrt %108 : vector<8x1xf32>
    %110 = vector.broadcast %109 : vector<8x1xf32> to vector<8x32xf32>
    %111 = arith.mulf %106, %110 : vector<8x32xf32>
    %112 = vector.broadcast %92 : vector<1x32xf32> to vector<8x32xf32>
    %113 = arith.mulf %111, %112 : vector<8x32xf32>
    %114 = vector.broadcast %93 : vector<1x32xf32> to vector<8x32xf32>
    %115 = arith.addf %113, %114 : vector<8x32xf32>
    %c0_52 = arith.constant 0 : index
    %c0_53 = arith.constant 0 : index
    %c0_54 = arith.constant 0 : index
    %116 = vector.load %arg15[%c0_52, %c0_53, %c0_54] : memref<1x8x32xf32, #tpu.memory_space<vmem>>, vector<1x8x32xf32>
    %117 = vector.shape_cast %116 : vector<1x8x32xf32> to vector<8x32xf32>
    %118 = vector.shape_cast %115 : vector<8x32xf32> to vector<1x8x32xf32>
    tpu.vector_store %arg15[%c0_52, %c0_53, %c0_54], %118 {strides = array<i32>} : memref<1x8x32xf32, #tpu.memory_space<vmem>>, vector<1x8x32xf32>,
    return
  }
  func.func @transform_0(%arg0: i32) -> (i32, i32, i32) {
    %c0_i32 = arith.constant 0 : i32
    %c0_i32_0 = arith.constant 0 : i32
    %c0_i32_1 = arith.constant 0 : i32
    return %arg0, %c0_i32, %c0_i32_0 : i32, i32, i32
  }
  func.func @transform_1(%arg0: i32) -> (i32, i32, i32) {
    %c0_i32 = arith.constant 0 : i32
    %c0_i32_0 = arith.constant 0 : i32
    %c0_i32_1 = arith.constant 0 : i32
    return %arg0, %c0_i32, %c0_i32_0 : i32, i32, i32
  }
  func.func @transform_2(%arg0: i32) -> (i32, i32) {
    %c0_i32 = arith.constant 0 : i32
    %c0_i32_0 = arith.constant 0 : i32
    %c0_i32_1 = arith.constant 0 : i32
    return %c0_i32, %c0_i32_0 : i32, i32
  }
  func.func @transform_3(%arg0: i32) -> (i32, i32) {
    %c0_i32 = arith.constant 0 : i32
    %c0_i32_0 = arith.constant 0 : i32
    %c0_i32_1 = arith.constant 0 : i32
    return %c0_i32, %c0_i32_0 : i32, i32
  }
  func.func @transform_4(%arg0: i32) -> (i32, i32) {
    %c0_i32 = arith.constant 0 : i32
    %c0_i32_0 = arith.constant 0 : i32
    %c0_i32_1 = arith.constant 0 : i32
    return %c0_i32, %c0_i32_0 : i32, i32
  }
  func.func @transform_5(%arg0: i32) -> (i32, i32) {
    %c0_i32 = arith.constant 0 : i32
    %c0_i32_0 = arith.constant 0 : i32
    %c0_i32_1 = arith.constant 0 : i32
    return %c0_i32, %c0_i32_0 : i32, i32
  }
  func.func @transform_6(%arg0: i32) -> (i32, i32) {
    %c0_i32 = arith.constant 0 : i32
    %c0_i32_0 = arith.constant 0 : i32
    %c0_i32_1 = arith.constant 0 : i32
    return %c0_i32, %c0_i32_0 : i32, i32
  }
  func.func @transform_7(%arg0: i32) -> (i32, i32) {
    %c0_i32 = arith.constant 0 : i32
    %c0_i32_0 = arith.constant 0 : i32
    %c0_i32_1 = arith.constant 0 : i32
    return %c0_i32, %c0_i32_0 : i32, i32
  }
  func.func @transform_8(%arg0: i32) -> (i32, i32) {
    %c0_i32 = arith.constant 0 : i32
    %c0_i32_0 = arith.constant 0 : i32
    %c0_i32_1 = arith.constant 0 : i32
    return %c0_i32, %c0_i32_0 : i32, i32
  }
  func.func @transform_9(%arg0: i32) -> (i32, i32) {
    %c0_i32 = arith.constant 0 : i32
    %c0_i32_0 = arith.constant 0 : i32
    %c0_i32_1 = arith.constant 0 : i32
    return %c0_i32, %c0_i32_0 : i32, i32
  }
  func.func @transform_10(%arg0: i32) -> (i32, i32) {
    %c0_i32 = arith.constant 0 : i32
    %c0_i32_0 = arith.constant 0 : i32
    %c0_i32_1 = arith.constant 0 : i32
    return %c0_i32, %c0_i32_0 : i32, i32
  }
  func.func @transform_11(%arg0: i32) -> (i32, i32) {
    %c0_i32 = arith.constant 0 : i32
    %c0_i32_0 = arith.constant 0 : i32
    %c0_i32_1 = arith.constant 0 : i32
    return %c0_i32, %c0_i32_0 : i32, i32
  }
  func.func @transform_12(%arg0: i32) -> (i32, i32) {
    %c0_i32 = arith.constant 0 : i32
    %c0_i32_0 = arith.constant 0 : i32
    %c0_i32_1 = arith.constant 0 : i32
    return %c0_i32, %c0_i32_0 : i32, i32
  }
  func.func @transform_13(%arg0: i32) -> (i32, i32) {
    %c0_i32 = arith.constant 0 : i32
    %c0_i32_0 = arith.constant 0 : i32
    %c0_i32_1 = arith.constant 0 : i32
    return %c0_i32, %c0_i32_0 : i32, i32
  }
  func.func @transform_14(%arg0: i32) -> (i32, i32, i32) {
    %c0_i32 = arith.constant 0 : i32
    %c0_i32_0 = arith.constant 0 : i32
    %c0_i32_1 = arith.constant 0 : i32
    return %arg0, %c0_i32, %c0_i32_0 : i32, i32, i32
  }
  func.func @transform_15(%arg0: i32) -> (i32, i32, i32, i32) {
    %c0_i32 = arith.constant 0 : i32
    %c0_i32_0 = arith.constant 0 : i32
    %c0_i32_1 = arith.constant 0 : i32
    %c0_i32_2 = arith.constant 0 : i32
    return %arg0, %c0_i32, %c0_i32_0, %c0_i32_1 : i32, i32, i32, i32
  }
}

module attributes {stable_mosaic.version = 11 : i64} {
  func.func @encoder_layer_kernel(%arg0: i32, %arg1: memref<1x8x32xf32, #tpu.memory_space<vmem>>, %arg2: memref<1x8x8xbf16, #tpu.memory_space<vmem>>, %arg3: memref<32x96xbf16, #tpu.memory_space<vmem>>, %arg4: memref<1x96xf32, #tpu.memory_space<vmem>>, %arg5: memref<32x32xbf16, #tpu.memory_space<vmem>>, %arg6: memref<1x32xf32, #tpu.memory_space<vmem>>, %arg7: memref<1x32xf32, #tpu.memory_space<vmem>>, %arg8: memref<1x32xf32, #tpu.memory_space<vmem>>, %arg9: memref<32x64xbf16, #tpu.memory_space<vmem>>, %arg10: memref<1x64xf32, #tpu.memory_space<vmem>>, %arg11: memref<64x32xbf16, #tpu.memory_space<vmem>>, %arg12: memref<1x32xf32, #tpu.memory_space<vmem>>, %arg13: memref<1x32xf32, #tpu.memory_space<vmem>>, %arg14: memref<1x32xf32, #tpu.memory_space<vmem>>, %arg15: memref<1x8x32xf32, #tpu.memory_space<vmem>>, %arg16: memref<1x4x8x8xf32, #tpu.memory_space<vmem>>) attributes {dimension_semantics = [#tpu.dimension_semantics<parallel>], iteration_bounds = array<i64: 2>, scalar_prefetch = 0 : i64, scratch_operands = 0 : i64, tpu.core_type = #tpu.core_type<tc>, window_params = [{transform_indices = @transform_0, window_bounds = array<i64: 1, 8, 32>}, {transform_indices = @transform_1, window_bounds = array<i64: 1, 8, 8>}, {pipeline_mode = #tpu.pipeline_mode<synchronous>, transform_indices = @transform_2, window_bounds = array<i64: 32, 96>}, {pipeline_mode = #tpu.pipeline_mode<synchronous>, transform_indices = @transform_3, window_bounds = array<i64: 1, 96>}, {pipeline_mode = #tpu.pipeline_mode<synchronous>, transform_indices = @transform_4, window_bounds = array<i64: 32, 32>}, {pipeline_mode = #tpu.pipeline_mode<synchronous>, transform_indices = @transform_5, window_bounds = array<i64: 1, 32>}, {pipeline_mode = #tpu.pipeline_mode<synchronous>, transform_indices = @transform_6, window_bounds = array<i64: 1, 32>}, {pipeline_mode = #tpu.pipeline_mode<synchronous>, transform_indices = @transform_7, window_bounds = array<i64: 1, 32>}, {pipeline_mode = #tpu.pipeline_mode<synchronous>, transform_indices = @transform_8, window_bounds = array<i64: 32, 64>}, {pipeline_mode = #tpu.pipeline_mode<synchronous>, transform_indices = @transform_9, window_bounds = array<i64: 1, 64>}, {pipeline_mode = #tpu.pipeline_mode<synchronous>, transform_indices = @transform_10, window_bounds = array<i64: 64, 32>}, {pipeline_mode = #tpu.pipeline_mode<synchronous>, transform_indices = @transform_11, window_bounds = array<i64: 1, 32>}, {pipeline_mode = #tpu.pipeline_mode<synchronous>, transform_indices = @transform_12, window_bounds = array<i64: 1, 32>}, {pipeline_mode = #tpu.pipeline_mode<synchronous>, transform_indices = @transform_13, window_bounds = array<i64: 1, 32>}, {transform_indices = @transform_14, window_bounds = array<i64: 1, 8, 32>}, {transform_indices = @transform_15, window_bounds = array<i64: 1, 4, 8, 8>}]} {
    %c0 = arith.constant 0 : index
    %c0_0 = arith.constant 0 : index
    %c0_1 = arith.constant 0 : index
    %0 = vector.load %arg1[%c0, %c0_0, %c0_1] : memref<1x8x32xf32, #tpu.memory_space<vmem>>, vector<1x8x32xf32>
    %1 = vector.shape_cast %0 : vector<1x8x32xf32> to vector<8x32xf32>
    %c0_2 = arith.constant 0 : index
    %c0_3 = arith.constant 0 : index
    %c0_4 = arith.constant 0 : index
    %2 = vector.load %arg2[%c0_2, %c0_3, %c0_4] : memref<1x8x8xbf16, #tpu.memory_space<vmem>>, vector<1x8x8xbf16>
    %3 = vector.shape_cast %2 : vector<1x8x8xbf16> to vector<8x8xbf16>
    %4 = arith.extf %3 : vector<8x8xbf16> to vector<8x8xf32>
    %cst = arith.constant -1.000000e+09 : f32
    %5 = vector.broadcast %cst : f32 to vector<8x8xf32>
    %6 = arith.mulf %4, %5 : vector<8x8xf32>
    %7 = arith.truncf %1 : vector<8x32xf32> to vector<8x32xbf16>
    %c0_5 = arith.constant 0 : index
    %c0_6 = arith.constant 0 : index
    %8 = vector.load %arg3[%c0_5, %c0_6] : memref<32x96xbf16, #tpu.memory_space<vmem>>, vector<32x96xbf16>
    %cst_7 = arith.constant dense<0.000000e+00> : vector<8x96xf32>
    %9 = tpu.matmul %7, %8, %cst_7 {dimension_numbers = #tpu.dot_dimension_numbers<[1], [0], [0], [1], [0, 0, 1, 1], [], []>} : vector<8x32xbf16>, vector<32x96xbf16>, vector<8x96xf32> -> vector<8x96xf32>
    %c0_8 = arith.constant 0 : index
    %c0_9 = arith.constant 0 : index
    %10 = vector.load %arg4[%c0_8, %c0_9] : memref<1x96xf32, #tpu.memory_space<vmem>>, vector<1x96xf32>
    %11 = vector.broadcast %10 : vector<1x96xf32> to vector<8x96xf32>
    %12 = arith.addf %9, %11 : vector<8x96xf32>
    %13 = vector.extract_strided_slice %12 {offsets = [0, 0], sizes = [8, 32], strides = [1, 1]} : vector<8x96xf32> to vector<8x32xf32>
    %14 = vector.extract_strided_slice %12 {offsets = [0, 32], sizes = [8, 32], strides = [1, 1]} : vector<8x96xf32> to vector<8x32xf32>
    %15 = vector.extract_strided_slice %12 {offsets = [0, 64], sizes = [8, 32], strides = [1, 1]} : vector<8x96xf32> to vector<8x32xf32>
    %16 = arith.truncf %13 : vector<8x32xf32> to vector<8x32xbf16>
    %17 = vector.shape_cast %16 : vector<8x32xbf16> to vector<8x4x8xbf16>
    %18 = tpu.transpose %17, [1, 0, 2] : vector<8x4x8xbf16> -> vector<4x8x8xbf16>
    %19 = arith.truncf %14 : vector<8x32xf32> to vector<8x32xbf16>
    %20 = vector.shape_cast %19 : vector<8x32xbf16> to vector<8x4x8xbf16>
    %21 = tpu.transpose %20, [1, 0, 2] : vector<8x4x8xbf16> -> vector<4x8x8xbf16>
    %22 = arith.truncf %15 : vector<8x32xf32> to vector<8x32xbf16>
    %23 = vector.shape_cast %22 : vector<8x32xbf16> to vector<8x4x8xbf16>
    %24 = tpu.transpose %23, [1, 0, 2] : vector<8x4x8xbf16> -> vector<4x8x8xbf16>
    "tpu.trace_start"() <{level = 10 : i32, message = "hqd,hkd->hqk"}> : () -> ()
    %cst_10 = arith.constant dense<0.000000e+00> : vector<4x8x8xf32>
    %25 = tpu.matmul %18, %21, %cst_10 {dimension_numbers = #tpu.dot_dimension_numbers<[2], [2], [1], [1], [0, 0, 0, 1, 1, 1], [0], [0]>} : vector<4x8x8xbf16>, vector<4x8x8xbf16>, vector<4x8x8xf32> -> vector<4x8x8xf32>
    "tpu.trace_stop"() : () -> ()
    %26 = vector.shape_cast %6 : vector<8x8xf32> to vector<1x8x8xf32>
    %27 = vector.broadcast %26 : vector<1x8x8xf32> to vector<4x8x8xf32>
    %28 = arith.addf %25, %27 : vector<4x8x8xf32>
    %cst_11 = arith.constant dense<0xFF800000> : vector<4x8xf32>
    %29 = vector.multi_reduction <maximumf>, %28, %cst_11 [2] : vector<4x8x8xf32> to vector<4x8xf32>
    %30 = vector.shape_cast %29 : vector<4x8xf32> to vector<4x8x1xf32>
    %31 = vector.broadcast %30 : vector<4x8x1xf32> to vector<4x8x8xf32>
    %32 = arith.subf %28, %31 : vector<4x8x8xf32>
    %33 = math.exp %32 : vector<4x8x8xf32>
    %cst_12 = arith.constant dense<0.000000e+00> : vector<4x8xf32>
    %34 = vector.multi_reduction <add>, %33, %cst_12 [2] : vector<4x8x8xf32> to vector<4x8xf32>
    %35 = vector.shape_cast %34 : vector<4x8xf32> to vector<4x8x1xf32>
    %36 = tpu.reciprocal %35 : vector<4x8x1xf32> -> vector<4x8x1xf32>
    %37 = vector.broadcast %36 : vector<4x8x1xf32> to vector<4x8x8xf32>
    %38 = arith.mulf %33, %37 : vector<4x8x8xf32>
    %c0_13 = arith.constant 0 : index
    %c0_14 = arith.constant 0 : index
    %c0_15 = arith.constant 0 : index
    %c0_16 = arith.constant 0 : index
    %39 = vector.load %arg16[%c0_13, %c0_14, %c0_15, %c0_16] : memref<1x4x8x8xf32, #tpu.memory_space<vmem>>, vector<1x4x8x8xf32>
    %40 = vector.shape_cast %39 : vector<1x4x8x8xf32> to vector<4x8x8xf32>
    %41 = vector.shape_cast %38 : vector<4x8x8xf32> to vector<1x4x8x8xf32>
    tpu.vector_store %arg16[%c0_13, %c0_14, %c0_15, %c0_16], %41 {strides = array<i32>} : memref<1x4x8x8xf32, #tpu.memory_space<vmem>>, vector<1x4x8x8xf32>,
    %42 = arith.truncf %38 : vector<4x8x8xf32> to vector<4x8x8xbf16>
    "tpu.trace_start"() <{level = 10 : i32, message = "hqk,hkd->hqd"}> : () -> ()
    %cst_17 = arith.constant dense<0.000000e+00> : vector<4x8x8xf32>
    %43 = tpu.matmul %42, %24, %cst_17 {dimension_numbers = #tpu.dot_dimension_numbers<[2], [1], [1], [2], [0, 0, 0, 1, 1, 2], [0], [0]>} : vector<4x8x8xbf16>, vector<4x8x8xbf16>, vector<4x8x8xf32> -> vector<4x8x8xf32>
    "tpu.trace_stop"() : () -> ()
    %44 = arith.truncf %43 : vector<4x8x8xf32> to vector<4x8x8xbf16>
    %45 = tpu.transpose %44, [1, 0, 2] : vector<4x8x8xbf16> -> vector<8x4x8xbf16>
    %46 = vector.shape_cast %45 : vector<8x4x8xbf16> to vector<8x32xbf16>
    %c0_18 = arith.constant 0 : index
    %c0_19 = arith.constant 0 : index
    %47 = vector.load %arg5[%c0_18, %c0_19] : memref<32x32xbf16, #tpu.memory_space<vmem>>, vector<32x32xbf16>
    %cst_20 = arith.constant dense<0.000000e+00> : vector<8x32xf32>
    %48 = tpu.matmul %46, %47, %cst_20 {dimension_numbers = #tpu.dot_dimension_numbers<[1], [0], [0], [1], [0, 0, 1, 1], [], []>} : vector<8x32xbf16>, vector<32x32xbf16>, vector<8x32xf32> -> vector<8x32xf32>
    %c0_21 = arith.constant 0 : index
    %c0_22 = arith.constant 0 : index
    %49 = vector.load %arg6[%c0_21, %c0_22] : memref<1x32xf32, #tpu.memory_space<vmem>>, vector<1x32xf32>
    %50 = vector.broadcast %49 : vector<1x32xf32> to vector<8x32xf32>
    %51 = arith.addf %48, %50 : vector<8x32xf32>
    %52 = arith.addf %51, %1 : vector<8x32xf32>
    %c0_23 = arith.constant 0 : index
    %c0_24 = arith.constant 0 : index
    %53 = vector.load %arg7[%c0_23, %c0_24] : memref<1x32xf32, #tpu.memory_space<vmem>>, vector<1x32xf32>
    %c0_25 = arith.constant 0 : index
    %c0_26 = arith.constant 0 : index
    %54 = vector.load %arg8[%c0_25, %c0_26] : memref<1x32xf32, #tpu.memory_space<vmem>>, vector<1x32xf32>
    %cst_27 = arith.constant dense<0.000000e+00> : vector<8xf32>
    %55 = vector.multi_reduction <add>, %52, %cst_27 [1] : vector<8x32xf32> to vector<8xf32>
    %56 = vector.shape_cast %55 : vector<8xf32> to vector<8x1xf32>
    %cst_28 = arith.constant 3.200000e+01 : f32
    %57 = vector.broadcast %cst_28 : f32 to vector<8x1xf32>
    %58 = arith.divf %56, %57 : vector<8x1xf32>
    %59 = vector.broadcast %58 : vector<8x1xf32> to vector<8x32xf32>
    %60 = arith.subf %52, %59 : vector<8x32xf32>
    %61 = arith.mulf %60, %60 : vector<8x32xf32>
    %cst_29 = arith.constant dense<0.000000e+00> : vector<8xf32>
    %62 = vector.multi_reduction <add>, %61, %cst_29 [1] : vector<8x32xf32> to vector<8xf32>
    %63 = vector.shape_cast %62 : vector<8xf32> to vector<8x1xf32>
    %cst_30 = arith.constant 3.200000e+01 : f32
    %64 = vector.broadcast %cst_30 : f32 to vector<8x1xf32>
    %65 = arith.divf %63, %64 : vector<8x1xf32>
    %66 = vector.broadcast %58 : vector<8x1xf32> to vector<8x32xf32>
    %67 = arith.subf %52, %66 : vector<8x32xf32>
    %cst_31 = arith.constant 9.99999974E-6 : f32
    %68 = vector.broadcast %cst_31 : f32 to vector<8x1xf32>
    %69 = arith.addf %65, %68 : vector<8x1xf32>
    %70 = math.rsqrt %69 : vector<8x1xf32>
    %71 = vector.broadcast %70 : vector<8x1xf32> to vector<8x32xf32>
    %72 = arith.mulf %67, %71 : vector<8x32xf32>
    %73 = vector.broadcast %53 : vector<1x32xf32> to vector<8x32xf32>
    %74 = arith.mulf %72, %73 : vector<8x32xf32>
    %75 = vector.broadcast %54 : vector<1x32xf32> to vector<8x32xf32>
    %76 = arith.addf %74, %75 : vector<8x32xf32>
    %77 = arith.truncf %76 : vector<8x32xf32> to vector<8x32xbf16>
    %c0_32 = arith.constant 0 : index
    %c0_33 = arith.constant 0 : index
    %78 = vector.load %arg9[%c0_32, %c0_33] : memref<32x64xbf16, #tpu.memory_space<vmem>>, vector<32x64xbf16>
    %cst_34 = arith.constant dense<0.000000e+00> : vector<8x64xf32>
    %79 = tpu.matmul %77, %78, %cst_34 {dimension_numbers = #tpu.dot_dimension_numbers<[1], [0], [0], [1], [0, 0, 1, 1], [], []>} : vector<8x32xbf16>, vector<32x64xbf16>, vector<8x64xf32> -> vector<8x64xf32>
    %c0_35 = arith.constant 0 : index
    %c0_36 = arith.constant 0 : index
    %80 = vector.load %arg10[%c0_35, %c0_36] : memref<1x64xf32, #tpu.memory_space<vmem>>, vector<1x64xf32>
    %81 = vector.broadcast %80 : vector<1x64xf32> to vector<8x64xf32>
    %82 = arith.addf %79, %81 : vector<8x64xf32>
    %cst_37 = arith.constant 0.000000e+00 : f32
    %83 = vector.broadcast %cst_37 : f32 to vector<8x64xf32>
    %84 = arith.maximumf %82, %83 : vector<8x64xf32>
    %85 = arith.truncf %84 : vector<8x64xf32> to vector<8x64xbf16>
    %c0_38 = arith.constant 0 : index
    %c0_39 = arith.constant 0 : index
    %86 = vector.load %arg11[%c0_38, %c0_39] : memref<64x32xbf16, #tpu.memory_space<vmem>>, vector<64x32xbf16>
    %cst_40 = arith.constant dense<0.000000e+00> : vector<8x32xf32>
    %87 = tpu.matmul %85, %86, %cst_40 {dimension_numbers = #tpu.dot_dimension_numbers<[1], [0], [0], [1], [0, 0, 1, 1], [], []>} : vector<8x64xbf16>, vector<64x32xbf16>, vector<8x32xf32> -> vector<8x32xf32>
    %c0_41 = arith.constant 0 : index
    %c0_42 = arith.constant 0 : index
    %88 = vector.load %arg12[%c0_41, %c0_42] : memref<1x32xf32, #tpu.memory_space<vmem>>, vector<1x32xf32>
    %89 = vector.broadcast %88 : vector<1x32xf32> to vector<8x32xf32>
    %90 = arith.addf %87, %89 : vector<8x32xf32>
    %91 = arith.addf %90, %76 : vector<8x32xf32>
    %c0_43 = arith.constant 0 : index
    %c0_44 = arith.constant 0 : index
    %92 = vector.load %arg13[%c0_43, %c0_44] : memref<1x32xf32, #tpu.memory_space<vmem>>, vector<1x32xf32>
    %c0_45 = arith.constant 0 : index
    %c0_46 = arith.constant 0 : index
    %93 = vector.load %arg14[%c0_45, %c0_46] : memref<1x32xf32, #tpu.memory_space<vmem>>, vector<1x32xf32>
    %cst_47 = arith.constant dense<0.000000e+00> : vector<8xf32>
    %94 = vector.multi_reduction <add>, %91, %cst_47 [1] : vector<8x32xf32> to vector<8xf32>
    %95 = vector.shape_cast %94 : vector<8xf32> to vector<8x1xf32>
    %cst_48 = arith.constant 3.200000e+01 : f32
    %96 = vector.broadcast %cst_48 : f32 to vector<8x1xf32>
    %97 = arith.divf %95, %96 : vector<8x1xf32>
    %98 = vector.broadcast %97 : vector<8x1xf32> to vector<8x32xf32>
    %99 = arith.subf %91, %98 : vector<8x32xf32>
    %100 = arith.mulf %99, %99 : vector<8x32xf32>
    %cst_49 = arith.constant dense<0.000000e+00> : vector<8xf32>
    %101 = vector.multi_reduction <add>, %100, %cst_49 [1] : vector<8x32xf32> to vector<8xf32>
    %102 = vector.shape_cast %101 : vector<8xf32> to vector<8x1xf32>
    %cst_50 = arith.constant 3.200000e+01 : f32
    %103 = vector.broadcast %cst_50 : f32 to vector<8x1xf32>
    %104 = arith.divf %102, %103 : vector<8x1xf32>
    %105 = vector.broadcast %97 : vector<8x1xf32> to vector<8x32xf32>
    %106 = arith.subf %91, %105 : vector<8x32xf32>
    %cst_51 = arith.constant 9.99999974E-6 : f32
    %107 = vector.broadcast %cst_51 : f32 to vector<8x1xf32>
    %108 = arith.addf %104, %107 : vector<8x1xf32>
    %109 = math.rsqrt %108 : vector<8x1xf32>
    %110 = vector.broadcast %109 : vector<8x1xf32> to vector<8x32xf32>
    %111 = arith.mulf %106, %110 : vector<8x32xf32>
    %112 = vector.broadcast %92 : vector<1x32xf32> to vector<8x32xf32>
    %113 = arith.mulf %111, %112 : vector<8x32xf32>
    %114 = vector.broadcast %93 : vector<1x32xf32> to vector<8x32xf32>
    %115 = arith.addf %113, %114 : vector<8x32xf32>
    %c0_52 = arith.constant 0 : index
    %c0_53 = arith.constant 0 : index
    %c0_54 = arith.constant 0 : index
    %116 = vector.load %arg15[%c0_52, %c0_53, %c0_54] : memref<1x8x32xf32, #tpu.memory_space<vmem>>, vector<1x8x32xf32>
    %117 = vector.shape_cast %116 : vector<1x8x32xf32> to vector<8x32xf32>
    %118 = vector.shape_cast %115 : vector<8x32xf32> to vector<1x8x32xf32>
    tpu.vector_store %arg15[%c0_52, %c0_53, %c0_54], %118 {strides = array<i32>} : memref<1x8x32xf32, #tpu.memory_space<vmem>>, vector<1x8x32xf32>,
    return
  }
  func.func @transform_0(%arg0: i32) -> (i32, i32, i32) {
    %c0_i32 = arith.constant 0 : i32
    %c0_i32_0 = arith.constant 0 : i32
    %c0_i32_1 = arith.constant 0 : i32
    return %arg0, %c0_i32, %c0_i32_0 : i32, i32, i32
  }
  func.func @transform_1(%arg0: i32) -> (i32, i32, i32) {
    %c0_i32 = arith.constant 0 : i32
    %c0_i32_0 = arith.constant 0 : i32
    %c0_i32_1 = arith.constant 0 : i32
    return %arg0, %c0_i32, %c0_i32_0 : i32, i32, i32
  }
  func.func @transform_2(%arg0: i32) -> (i32, i32) {
    %c0_i32 = arith.constant 0 : i32
    %c0_i32_0 = arith.constant 0 : i32
    %c0_i32_1 = arith.constant 0 : i32
    return %c0_i32, %c0_i32_0 : i32, i32
  }
  func.func @transform_3(%arg0: i32) -> (i32, i32) {
    %c0_i32 = arith.constant 0 : i32
    %c0_i32_0 = arith.constant 0 : i32
    %c0_i32_1 = arith.constant 0 : i32
    return %c0_i32, %c0_i32_0 : i32, i32
  }
  func.func @transform_4(%arg0: i32) -> (i32, i32) {
    %c0_i32 = arith.constant 0 : i32
    %c0_i32_0 = arith.constant 0 : i32
    %c0_i32_1 = arith.constant 0 : i32
    return %c0_i32, %c0_i32_0 : i32, i32
  }
  func.func @transform_5(%arg0: i32) -> (i32, i32) {
    %c0_i32 = arith.constant 0 : i32
    %c0_i32_0 = arith.constant 0 : i32
    %c0_i32_1 = arith.constant 0 : i32
    return %c0_i32, %c0_i32_0 : i32, i32
  }
  func.func @transform_6(%arg0: i32) -> (i32, i32) {
    %c0_i32 = arith.constant 0 : i32
    %c0_i32_0 = arith.constant 0 : i32
    %c0_i32_1 = arith.constant 0 : i32
    return %c0_i32, %c0_i32_0 : i32, i32
  }
  func.func @transform_7(%arg0: i32) -> (i32, i32) {
    %c0_i32 = arith.constant 0 : i32
    %c0_i32_0 = arith.constant 0 : i32
    %c0_i32_1 = arith.constant 0 : i32
    return %c0_i32, %c0_i32_0 : i32, i32
  }
  func.func @transform_8(%arg0: i32) -> (i32, i32) {
    %c0_i32 = arith.constant 0 : i32
    %c0_i32_0 = arith.constant 0 : i32
    %c0_i32_1 = arith.constant 0 : i32
    return %c0_i32, %c0_i32_0 : i32, i32
  }
  func.func @transform_9(%arg0: i32) -> (i32, i32) {
    %c0_i32 = arith.constant 0 : i32
    %c0_i32_0 = arith.constant 0 : i32
    %c0_i32_1 = arith.constant 0 : i32
    return %c0_i32, %c0_i32_0 : i32, i32
  }
  func.func @transform_10(%arg0: i32) -> (i32, i32) {
    %c0_i32 = arith.constant 0 : i32
    %c0_i32_0 = arith.constant 0 : i32
    %c0_i32_1 = arith.constant 0 : i32
    return %c0_i32, %c0_i32_0 : i32, i32
  }
  func.func @transform_11(%arg0: i32) -> (i32, i32) {
    %c0_i32 = arith.constant 0 : i32
    %c0_i32_0 = arith.constant 0 : i32
    %c0_i32_1 = arith.constant 0 : i32
    return %c0_i32, %c0_i32_0 : i32, i32
  }
  func.func @transform_12(%arg0: i32) -> (i32, i32) {
    %c0_i32 = arith.constant 0 : i32
    %c0_i32_0 = arith.constant 0 : i32
    %c0_i32_1 = arith.constant 0 : i32
    return %c0_i32, %c0_i32_0 : i32, i32
  }
  func.func @transform_13(%arg0: i32) -> (i32, i32) {
    %c0_i32 = arith.constant 0 : i32
    %c0_i32_0 = arith.constant 0 : i32
    %c0_i32_1 = arith.constant 0 : i32
    return %c0_i32, %c0_i32_0 : i32, i32
  }
  func.func @transform_14(%arg0: i32) -> (i32, i32, i32) {
    %c0_i32 = arith.constant 0 : i32
    %c0_i32_0 = arith.constant 0 : i32
    %c0_i32_1 = arith.constant 0 : i32
    return %arg0, %c0_i32, %c0_i32_0 : i32, i32, i32
  }
  func.func @transform_15(%arg0: i32) -> (i32, i32, i32, i32) {
    %c0_i32 = arith.constant 0 : i32
    %c0_i32_0 = arith.constant 0 : i32
    %c0_i32_1 = arith.constant 0 : i32
    %c0_i32_2 = arith.constant 0 : i32
    return %arg0, %c0_i32, %c0_i32_0, %c0_i32_1 : i32, i32, i32, i32
  }
}

</mosaic_0001>

<bundles_post_ra>
// kernel: tpu_custom_call.1
= control target key start
LH: loop header
LB: loop body
LE: loop exit
PB: predicated region body
PF: predicated region fallthrough
CT: control target
= control target key end

     0   :  { %s3220_s0 = inlined_call_operand.vmem [shape: f32[2,8,32], index: 0, kind: input, shape index: {}]   ;;  %s3221_s1 = inlined_call_operand.hbm [shape: bf16[2,8,8], index: 1, kind: input, shape index: {}]   ;;  %s3222_s2 = inlined_call_operand.vmem [shape: bf16[32,96], index: 2, kind: input, shape index: {}]   ;;  %s3223_s3 = inlined_call_operand.vmem [shape: f32[1,96], index: 3, kind: input, shape index: {}]   ;;  %s3224_s4 = inlined_call_operand.vmem [shape: bf16[32,32], index: 4, kind: input, shape index: {}]   ;;  %s3225_s5 = inlined_call_operand.vmem [shape: f32[1,32], index: 5, kind: input, shape index: {}]   ;;  %s3226_s6 = inlined_call_operand.vmem [shape: f32[1,32], index: 6, kind: input, shape index: {}]   ;;  %s3227_s7 = inlined_call_operand.vmem [shape: f32[1,32], index: 7, kind: input, shape index: {}]   ;;  %s3228_s8 = inlined_call_operand.hbm [shape: bf16[32,64], index: 8, kind: input, shape index: {}]   ;;  %s3229_s9 = inlined_call_operand.vmem [shape: f32[1,64], index: 9, kind: input, shape index: {}]   ;;  %s3230_s10 = inlined_call_operand.vmem [shape: bf16[64,32], index: 10, kind: input, shape index: {}]   ;;  %s3231_s11 = inlined_call_operand.vmem [shape: f32[1,32], index: 11, kind: input, shape index: {}]   ;;  %s3232_s12 = inlined_call_operand.vmem [shape: f32[1,32], index: 12, kind: input, shape index: {}]   ;;  %s3233_s13 = inlined_call_operand.vmem [shape: f32[1,32], index: 13, kind: input, shape index: {}]   ;;  %s3234_s14 = inlined_call_operand.hbm [shape: f32[2,8,32], index: 14, kind: output, shape index: {0}]   ;;  %s3235_s15 = inlined_call_operand.hbm [shape: f32[2,4,8,8], index: 15, kind: output, shape index: {1}]  }
   0x1   :  { %3245 = sst [smem:[#allocation17_spill]] %s3220_s0 }
   0x2   :  { %3246 = sst [smem:[#allocation18_spill]] %s3221_s1 }
   0x3   :  { %3247 = sst [smem:[#allocation19_spill]] %s3231_s11 }
   0x4   :  { %3248 = sst [smem:[#allocation20_spill]] %s3232_s12 }
   0x5   :  { %3249 = sst [smem:[#allocation21_spill]] %s3233_s13 }
   0x6   :  { %3250 = sst [smem:[#allocation22_spill]] %s3234_s14 }
   0x7   :  { %3251 = sst [smem:[#allocation23_spill]] %s3235_s15 }
   0x8   :  { %21 = vsyncpa [#allocation3], 0 }
   0x9   :  { %23 = vsyncpa [#allocation3 + $0x1], 0 }
   0xa   :  { %24 = vsyncpa [#allocation6], 0 }
   0xb   :  { %25 = vsyncpa [#allocation4], 0 }
   0xc   :  { %27 = vsyncpa [#allocation4 + $0x1], 0 }
   0xd   :  { %28 = vsyncpa [#allocation9], 0 }
   0xe   :  { %30 = vsyncpa [#allocation9 + $0x1], 0  ;;  %s2706_s18 = smov 0   ;;  %s2708_s19 = smov 0  }
   0xf   :  { %s2710_s20 = smov 0   ;;  %s2712_s21 = smov 0  }
  0x10 LB: > { %3252 = sst [smem:[#allocation14_spill]] %s2592_s18  ;;  %s2727_s22 = sadd.s32 4294967295, %s2604_s21   ;;  %s2604_s21 = sphi %s2712_s21, %s3277_s21   ;;  %s2600_s20 = sphi %s2710_s20, %s3280_s20   ;;  %s2596_s19 = sphi %s2708_s19, %s3279_s19   ;;  %s2592_s18 = sphi %s2706_s18, %s3278_s18  }
  0x11   : > { %s2172_s23 = sadd.s32 4294967294, %s2604_s21   ;;  %p82_p0 = scmp.ne.s32.totalorder %s2596_s19, %s2592_s18 }
  0x12   : > { %p3241_p1 = scmp.eq.s32.totalorder %s2727_s22, 0  ;;  %p364_p3 = scmp.eq.s32.totalorder %s2172_s23, 1 }
  0x13   : > { %p2173_p5 = scmp.ge.s32.totalorder %s2604_s21, 1  ;;  %p397_p7 = scmp.lt.s32.totalorder %s2604_s21, 3 }
  0x14   : > { %p2736_p4 = por %p3241_p1, %p82_p0  ;;  %p2741_p6 = por %p364_p3, %p82_p0 }
  0x15   : > { %p2746_p8 = pnand %p2173_p5, %p397_p7  ;;  %s2606_s27 = smov [#allocation5]  }
  0x16   : > { %s3253_s24 = scalar_select %p2736_p4, 1, 0 }
  0x17   : > { %s3254_s25 = scalar_select %p2741_p6, 1, 0 }
  0x18   : > { %s3256_s26 = scalar_select %p2746_p8, 1, 0 }
  0x19   : > { %3255 = sst [smem:[#allocation15_spill]] %s3254_s25  ;;  %s427_s28 = sshll.u32 %s2606_s27, 4  ;;  %s2750_s28 = int_to_ptr.vmem [resolvable:$true] %s427_s28 }
  0x1a   : > { %p2346_p9 = pneg %p2746_p8  ;;  %s2762_s30 = sadd.s32 1, %s2604_s21  }
  0x1b   : > { %3258 = sst [smem:[#allocation16_spill]] %s2762_s30  ;;  %s69_s16 = sadd.s32 1, %s2600_s20 }
  0x1c   : > { %p2757_p11 = pnand %p2346_p9, %p3241_p1  ;;  %s66_s17 = ssub.s32 %s2604_s21, %s2762_s30 }
  0x1d   : > { %s2444_s27 = scalar_lea.hbm %s3228_s8, 256 }
  0x1e   : > { %p2445_p12 = scmp.ne.s32.totalorder %s3228_s8, %s2444_s27  ;;  %p2446_p13 = pneg %p2757_p11 }
  0x1f   : > { %p2451_p5 = scmp.lt.u32.totalorder %s2444_s27, %s3228_s8 }
  0x20   : > { %p2447_p0 = pnand %p2446_p13, %p2445_p12 }
  0x22   : > { %p2448_p3 = pneg %p2447_p0 }
  0x24   : > { %p2453_p7 = pnand %p2451_p5, %p2448_p3 }
  0x26   : > { %2456 = shalt.err (!%p2453_p7)
}
  0x27   : > { %s2457_s30 = scalar_lea.vmem %s2750_s28, 256  ;;  %p2465_p2 = scmp.lt.s32.totalorder %s2750_s28, %s2750_s28 }
  0x28   : > { %p2458_p9 = scmp.ne.s32.totalorder %s2750_s28, %s2457_s30  ;;  %p2466_p6 = scmp.lt.s32.totalorder %s2457_s30, %s2457_s30 }
  0x2a   : > { %p2460_p10 = pnand %p2458_p9, %p2446_p13  ;;  %p2467_p4 = por %p2466_p6, %p2465_p2 }
  0x2c   : > { %p2461_p1 = pneg %p2460_p10 }
  0x2e   : > { %p2468_p8 = pnand %p2467_p4, %p2461_p1 }
  0x30   : > { %2471 = shalt.err (!%p2468_p8)
}
  0x31   : > { %s2607_s14 = smov 64   ;;  %s2608_s12 = smov 4  }
  0x32   : > { %2349 = dma.hbm_to_vmem [thread:$0]  (!%p2757_p11), %s3228_s8, 256, %s2750_s28, [#allocation6], %s2607_s14, %s2607_s14, %s2608_s12  }
  0x33   : > { %p67_p2 = scmp.eq.s32.totalorder %s66_s17, 0  ;;  %p76_p1 = scmp.ne.s32.totalorder %s2600_s20, %s2596_s19 }
  0x34   : > { %p77_p4 = scmp.eq.s32.totalorder %s2604_s21, 0  ;;  %p2362_p6 = scmp.lt.s32.totalorder %s2604_s21, 2 }
  0x35   : > { %s2793_s25 = scalar_select %p67_p2, %s2600_s20, %s69_s16  }
  0x36   : > { %p78_p8 = por %p77_p4, %p76_p1  ;;  %p3259_p10 = scmp.eq.s32.totalorder %s2727_s22, 1 }
  0x37   : > { %s463_s23 = sand.u32 1, %s2600_s20   ;;  %s2177_s27 = sshll.u32 %s2604_s21, 6 }
  0x38   : > { %p2797_p12 = por %p3259_p10, %p76_p1  ;;  %s2176_s15 = sshll.u32 %s463_s23, 2 }
  0x39   : > { %s3261_s1 = sld [smem:[#allocation18_spill]]  ;;  %s467_s28 = scalar_lea.vmem [#allocation2], %s2176_s15 }
  0x3a   : > { %s474_s16 = sshll.u32 %s467_s28, 4  ;;  %p2808_p11 = pnand %p2362_p6, %p78_p8  ;;  %s2812_s16 = int_to_ptr.vmem [resolvable:$true] %s474_s16 }
  0x3b   : > { %s464_s14 = scalar_lea.sflag [#allocation3], %s463_s23 }
  0x3c   : > { %p2474_p0 = pneg %p2808_p11 }
  0x3f   : > { %s2806_s13 = scalar_lea.hbm %s3261_s1, %s2177_s27  ;;  %s2477_s18 = scalar_lea.hbm %s3261_s1, 128 }
  0x40   : > { %s2472_s12 = scalar_lea.hbm %s2806_s13, 64  ;;  %p2478_p7 = scmp.lt.u32.totalorder %s2806_s13, %s3261_s1 }
  0x41   : > { %p2473_p13 = scmp.ne.s32.totalorder %s2806_s13, %s2472_s12  ;;  %p2479_p9 = scmp.lt.u32.totalorder %s2477_s18, %s2472_s12 }
  0x42   : > { %p2481_p1 = scmp.lt.u32.totalorder %s2472_s12, %s2806_s13 }
  0x43   : > { %p2475_p3 = pnand %p2474_p0, %p2473_p13  ;;  %p2480_p2 = por %p2479_p9, %p2478_p7 }
  0x45   : > { %p2476_p5 = pneg %p2475_p3  ;;  %p2482_p4 = por %p2481_p1, %p2480_p2 }
  0x47   : > { %p2483_p6 = pnand %p2482_p4, %p2476_p5 }
  0x49   : > { %2486 = shalt.err (!%p2483_p6)
}
  0x4a   : > { %s2487_s23 = scalar_lea.vmem %s2812_s16, 64  ;;  %s2609_s28 = smov [#allocation2]  }
  0x4b   : > { %p2488_p8 = scmp.ne.s32.totalorder %s2812_s16, %s2487_s23  ;;  %s2492_s11 = sshll.u32 %s2609_s28, 4  ;;  %s2493_s11 = int_to_ptr.vmem [resolvable:$false] %s2492_s11 }
  0x4c   : > { %s2494_s15 = scalar_lea.vmem %s2493_s11, 128  ;;  %p2495_p3 = scmp.lt.s32.totalorder %s2812_s16, %s2493_s11 }
  0x4d   : > { %p2490_p10 = pnand %p2488_p8, %p2474_p0  ;;  %p2496_p7 = scmp.lt.s32.totalorder %s2494_s15, %s2487_s23 }
  0x4f   : > { %p2491_p13 = pneg %p2490_p10  ;;  %p2497_p9 = por %p2496_p7, %p2495_p3 }
  0x51   : > { %p2498_p2 = pnand %p2497_p9, %p2491_p13 }
  0x53   : > { %2501 = shalt.err (!%p2498_p2)
}
  0x54   : > { %2353 = dma.hbm_to_vmem [thread:$0]  (!%p2808_p11), %s2806_s13, 64, %s2812_s16, %s464_s14  }
  0x55   : > { %p3263_p5 = scmp.ne.s32.totalorder %s3256_s26, 0 }
  0x56   : > { %s2842_s12 = sand.u32 (!%p3263_p5), 1, %s2596_s19   ;;  %p3264_p0 = scmp.ne.s32.totalorder (!%p3263_p5), %s3253_s24, 0 }
  0x57   : > { %483 = sbr.rel (%p3263_p5) target bundleno = 2825 (0xb09), region = 76  ;;  %s2179_s18 = sshll.u32 (!%p3263_p5), %s2842_s12, 2 }
  0x58   : > { %s486_s27 = scalar_lea.sflag (!%p3263_p5), [#allocation3], %s2842_s12  ;;  %s2846_s29 = scalar_lea.vmem (!%p3263_p5), [#allocation2], %s2179_s18 }
  0x5e   : > { %2575 = dma.done.wait (%p3264_p0), %s486_s27, 64  }
  0x5f   : > { %2577 = vsyncadd (%p3264_p0), %s486_s27, 4294967232  ;;  %p3265_p11 = scmp.eq.s32.totalorder %s2727_s22, 0 }
  0x61   : > { %2579 = dma.done.wait (%p3265_p11), [#allocation6], 256   ;;  %p3266_p1 = pmov %p3265_p11 }
  0x62   : > { %p549_p4 = scmp.lt.s32.totalorder %s2727_s22, 1  ;;  %v2610_v0 = vmov 0.0   ;;  %vm2611_vm0 = vmmov 0   ;;  %s3267_s0 = sld [smem:[#allocation17_spill]]  ;;  %v2414_v1 = vld [vmem:[%s3222_s2] sm:$0xff]   ;;  %v2415_v2 = vld [vmem:[%s3222_s2 + $0x8] sm:$0xff]   ;;  %v637_v17 = vlaneseq }
  0x63   : > { %2581 = vsyncadd (%p3266_p1), [#allocation6], 4294967040  ;;  %2252 = vmatprep.subr.bf16.mxu0 %v2610_v0  ;;  %2256 = vmatprep.mubr.msk.bf16.mxu0 %vm2611_vm0, %v2610_v0  ;;  %vm582_vm1 = vcmask 261120   ;;  %v2184_v5 = vld [vmem:[%s3223_s3] ss:$0 sm:$0xff]  ;;  %s2612_s27 = smov 104  }
  0x64   : > { %s550_s26 = scalar_select %p549_p4, %s2727_s22, 1  ;;  %2260 = vmatprep.subr.bf16.mxu1 %v2610_v0  ;;  %2262 = vmatprep.mubr.msk.bf16.mxu1 %vm2611_vm0, %v2610_v0  ;;  %v2616_v15 = vmov 1983009808   ;;  %v638_v19 = vshrl.u32 %v637_v17, 7  ;;  %v2617_v20 = vmov 1934713408  }
  0x65   : > { %2253 = vmatpush3.bf16.msra.mxu0 %v2414_v1  ;;  %s2615_s13 = smov 112   ;;  %v635_v16 = vunpack.c.l.s4 %v2616_v15  ;;  %v652_v21 = vunpack.c.l.s4 %v2617_v20  ;;  %v2618_v39 = vmov 0   ;;  %vm1135_vm2 = vcmask 64512   ;;  %s2182_s16 = sshll.u32 %s2842_s12, 5 }
  0x66   : > { %s2183_s24 = sshll.u32 %s550_s26, 3  ;;  %2254 = vmatprep.subr.bf16.mxu0 %v2610_v0  ;;  %s2613_s26 = smov 120   ;;  %vm1375_vm3 = vcmask 1043456   ;;  %vm1728_vm4 = vcmask 130048   ;;  %vm1731_vm5 = vcmask 195584   ;;  %vm1938_vm6 = vcmask 523264  }
  0x67   : > { %v636_v18 = vunpack.c.0.s8 %v635_v16  ;;  %v653_v24 = vunpack.c.0.s8 %v652_v21  ;;  %s2620_s15 = smov 8   ;;  %s2621_s18 = smov 16  }
  0x68   : > { %s552_s17 = scalar_lea.vmem %s3267_s0, %s2183_s24  ;;  %s2614_s24 = smov 96  }
  0x69   : > { %v2873_v3 = vld [vmem:[%s552_s17] sm:$0xff]  ;;  %2255 = vmatpush3.bf16.msra.mxu0 %v2415_v2  ;;  %v2900_v22 = vsub.s32 %v636_v18, %v638_v19  ;;  %v2910_v28 = vsub.s32 %v653_v24, %v638_v19  ;;  %s3018_s17 = scalar_lea.vmem [#allocation8], %s2182_s16  ;;  %s3268_s28 = sld [smem:[#allocation19_spill]] }
  0x6a   : > { %v558_v4 = vpack.c.bf16 %v2873_v3, %v2873_v3  ;;  %2266 = vmatprep.subr.bf16.mxu0 %v2610_v0  ;;  %s2221_s11 = sshll.u32 %s2727_s22, 9  ;;  %s2623_s14 = smov [#allocation8]  }
  0x6b   : > { %s2506_s23 = sshll.u32 %s2623_s14, 4  ;;  %s2507_s23 = int_to_ptr.vmem [resolvable:$false] %s2506_s23 }
  0x6c   : > { %2257 = vmatmul.mubr.msk.bf16.vlgmr.msra.gmra.mrb[0].mxu0 %vm582_vm1, %v558_v4 }
  0x6d   : > { %2268 = vmatprep.mubr.msk.bf16.mxu0 %vm2611_vm0, %v2610_v0 }
 0x13f   : > { %v620_v6 = vpop.f32.mrb[0].mxu0 }
 0x140   : > { %v621_v7 = vadd.f32 %v2184_v5, %v620_v6  ;;  %v2258_v8 = vpop.f32.mrb[1].mxu0 }
 0x141   : > { %v623_v9 = vpop.f32.mrb[2].mxu0 }
 0x142   : > { %v2885_v10 = vpack.c.bf16 %v621_v7, %v621_v7  ;;  %v2259_v11 = vpop.f32.mrb[3].mxu0 }
 0x144   : > { %632 = vrot.lane.b32.xlu1 %v2885_v10, %s2612_s27  ;;  %628 = vrot.lane.b32.xlu0 %v2885_v10, %s2613_s26  ;;  %v640_v27 = vrot.slane %v2885_v10, %v2900_v22  ;;  %s2622_s27 = smov 24  }
 0x148   : > { %795 = vrot.lane.b32.xlu1 %v2885_v10, %s2614_s24  ;;  %630 = vrot.lane.b32.xlu0 %v2885_v10, %s2615_s13 }
 0x1b6   : > { %v2891_v12 = vpop.permute.xlu0 %628  ;;  %v2894_v13 = vpop.permute.xlu1 %632 }
 0x1b7   : > { %797 = vrot.lane.b32.xlu0 %v2891_v12, %s2614_s24  ;;  %v682_v23 = vrot.slane %v2894_v13, %v2900_v22  ;;  %v674_v25 = vrot.slane %v2891_v12, %v2900_v22 }
 0x1b9   : > { %v683_v29 = vcombine.low %v674_v25, %v682_v23  ;;  %v684_v32 = vcombine.high %v674_v25, %v682_v23 }
 0x1ba   : > { %v2896_v14 = vpop.permute.xlu0 %630  ;;  %v796_v38 = vpop.permute.xlu1 %795 }
 0x1bb   : > { %801 = vrot.lane.b32.xlu0 %v2894_v13, %s2614_s24  ;;  %799 = vrot.lane.b32.xlu1 %v2896_v14, %s2614_s24  ;;  %v648_v26 = vrot.slane %v2896_v14, %v2900_v22  ;;  %v2913_v33 = vrot.slane %v683_v29, %v2910_v28  ;;  %v2922_v36 = vrot.slane %v684_v32, %v2910_v28  ;;  %s3269_s24 = sld [smem:[#allocation23_spill]] }
 0x1bc   : > { %v810_v45 = vrot.slane %v796_v38, %v2900_v22 }
 0x1bd   : > { %v649_v30 = vcombine.low %v640_v27, %v648_v26  ;;  %v650_v31 = vcombine.high %v640_v27, %v648_v26  ;;  %v699_v40 = vcombine.high %v2913_v33, %v2618_v39  ;;  %v700_v43 = vcombine.high %v2922_v36, %v2618_v39 }
 0x1be   : > { %v706_v44 = vshrl.u32 %v2913_v33, 16  ;;  %v722_v48 = vshrl.u32 %v2922_v36, 16 }
 0x1bf   : > { %v2916_v34 = vrot.slane %v649_v30, %v2910_v28  ;;  %v2919_v35 = vrot.slane %v650_v31, %v2910_v28  ;;  %v714_v53 = vshrl.u32 %v699_v40, 16  ;;  %v730_v57 = vshrl.u32 %v700_v43, 16 }
 0x1c1   : > { %v665_v41 = vcombine.high %v2916_v34, %v2618_v39  ;;  %v666_v42 = vcombine.high %v2919_v35, %v2618_v39  ;;  %v705_v46 = vshrl.u32 %v2916_v34, 16  ;;  %v721_v49 = vshrl.u32 %v2919_v35, 16  ;;  %s3135_s13 = scalar_lea.hbm %s3269_s24, %s2221_s11 }
 0x1c2   : > { %v703_v58 = vpack.i.b16 %v2913_v33, %v2916_v34  ;;  %v719_v33 = vpack.i.b16 %v2922_v36, %v2919_v35 }
 0x1c3   : > { %v713_v54 = vshrl.u32 %v665_v41, 16  ;;  %v729_v55 = vshrl.u32 %v666_v42, 16  ;;  %v707_v61 = vpack.i.b16 %v706_v44, %v705_v46  ;;  %v711_v62 = vpack.i.b16 %v699_v40, %v665_v41 }
 0x1c4   : > { %v723_v2 = vpack.i.b16 %v722_v48, %v721_v49  ;;  %v727_v4 = vpack.i.b16 %v700_v43, %v666_v42  ;;  %v733_v48 = vcombine.low %v703_v58, %v719_v33 }
 0x1c5   : > { %v715_v7 = vpack.i.b16 %v714_v53, %v713_v54  ;;  %v731_v8 = vpack.i.b16 %v730_v57, %v729_v55 }
 0x1c6   : > { %v741_v43 = vcombine.low %v711_v62, %v727_v4  ;;  %v758_v46 = vcombine.low %v707_v61, %v723_v2  ;;  %v740_v57 = vrot.slane %v733_v48, %v2900_v22 }
 0x1c7   : > { %v766_v42 = vcombine.low %v715_v7, %v731_v8 }
 0x1c8   : > { %v748_v53 = vrot.slane %v741_v43, %v2900_v22  ;;  %v765_v55 = vrot.slane %v758_v46, %v2900_v22 }
 0x1c9   : > { %v773_v36 = vrot.slane %v766_v42, %v2900_v22 }
 0x229   : > { %v798_v37 = vpop.permute.xlu0 %797 }
 0x22a   : > { %v844_v50 = vrot.slane %v798_v37, %v2900_v22 }
 0x22d   : > { %v802_v47 = vpop.permute.xlu0 %801  ;;  %v800_v51 = vpop.permute.xlu1 %799 }
 0x22e   : > { %v852_v52 = vrot.slane %v802_v47, %v2900_v22  ;;  %v818_v56 = vrot.slane %v800_v51, %v2900_v22 }
 0x230   : > { %v853_v59 = vcombine.low %v844_v50, %v852_v52  ;;  %v854_v60 = vcombine.high %v844_v50, %v852_v52  ;;  %v819_v63 = vcombine.low %v810_v45, %v818_v56  ;;  %v820_v1 = vcombine.high %v810_v45, %v818_v56 }
 0x232   : > { %v861_v5 = vrot.slane %v853_v59, %v2910_v28  ;;  %v868_v6 = vrot.slane %v854_v60, %v2910_v28  ;;  %v827_v9 = vrot.slane %v819_v63, %v2910_v28  ;;  %v834_v11 = vrot.slane %v820_v1, %v2910_v28 }
 0x233   : > { %v774_v59 = vcombine.low %v765_v55, %v773_v36  ;;  %v749_v60 = vcombine.low %v740_v57, %v748_v53 }
 0x234   : > { %v869_v15 = vcombine.high %v861_v5, %v2618_v39  ;;  %v870_v16 = vcombine.high %v868_v6, %v2618_v39  ;;  %v876_v17 = vshrl.u32 %v861_v5, 16  ;;  %v892_v18 = vshrl.u32 %v868_v6, 16 }
 0x235   : > { %v835_v19 = vcombine.high %v827_v9, %v2618_v39  ;;  %v836_v20 = vcombine.high %v834_v11, %v2618_v39  ;;  %v875_v21 = vshrl.u32 %v827_v9, 16  ;;  %v891_v23 = vshrl.u32 %v834_v11, 16 }
 0x236   : > { %v873_v24 = vpack.i.b16 %v861_v5, %v827_v9  ;;  %v884_v25 = vshrl.u32 %v869_v15, 16  ;;  %v889_v26 = vpack.i.b16 %v868_v6, %v834_v11  ;;  %v900_v27 = vshrl.u32 %v870_v16, 16 }
 0x237   : > { %v883_v29 = vshrl.u32 %v835_v19, 16  ;;  %v899_v30 = vshrl.u32 %v836_v20, 16  ;;  %v877_v31 = vpack.i.b16 %v876_v17, %v875_v21  ;;  %v881_v32 = vpack.i.b16 %v869_v15, %v835_v19 }
 0x238   : > { %v893_v34 = vpack.i.b16 %v892_v18, %v891_v23  ;;  %v897_v37 = vpack.i.b16 %v870_v16, %v836_v20  ;;  %v903_v38 = vcombine.low %v873_v24, %v889_v26  ;;  %v781_v5 = vrot.slane %v774_v59, %v2910_v28 }
 0x239   : > { %v885_v40 = vpack.i.b16 %v884_v25, %v883_v29  ;;  %v901_v41 = vpack.i.b16 %v900_v27, %v899_v30  ;;  %v756_v8 = vrot.slane %v749_v60, %v2910_v28 }
 0x23a   : > { %v911_v44 = vcombine.low %v881_v32, %v897_v37  ;;  %v928_v45 = vcombine.low %v877_v31, %v893_v34  ;;  %v910_v49 = vrot.slane %v903_v38, %v2900_v22  ;;  %v787_v15 = vshrl.u32 %v781_v5, 16  ;;  %v555_v31 = vld [vmem:[%s2846_s29] sm:$0xf]  ;;  %s2619_s29 = smov 64  }
 0x23b   : > { %v936_v47 = vcombine.low %v885_v40, %v901_v41  ;;  %v785_v17 = vpack.i.b16 %v781_v5, %v756_v8  ;;  %v786_v18 = vshrl.u32 %v756_v8, 16  ;;  %v782_v23 = vcombine.high %v781_v5, %v2618_v39 }
 0x23c   : > { %v918_v50 = vrot.slane %v911_v44, %v2900_v22  ;;  %v935_v51 = vrot.slane %v928_v45, %v2900_v22  ;;  %v757_v25 = vcombine.high %v756_v8, %v2618_v39  ;;  %v556_v32 = vunpack.c.l.bf16 %v555_v31 }
 0x23d   : > { %v943_v35 = vrot.slane %v936_v47, %v2900_v22  ;;  %v788_v21 = vpack.i.b16 %v787_v15, %v786_v18  ;;  %v793_v26 = vshrl.u32 %v782_v23, 16 }
 0x23e   : > { %v919_v52 = vcombine.low %v910_v49, %v918_v50  ;;  %v791_v27 = vpack.i.b16 %v782_v23, %v757_v25  ;;  %v792_v29 = vshrl.u32 %v757_v25, 16  ;;  %v557_v33 = vmul.f32 -1e+09, %v556_v32 }
 0x23f   : > { %v944_v54 = vcombine.low %v935_v51, %v943_v35 }
 0x240   : > { %v926_v56 = vrot.slane %v919_v52, %v2910_v28  ;;  %v794_v30 = vpack.i.b16 %v793_v26, %v792_v29 }
 0x241   : > { %v951_v58 = vrot.slane %v944_v54, %v2910_v28 }
 0x242   : > { %v956_v62 = vshrl.u32 %v926_v56, 16  ;;  %v927_v6 = vcombine.high %v926_v56, %v2618_v39 }
 0x243   : > { %v955_v61 = vpack.i.b16 %v951_v58, %v926_v56  ;;  %v957_v63 = vshrl.u32 %v951_v58, 16  ;;  %v952_v1 = vcombine.high %v951_v58, %v2618_v39 }
 0x244   : > { %v962_v16 = vshrl.u32 %v927_v6, 16 }
 0x245   : > { %v1140_v2 = vsel %vm1135_vm2, %v955_v61, 0  ;;  %v958_v4 = vpack.i.b16 %v957_v63, %v956_v62  ;;  %v963_v9 = vshrl.u32 %v952_v1, 16  ;;  %v961_v11 = vpack.i.b16 %v952_v1, %v927_v6 }
 0x246   : > { %2261 = vmatpush3.bf16.xpose.msra.mxu1 %v1140_v2 }
 0x247   : > { %v1186_v7 = vsel %vm1135_vm2, %v958_v4, 0  ;;  %2272 = vmatprep.subr.bf16.mxu1 %v2610_v0  ;;  %v964_v19 = vpack.i.b16 %v963_v9, %v962_v16  ;;  %v1232_v20 = vsel %vm1135_vm2, %v961_v11, 0 }
 0x248   : > { %2267 = vmatpush3.bf16.xpose.msra.mxu0 %v1186_v7 }
 0x249   : > { %2278 = vmatprep.subr.bf16.mxu0 %v2610_v0  ;;  %v1278_v24 = vsel %vm1135_vm2, %v964_v19, 0 }
 0x24d   : > { %2263 = vmatmul.mubr.msk.bf16.vlgmr.msra.gmra.mrb[0].mxu1 %vm1135_vm2, %v785_v17 }
 0x24e   : > { %2273 = vmatpush3.bf16.xpose.msra.mxu1 %v1232_v20  ;;  %2274 = vmatprep.mubr.msk.bf16.mxu1 %vm2611_vm0, %v2610_v0 }
 0x24f   : > { %2269 = vmatmul.mubr.msk.bf16.vlgmr.msra.gmra.mrb[4].mxu0 %vm1135_vm2, %v788_v21  ;;  %2284 = vmatprep.subr.bf16.mxu1 %v2610_v0 }
 0x250   : > { %2279 = vmatpush3.bf16.xpose.msra.mxu0 %v1278_v24  ;;  %2280 = vmatprep.mubr.msk.bf16.mxu0 %vm2611_vm0, %v2610_v0 }
 0x251   : > { %2290 = vmatprep.subr.bf16.mxu0 %v2610_v0 }
 0x255   : > { %2275 = vmatmul.mubr.msk.bf16.vlgmr.msra.gmra.mrb[4].mxu1 %vm1135_vm2, %v791_v27 }
 0x256   : > { %2286 = vmatprep.mubr.msk.bf16.mxu1 %vm2611_vm0, %v2610_v0 }
 0x257   : > { %2281 = vmatmul.mubr.msk.bf16.vlgmr.msra.gmra.mrb[8].mxu0 %vm1135_vm2, %v794_v30 }
 0x258   : > { %2292 = vmatprep.mubr.msk.bf16.mxu0 %vm2611_vm0, %v2610_v0 }
 0x320   : > { %v1176_v34 = vpop.f32.mrb[0].mxu1 }
 0x321   : > { %v1177_v37 = vadd.f32 %v1176_v34, %v557_v33  ;;  %v2264_v38 = vpop.f32.mrb[1].mxu1 }
 0x322   : > { %v1179_v40 = vpop.f32.mrb[2].mxu1  ;;  %v1222_v41 = vpop.f32.mrb[4].mxu0 }
 0x323   : > { %v1223_v42 = vadd.f32 %v1222_v41, %v557_v33  ;;  %v2265_v43 = vpop.f32.mrb[3].mxu1  ;;  %v2270_v44 = vpop.f32.mrb[5].mxu0  ;;  %v1320_v45 = vsel %vm1135_vm2, %v1177_v37, -inf }
 0x324   : > { %1321 = vmax.xlane.f32.xlu1 %v1320_v45  ;;  %v1225_v46 = vpop.f32.mrb[6].mxu0 }
 0x325   : > { %v2271_v47 = vpop.f32.mrb[7].mxu0  ;;  %v1323_v48 = vsel %vm1135_vm2, %v1223_v42, -inf }
 0x326   : > { %1324 = vmax.xlane.f32.xlu0 %v1323_v48 }
 0x328   : > { %v1268_v49 = vpop.f32.mrb[4].mxu1 }
 0x329   : > { %v1269_v50 = vadd.f32 %v1268_v49, %v557_v33  ;;  %v2276_v51 = vpop.f32.mrb[5].mxu1 }
 0x32a   : > { %v1271_v35 = vpop.f32.mrb[6].mxu1  ;;  %v1314_v36 = vpop.f32.mrb[8].mxu0 }
 0x32b   : > { %v1315_v52 = vadd.f32 %v1314_v36, %v557_v33  ;;  %v2277_v53 = vpop.f32.mrb[7].mxu1  ;;  %v2282_v54 = vpop.f32.mrb[9].mxu0  ;;  %v1326_v55 = vsel %vm1135_vm2, %v1269_v50, -inf }
 0x32c   : > { %1327 = vmax.xlane.f32.xlu0 %v1326_v55  ;;  %v1317_v56 = vpop.f32.mrb[10].mxu0 }
 0x32d   : > { %v2283_v57 = vpop.f32.mrb[11].mxu0  ;;  %v1329_v58 = vsel %vm1135_vm2, %v1315_v52, -inf }
 0x32e   : > { %1330 = vmax.xlane.f32.xlu1 %v1329_v58 }
 0x33f   : > { %967 = vrot.lane.b32.xlu1 %v2891_v12, %s2619_s29 }
 0x342   : > { %965 = vrot.lane.b32.xlu0 %v2885_v10, %s2619_s29 }
 0x3b1   : > { %v1322_v59 = vpop.xlane.xlu1 %1321 }
 0x3b2   : > { %v1332_v60 = vsub.f32 %v1177_v37, %v1322_v59 }
 0x3b3   : > { %v1325_v61 = vpop.xlane.xlu0 %1324 }
 0x3b4   : > { %v1336_v62 = vmul.f32 1.442695, %v1332_v60  ;;  %v1333_v63 = vsub.f32 %v1223_v42, %v1325_v61 }
 0x3b6   : > { %2424 = vpow2.f32 %v1336_v62  ;;  %v1338_v1 = vmul.f32 1.442695, %v1333_v63 }
 0x3b8   : > { %2426 = vpow2.f32 %v1338_v1 }
 0x3b9   : > { %v1328_v12 = vpop.xlane.xlu0 %1327 }
 0x3ba   : > { %v1334_v8 = vsub.f32 %v1269_v50, %v1328_v12 }
 0x3bb   : > { %v1331_v10 = vpop.xlane.xlu1 %1330 }
 0x3bc   : > { %v1335_v7 = vsub.f32 %v1315_v52, %v1331_v10  ;;  %v1340_v11 = vmul.f32 1.442695, %v1334_v8 }
 0x3be   : > { %v1342_v9 = vmul.f32 1.442695, %v1335_v7 }
 0x3bf   : > { %v968_v18 = vpop.permute.xlu1 %967 }
 0x3c0   : > { %v2425_v2 = vpop.eup %2424  ;;  %2428 = vpow2.f32 %v1342_v9  ;;  %v1014_v23 = vrot.slane %v968_v18, %v2900_v22 }
 0x3c1   : > { %v1344_v4 = vsel %vm1135_vm2, %v2425_v2, 0.0  ;;  %2430 = vpow2.f32 %v1340_v11 }
 0x3c2   : > { %v2427_v5 = vpop.eup %2426  ;;  %1345 = vadd.xlane.f32.xlu0 %v1344_v4 }
 0x3c3   : > { %v1347_v6 = vsel %vm1135_vm2, %v2427_v5, 0.0 }
 0x3c4   : > { %1348 = vadd.xlane.f32.xlu1 %v1347_v6 }
 0x3ca   : > { %v2999_v15 = vpop.eup %2428 }
 0x3cb   : > { %v3001_v16 = vpop.eup %2430  ;;  %v1353_v17 = vsel %vm1135_vm2, %v2999_v15, 0.0 }
 0x3d5   : > { %969 = vrot.lane.b32.xlu1 %v2896_v14, %s2619_s29  ;;  %v1350_v14 = vsel %vm1135_vm2, %v3001_v16, 0.0 }
 0x3d8   : > { %971 = vrot.lane.b32.xlu0 %v2894_v13, %s2619_s29  ;;  %v966_v13 = vpop.permute.xlu0 %965  ;;  %s2019_s29 = scalar_lea.sflag [#allocation9], %s2842_s12 }
 0x3d9   : > { %v980_v26 = vrot.slane %v966_v13, %v2900_v22 }
 0x3f7   : > { %1354 = vadd.xlane.f32.xlu0 %v1353_v17 }
 0x3f9   : > { %1351 = vadd.xlane.f32.xlu1 %v1350_v14 }
 0x44f   : > { %v1346_v19 = vpop.xlane.xlu0 %1345 }
 0x450   : > { %2432 = vrcp.f32 %v1346_v19 }
 0x451   : > { %v1349_v20 = vpop.xlane.xlu1 %1348 }
 0x452   : > { %2434 = vrcp.f32 %v1349_v20 }
 0x453   : > { %v972_v21 = vpop.permute.xlu0 %971 }
 0x454   : > { %v1022_v24 = vrot.slane %v972_v21, %v2900_v22 }
 0x455   : > { %v970_v25 = vpop.permute.xlu1 %969 }
 0x456   : > { %v1023_v27 = vcombine.low %v1014_v23, %v1022_v24  ;;  %v1024_v29 = vcombine.high %v1014_v23, %v1022_v24  ;;  %v988_v30 = vrot.slane %v970_v25, %v2900_v22 }
 0x458   : > { %v1031_v31 = vrot.slane %v1023_v27, %v2910_v28  ;;  %v1038_v32 = vrot.slane %v1024_v29, %v2910_v28  ;;  %v989_v33 = vcombine.low %v980_v26, %v988_v30  ;;  %v990_v34 = vcombine.high %v980_v26, %v988_v30 }
 0x45a   : > { %v2433_v37 = vpop.eup %2432  ;;  %v1039_v38 = vcombine.high %v1031_v31, %v2618_v39  ;;  %v1040_v40 = vcombine.high %v1038_v32, %v2618_v39  ;;  %v997_v42 = vrot.slane %v989_v33, %v2910_v28  ;;  %v1004_v43 = vrot.slane %v990_v34, %v2910_v28 }
 0x45b   : > { %v1360_v41 = vmul.f32 %v2433_v37, %v2425_v2  ;;  %v1046_v45 = vshrl.u32 %v1031_v31, 16  ;;  %v1062_v47 = vshrl.u32 %v1038_v32, 16 }
 0x45c   : > { %v2435_v44 = vpop.eup %2434  ;;  %v1054_v46 = vshrl.u32 %v1039_v38, 16  ;;  %v1005_v49 = vcombine.high %v997_v42, %v2618_v39  ;;  %v1006_v50 = vcombine.high %v1004_v43, %v2618_v39  ;;  %v1043_v51 = vpack.i.b16 %v1031_v31, %v997_v42 }
 0x45d   : > { %1364 = vst.msk [vmem:[%s3018_s17] sm:$0xff] %vm1135_vm2, %v1360_v41  ;;  %v1361_v48 = vmul.f32 %v2435_v44, %v2427_v5  ;;  %v1070_v35 = vshrl.u32 %v1040_v40, 16  ;;  %v1045_v36 = vshrl.u32 %v997_v42, 16  ;;  %v1059_v52 = vpack.i.b16 %v1038_v32, %v1004_v43 }
 0x45e   : > { %v1061_v53 = vshrl.u32 %v1004_v43, 16  ;;  %v1051_v54 = vpack.i.b16 %v1039_v38, %v1005_v49  ;;  %v1053_v55 = vshrl.u32 %v1005_v49, 16  ;;  %v1067_v56 = vpack.i.b16 %v1040_v40, %v1006_v50 }
 0x45f   : > { %1365 = vst.msk [vmem:[%s3018_s17 + $0x8] sm:$0xff] %vm1135_vm2, %v1361_v48  ;;  %v1069_v57 = vshrl.u32 %v1006_v50, 16  ;;  %v1047_v58 = vpack.i.b16 %v1046_v45, %v1045_v36  ;;  %v1073_v60 = vcombine.low %v1043_v51, %v1059_v52  ;;  %v1368_v26 = vpack.c.bf16 %v1360_v41, %v1360_v41 }
 0x460   : > { %v1063_v59 = vpack.i.b16 %v1062_v47, %v1061_v53  ;;  %v1055_v61 = vpack.i.b16 %v1054_v46, %v1053_v55  ;;  %v1081_v63 = vcombine.low %v1051_v54, %v1067_v56  ;;  %v1369_v30 = vpack.c.bf16 %v1361_v48, %v1361_v48 }
 0x461   : > { %v1071_v62 = vpack.i.b16 %v1070_v35, %v1069_v57  ;;  %v1080_v2 = vrot.slane %v1073_v60, %v2900_v22 }
 0x462   : > { %v1098_v1 = vcombine.low %v1047_v58, %v1063_v59  ;;  %v1088_v5 = vrot.slane %v1081_v63, %v2900_v22 }
 0x463   : > { %v1106_v4 = vcombine.low %v1055_v61, %v1071_v62 }
 0x464   : > { %v1089_v6 = vcombine.low %v1080_v2, %v1088_v5  ;;  %v1105_v10 = vrot.slane %v1098_v1, %v2900_v22 }
 0x465   : > { %v1113_v12 = vrot.slane %v1106_v4, %v2900_v22 }
 0x466   : > { %v1096_v7 = vrot.slane %v1089_v6, %v2910_v28 }
 0x467   : > { %v1114_v8 = vcombine.low %v1105_v10, %v1113_v12 }
 0x468   : > { %v1097_v11 = vcombine.high %v1096_v7, %v2618_v39  ;;  %v1126_v14 = vshrl.u32 %v1096_v7, 16 }
 0x469   : > { %v1121_v9 = vrot.slane %v1114_v8, %v2910_v28 }
 0x46a   : > { %v1132_v19 = vshrl.u32 %v1097_v11, 16 }
 0x46b   : > { %v1125_v17 = vpack.i.b16 %v1121_v9, %v1096_v7  ;;  %v1127_v13 = vshrl.u32 %v1121_v9, 16  ;;  %v1122_v18 = vcombine.high %v1121_v9, %v2618_v39 }
 0x46d   : > { %v1377_v20 = vsel %vm1375_vm3, %v1125_v17, 0  ;;  %v1128_v21 = vpack.i.b16 %v1127_v13, %v1126_v14  ;;  %v1131_v23 = vpack.i.b16 %v1122_v18, %v1097_v11  ;;  %v1133_v24 = vshrl.u32 %v1122_v18, 16 }
 0x46e   : > { %2285 = vmatpush3.bf16.msra.mxu1 %v1377_v20 }
 0x46f   : > { %v1423_v25 = vsel %vm1375_vm3, %v1128_v21, 0  ;;  %2296 = vmatprep.subr.bf16.mxu1 %v2610_v0  ;;  %v1134_v27 = vpack.i.b16 %v1133_v24, %v1132_v19  ;;  %v1469_v29 = vsel %vm1375_vm3, %v1131_v23, 0 }
 0x470   : > { %2291 = vmatpush3.bf16.msra.mxu0 %v1423_v25 }
 0x471   : > { %2287 = vmatmul.mubr.msk.bf16.vlgmr.msra.gmra.mrb[8].mxu1 %vm1135_vm2, %v1368_v26  ;;  %2302 = vmatprep.subr.bf16.mxu0 %v2610_v0  ;;  %v1515_v31 = vsel %vm1375_vm3, %v1134_v27, 0 }
 0x472   : > { %2297 = vmatpush3.bf16.msra.mxu1 %v1469_v29  ;;  %2298 = vmatprep.mubr.msk.bf16.mxu1 %vm2611_vm0, %v2610_v0 }
 0x473   : > { %2293 = vmatmul.mubr.msk.bf16.vlgmr.msra.gmra.mrb[12].mxu0 %vm1135_vm2, %v1369_v30  ;;  %2308 = vmatprep.subr.bf16.mxu1 %v2610_v0 }
 0x474   : > { %2303 = vmatpush3.bf16.msra.mxu0 %v1515_v31  ;;  %2304 = vmatprep.mubr.msk.bf16.mxu0 %vm2611_vm0, %v2610_v0 }
 0x475   : > { %2316 = vmatprep.subr.bf16.mxu0 %v2610_v0 }
 0x484   : > { %v1355_v32 = vpop.xlane.xlu0 %1354 }
 0x485   : > { %2436 = vrcp.f32 %v1355_v32 }
 0x486   : > { %v1352_v33 = vpop.xlane.xlu1 %1351 }
 0x487   : > { %2438 = vrcp.f32 %v1352_v33 }
 0x48f   : > { %v2437_v34 = vpop.eup %2436 }
 0x490   : > { %v1363_v37 = vmul.f32 %v2437_v34, %v2999_v15  ;;  %v2416_v15 = vld [vmem:[%s3224_s4] sm:$0xff]  }
 0x491   : > { %v2439_v38 = vpop.eup %2438 }
 0x492   : > { %1367 = vst.msk [vmem:[%s3018_s17 + $0x18] sm:$0xff] %vm1135_vm2, %v1363_v37  ;;  %v1362_v40 = vmul.f32 %v2439_v38, %v3001_v16  ;;  %v1371_v41 = vpack.c.bf16 %v1363_v37, %v1363_v37 }
 0x494   : > { %1366 = vst.msk [vmem:[%s3018_s17 + $0x10] sm:$0xff] %vm1135_vm2, %v1362_v40  ;;  %2305 = vmatmul.mubr.msk.bf16.vlgmr.msra.gmra.mrb[16].mxu0 %vm1135_vm2, %v1371_v41  ;;  %v1370_v42 = vpack.c.bf16 %v1362_v40, %v1362_v40 }
 0x495   : > { %2320 = vmatprep.mubr.msk.bf16.mxu0 %vm2611_vm0, %v2610_v0 }
 0x496   : > { %2299 = vmatmul.mubr.msk.bf16.vlgmr.msra.gmra.mrb[12].mxu1 %vm1135_vm2, %v1370_v42  ;;  %v2417_v42 = vld [vmem:[%s3224_s4 + $0x8] sm:$0xff]  }
 0x497   : > { %2312 = vmatprep.mubr.msk.bf16.mxu1 %vm2611_vm0, %v2610_v0  ;;  %2309 = vmatpush3.bf16.msra.mxu1 %v2416_v15 }
 0x498   : > { %2310 = vmatprep.subr.bf16.mxu1 %v2610_v0 }
 0x49b   : > { %2311 = vmatpush3.bf16.msra.mxu1 %v2417_v42 }
 0x49c   : > { %2324 = vmatprep.subr.bf16.mxu1 %v2610_v0 }
 0x544   : > { %v1413_v16 = vpop.f32.mrb[8].mxu1 }
 0x545   : > { %v2288_v43 = vpop.f32.mrb[9].mxu1  ;;  %v1557_v35 = vpack.c.bf16 %v1413_v16, %v1413_v16 }
 0x546   : > { %v1416_v44 = vpop.f32.mrb[10].mxu1  ;;  %v1459_v45 = vpop.f32.mrb[12].mxu0 }
 0x547   : > { %v2289_v46 = vpop.f32.mrb[11].mxu1  ;;  %v2294_v47 = vpop.f32.mrb[13].mxu0  ;;  %v1591_v50 = vpack.c.bf16 %v1459_v45, %v1459_v45  ;;  %v1564_v61 = vrot.slane %v1557_v35, %v2900_v22 }
 0x548   : > { %v1462_v48 = vpop.f32.mrb[14].mxu0 }
 0x549   : > { %v2295_v49 = vpop.f32.mrb[15].mxu0  ;;  %v1598_v55 = vrot.slane %v1591_v50, %v2900_v22 }
 0x567   : > { %v1551_v51 = vpop.f32.mrb[16].mxu0 }
 0x568   : > { %v1599_v36 = vpack.c.bf16 %v1551_v51, %v1551_v51  ;;  %v2306_v52 = vpop.f32.mrb[17].mxu0 }
 0x569   : > { %v1505_v53 = vpop.f32.mrb[12].mxu1  ;;  %v1554_v54 = vpop.f32.mrb[18].mxu0 }
 0x56a   : > { %v1606_v56 = vrot.slane %v1599_v36, %v2900_v22  ;;  %v1565_v57 = vpack.c.bf16 %v1505_v53, %v1505_v53  ;;  %v2300_v58 = vpop.f32.mrb[13].mxu1  ;;  %v2307_v59 = vpop.f32.mrb[19].mxu0 }
 0x56b   : > { %v1508_v60 = vpop.f32.mrb[14].mxu1  ;;  %v2196_v59 = vld [vmem:[%s3225_s5] ss:$0 sm:$0xff] }
 0x56c   : > { %v1607_v62 = vcombine.low %v1598_v55, %v1606_v56  ;;  %v1608_v63 = vcombine.high %v1598_v55, %v1606_v56  ;;  %v1572_v1 = vrot.slane %v1565_v57, %v2900_v22  ;;  %v2301_v2 = vpop.f32.mrb[15].mxu1 }
 0x56e   : > { %v1615_v4 = vrot.slane %v1607_v62, %v2910_v28  ;;  %v1622_v5 = vrot.slane %v1608_v63, %v2910_v28  ;;  %v1573_v6 = vcombine.low %v1564_v61, %v1572_v1  ;;  %v1574_v10 = vcombine.high %v1564_v61, %v1572_v1 }
 0x570   : > { %v1623_v12 = vcombine.high %v1615_v4, %v2618_v39  ;;  %v1581_v7 = vrot.slane %v1573_v6, %v2910_v28  ;;  %v1588_v8 = vrot.slane %v1574_v10, %v2910_v28  ;;  %v1624_v9 = vcombine.high %v1622_v5, %v2618_v39 }
 0x571   : > { %v1630_v11 = vshrl.u32 %v1615_v4, 16  ;;  %v1646_v20 = vshrl.u32 %v1622_v5, 16 }
 0x572   : > { %v1589_v17 = vcombine.high %v1581_v7, %v2618_v39  ;;  %v1590_v14 = vcombine.high %v1588_v8, %v2618_v39  ;;  %v1627_v13 = vpack.i.b16 %v1615_v4, %v1581_v7  ;;  %v1629_v18 = vshrl.u32 %v1581_v7, 16 }
 0x573   : > { %v1638_v19 = vshrl.u32 %v1623_v12, 16  ;;  %v1643_v21 = vpack.i.b16 %v1622_v5, %v1588_v8  ;;  %v1645_v23 = vshrl.u32 %v1588_v8, 16  ;;  %v1654_v29 = vshrl.u32 %v1624_v9, 16  ;;  %v2418_v8 = vld [vmem:[#allocation5] sm:$0xff]  }
 0x574   : > { %v1631_v24 = vpack.i.b16 %v1630_v11, %v1629_v18  ;;  %v1635_v25 = vpack.i.b16 %v1623_v12, %v1589_v17  ;;  %v1637_v26 = vshrl.u32 %v1589_v17, 16  ;;  %v1651_v27 = vpack.i.b16 %v1624_v9, %v1590_v14  ;;  %2317 = vmatpush3.bf16.msra.mxu0 %v2418_v8  ;;  %v2419_v9 = vld [vmem:[#allocation5 + $0x8] sm:$0xff]   ;;  %v2421_v11 = vld [vmem:[%s3230_s10 + $0x8] sm:$0xff]  }
 0x575   : > { %v1647_v30 = vpack.i.b16 %v1646_v20, %v1645_v23  ;;  %v1653_v31 = vshrl.u32 %v1590_v14, 16  ;;  %v1657_v32 = vcombine.low %v1627_v13, %v1643_v21  ;;  %2318 = vmatprep.subr.bf16.mxu0 %v2610_v0  ;;  %v2201_v21 = vld [vmem:[%s3227_s7] ss:$0 sm:$0xff] }
 0x576   : > { %v1639_v33 = vpack.i.b16 %v1638_v19, %v1637_v26  ;;  %v1665_v34 = vcombine.low %v1635_v25, %v1651_v27  ;;  %v2200_v19 = vld [vmem:[%s3226_s6] ss:$0 sm:$0xff]  ;;  %v2422_v26 = vld [vmem:[%s3230_s10 + $0x10] sm:$0xff]   ;;  %v2423_v27 = vld [vmem:[%s3230_s10 + $0x18] sm:$0xff]  }
 0x577   : > { %v1655_v37 = vpack.i.b16 %v1654_v29, %v1653_v31  ;;  %v1682_v38 = vcombine.low %v1631_v24, %v1647_v30  ;;  %v1664_v40 = vrot.slane %v1657_v32, %v2900_v22  ;;  %v2202_v29 = vld [vmem:[%s3229_s9] ss:$0 sm:$0xff] }
 0x578   : > { %v1672_v41 = vrot.slane %v1665_v34, %v2900_v22  ;;  %2319 = vmatpush3.bf16.msra.mxu0 %v2419_v9 }
 0x579   : > { %v1690_v15 = vcombine.low %v1639_v33, %v1655_v37  ;;  %v1689_v43 = vrot.slane %v1682_v38, %v2900_v22 }
 0x57a   : > { %v1673_v16 = vcombine.low %v1664_v40, %v1672_v41 }
 0x57b   : > { %v1697_v44 = vrot.slane %v1690_v15, %v2900_v22 }
 0x57c   : > { %v1680_v45 = vrot.slane %v1673_v16, %v2910_v28 }
 0x57d   : > { %v1698_v46 = vcombine.low %v1689_v43, %v1697_v44 }
 0x57e   : > { %v1681_v48 = vcombine.high %v1680_v45, %v2618_v39  ;;  %v1710_v49 = vshrl.u32 %v1680_v45, 16 }
 0x57f   : > { %v1705_v47 = vrot.slane %v1698_v46, %v2910_v28 }
 0x580   : > { %v1716_v53 = vshrl.u32 %v1681_v48, 16 }
 0x581   : > { %v1711_v50 = vshrl.u32 %v1705_v47, 16  ;;  %v1706_v51 = vcombine.high %v1705_v47, %v2618_v39  ;;  %v1709_v35 = vpack.i.b16 %v1705_v47, %v1680_v45 }
 0x583   : > { %v1712_v36 = vpack.i.b16 %v1711_v50, %v1710_v49  ;;  %v1715_v52 = vpack.i.b16 %v1706_v51, %v1681_v48  ;;  %v1717_v54 = vshrl.u32 %v1706_v51, 16 }
 0x585   : > { %1719 = vrot.lane.b32.xlu0 %v1712_v36, %s2620_s15  ;;  %1721 = vrot.lane.b32.xlu1 %v1715_v52, %s2621_s18  ;;  %v1718_v22 = vpack.i.b16 %v1717_v54, %v1716_v53  ;;  %s2045_s18 = sshll.u32 %s3018_s17, 4  ;;  %s2508_s17 = scalar_lea.vmem %s2507_s23, 1024  ;;  %s3137_s18 = int_to_ptr.vmem [resolvable:$true] %s2045_s18 }
 0x586   : > { %s2502_s16 = scalar_lea.vmem %s3137_s18, 512  ;;  %p2509_p13 = scmp.lt.s32.totalorder %s3137_s18, %s2507_s23 }
 0x587   : > { %p2503_p6 = scmp.ne.s32.totalorder %s3137_s18, %s2502_s16  ;;  %p2510_p3 = scmp.lt.s32.totalorder %s2508_s17, %s2502_s16 }
 0x589   : > { %1723 = vrot.lane.b32.xlu1 %v1718_v22, %s2622_s27  ;;  %p2504_p8 = pnand %p2503_p6, %p2797_p12  ;;  %p2511_p7 = por %p2510_p3, %p2509_p13 }
 0x58b   : > { %p2505_p10 = pneg %p2504_p8 }
 0x58d   : > { %p2512_p9 = pnand %p2511_p7, %p2505_p10 }
 0x5f7   : > { %v1720_v28 = vpop.permute.xlu0 %1719  ;;  %v1722_v55 = vpop.permute.xlu1 %1721 }
 0x5f8   : > { %v1727_v56 = vsel %vm1135_vm2, %v1709_v35, %v1720_v28 }
 0x5f9   : > { %v1730_v39 = vsel %vm1728_vm4, %v1727_v56, %v1722_v55 }
 0x5fb   : > { %v1724_v57 = vpop.permute.xlu1 %1723 }
 0x5fc   : > { %v1733_v58 = vsel %vm1731_vm5, %v1730_v39, %v1724_v57 }
 0x5fd   : > { %2313 = vmatmul.mubr.msk.bf16.vlgmr.msra.gmra.mrb[16].mxu1 %vm582_vm1, %v1733_v58 }
 0x5fe   : > { %2332 = vmatprep.mubr.msk.bf16.mxu1 %vm2611_vm0, %v2610_v0 }
 0x6d0   : > { %v1793_v60 = vpop.f32.mrb[16].mxu1 }
 0x6d1   : > { %v1794_v61 = vadd.f32 %v2196_v59, %v1793_v60  ;;  %v2314_v62 = vpop.f32.mrb[17].mxu1 }
 0x6d2   : > { %v1796_v63 = vpop.f32.mrb[18].mxu1 }
 0x6d3   : > { %v2315_v1 = vpop.f32.mrb[19].mxu1  ;;  %v1799_v2 = vadd.f32 %v1794_v61, %v2873_v3  ;;  %v2420_v3 = vld [vmem:[%s3230_s10] sm:$0xff]  }
 0x6d4   : > { %2325 = vmatpush3.bf16.msra.mxu1 %v2420_v3 }
 0x6d5   : > { %v1802_v4 = vsel %vm582_vm1, %v1799_v2, 0.0  ;;  %2326 = vmatprep.subr.bf16.mxu1 %v2610_v0 }
 0x6d6   : > { %1803 = vadd.xlane.f32.xlu0 %v1802_v4 }
 0x6d8   : > { %2327 = vmatpush3.bf16.msra.mxu1 %v2421_v11 }
 0x6d9   : > { %2328 = vmatprep.subr.bf16.mxu1 %v2610_v0 }
 0x6dc   : > { %2329 = vmatpush3.bf16.msra.mxu1 %v2422_v26 }
 0x6dd   : > { %2330 = vmatprep.subr.bf16.mxu1 %v2610_v0  ;;  %v2206_v0 = vld [vmem:[%s3268_s28] ss:$0 sm:$0xff] }
 0x6e0   : > { %2331 = vmatpush3.bf16.msra.mxu1 %v2423_v27 }
 0x763   : > { %v1804_v5 = vpop.xlane.xlu0 %1803 }
 0x764   : > { %v1806_v6 = vmul.f32 0.03125, %v1804_v5 }
 0x766   : > { %v1807_v10 = vsub.f32 %v1799_v2, %v1806_v6 }
 0x768   : > { %v1808_v12 = vmul.f32 %v1807_v10, %v1807_v10 }
 0x76a   : > { %v1809_v7 = vsel %vm582_vm1, %v1808_v12, 0.0 }
 0x76b   : > { %1810 = vadd.xlane.f32.xlu1 %v1809_v7 }
 0x7f8   : > { %v1811_v17 = vpop.xlane.xlu1 %1810 }
 0x7f9   : > { %v1812_v14 = vmul.f32 0.03125, %v1811_v17 }
 0x7fb   : > { %v1813_v13 = vadd.f32 1e-05, %v1812_v14 }
 0x7fd   : > { %2440 = vrsqrt.f32 %v1813_v13 }
 0x807   : > { %v2441_v18 = vpop.eup %2440 }
 0x808   : > { %v1815_v20 = vmul.f32 %v2441_v18, %v1807_v10 }
 0x80a   : > { %v1822_v23 = vmul.f32 %v2200_v19, %v1815_v20 }
 0x80c   : > { %v1829_v24 = vadd.f32 %v2201_v21, %v1822_v23 }
 0x80e   : > { %v1830_v25 = vpack.c.bf16 %v1829_v24, %v1829_v24 }
 0x810   : > { %2321 = vmatmul.mubr.msk.bf16.vlgmr.msra.gmra.mrb[20].mxu0 %vm582_vm1, %v1830_v25 }
 0x8e3   : > { %v1891_v30 = vpop.f32.mrb[20].mxu0 }
 0x8e4   : > { %v1892_v31 = vadd.f32 %v2202_v29, %v1891_v30  ;;  %v2322_v32 = vpop.f32.mrb[21].mxu0 }
 0x8e5   : > { %v1894_v33 = vpop.f32.mrb[22].mxu0 }
 0x8e6   : > { %v1897_v34 = vmax.f32 %v1892_v31, 0.0  ;;  %v2323_v37 = vpop.f32.mrb[23].mxu0 }
 0x8e8   : > { %v1898_v38 = vpack.c.bf16 %v1897_v34, %v1897_v34 }
 0x8ea   : > { %2333 = vmatmul.mubr.msk.bf16.vlgmr.msra.gmra.mrb[20].mxu1 %vm1938_vm6, %v1898_v38 }
 0x9bd   : > { %v1976_v40 = vpop.f32.mrb[20].mxu1 }
 0x9be   : > { %v1977_v41 = vadd.f32 %v2206_v0, %v1976_v40  ;;  %v2334_v42 = vpop.f32.mrb[21].mxu1 }
 0x9bf   : > { %v1979_v15 = vpop.f32.mrb[22].mxu1 }
 0x9c0   : > { %v2335_v16 = vpop.f32.mrb[23].mxu1  ;;  %v1982_v43 = vadd.f32 %v1977_v41, %v1829_v24 }
 0x9c2   : > { %v1985_v44 = vsel %vm582_vm1, %v1982_v43, 0.0 }
 0x9c3   : > { %1986 = vadd.xlane.f32.xlu0 %v1985_v44 }
 0xa50   : > { %v1987_v45 = vpop.xlane.xlu0 %1986 }
 0xa51   : > { %v1988_v46 = vmul.f32 0.03125, %v1987_v45 }
 0xa53   : > { %v1989_v47 = vsub.f32 %v1982_v43, %v1988_v46 }
 0xa55   : > { %v1990_v48 = vmul.f32 %v1989_v47, %v1989_v47 }
 0xa57   : > { %v1991_v49 = vsel %vm582_vm1, %v1990_v48, 0.0 }
 0xa58   : > { %1992 = vadd.xlane.f32.xlu0 %v1991_v49 }
 0xa59   : > { %2515 = shalt.err (!%p2512_p9)
}
 0xa5a   : > { %s2516_s28 = scalar_lea.hbm %s3135_s13, 512  ;;  %s2520_s26 = scalar_lea.hbm %s3269_s24, 1024 }
 0xa5b   : > { %p2517_p2 = scmp.ne.s32.totalorder %s3135_s13, %s2516_s28  ;;  %p2521_p11 = scmp.lt.u32.totalorder %s3135_s13, %s3269_s24 }
 0xa5c   : > { %p2522_p1 = scmp.lt.u32.totalorder %s2520_s26, %s2516_s28  ;;  %p2524_p6 = scmp.lt.u32.totalorder %s2516_s28, %s3135_s13 }
 0xa5d   : > { %p2518_p5 = pnand %p2517_p2, %p2797_p12 }
 0xa5e   : > { %p2523_p4 = por %p2522_p1, %p2521_p11 }
 0xa5f   : > { %p2519_p0 = pneg %p2518_p5 }
 0xa60   : > { %p2525_p8 = por %p2524_p6, %p2523_p4 }
 0xa62   : > { %p2526_p10 = pnand %p2525_p8, %p2519_p0 }
 0xa64   : > { %2529 = shalt.err (!%p2526_p10)
}
 0xa65   : > { %s2624_s16 = smov 128   ;;  %s2181_s17 = sshll.u32 %s2842_s12, 3 }
 0xa66   : > { %2343 = dma.vmem_to_hbm [thread:$0]  (%p2797_p12), %s3137_s18, 512, %s3135_s13, %s2019_s29, %s2624_s16, %s2624_s16, %s2620_s15  }
 0xa67   : > { %s3270_s27 = sld [smem:[#allocation20_spill]]  ;;  %s3271_s23 = sld [smem:[#allocation21_spill]] }
 0xa68   : > { %s2216_s0 = sshll.u32 %s2727_s22, 7  ;;  %s541_s1 = scalar_lea.vmem [#allocation7], %s2181_s17 }
 0xa69   : > { %s2032_s15 = sshll.u32 %s541_s1, 4  ;;  %s3272_s29 = sld [smem:[#allocation22_spill]]  ;;  %s3177_s15 = int_to_ptr.vmem [resolvable:$true] %s2032_s15 }
 0xa6a   : > { %s2014_s28 = scalar_lea.sflag [#allocation4], %s2842_s12  ;;  %s2530_s11 = scalar_lea.vmem %s3177_s15, 128 }
 0xa6b   : > { %p2531_p13 = scmp.ne.s32.totalorder %s3177_s15, %s2530_s11  ;;  %s2625_s22 = smov [#allocation7]  }
 0xa6c   : > { %s2534_s17 = sshll.u32 %s2625_s22, 4  ;;  %s2535_s17 = int_to_ptr.vmem [resolvable:$false] %s2534_s17 }
 0xa6d   : > { %v2212_v52 = vld [vmem:[%s3270_s27] ss:$0 sm:$0xff]  ;;  %p2532_p3 = pnand %p2531_p13, %p2797_p12  ;;  %s2536_s27 = scalar_lea.vmem %s2535_s17, 256 }
 0xa6e   : > { %v2213_v54 = vld [vmem:[%s3271_s23] ss:$0 sm:$0xff]  ;;  %p2537_p9 = scmp.lt.s32.totalorder %s3177_s15, %s2535_s17  ;;  %p2538_p2 = scmp.lt.s32.totalorder %s2536_s27, %s2530_s11 }
 0xa6f   : > { %s3175_s16 = scalar_lea.hbm %s3272_s29, %s2216_s0  ;;  %p2533_p7 = pneg %p2532_p3 }
 0xa70   : > { %p2539_p5 = por %p2538_p2, %p2537_p9 }
 0xa72   : > { %p2540_p0 = pnand %p2539_p5, %p2533_p7 }
 0xae5   : > { %v1993_v50 = vpop.xlane.xlu0 %1992 }
 0xae6   : > { %v1994_v51 = vmul.f32 0.03125, %v1993_v50 }
 0xae8   : > { %v1995_v35 = vadd.f32 1e-05, %v1994_v51 }
 0xaea   : > { %2442 = vrsqrt.f32 %v1995_v35 }
 0xaf4   : > { %v2443_v36 = vpop.eup %2442 }
 0xaf5   : > { %v1997_v53 = vmul.f32 %v2443_v36, %v1989_v47 }
 0xaf7   : > { %v2004_v22 = vmul.f32 %v2212_v52, %v1997_v53 }
 0xaf9   : > { %v2011_v28 = vadd.f32 %v2213_v54, %v2004_v22 }
 0xafb   : > { %2012 = vst.msk [vmem:[%s541_s1] sm:$0xff] %vm582_vm1, %v2011_v28 }
 0xafc   : > { %2543 = shalt.err (!%p2540_p0)
}
 0xafd   : > { %s2544_s0 = scalar_lea.hbm %s3175_s16, 128  ;;  %s2548_s26 = scalar_lea.hbm %s3272_s29, 256 }
 0xafe   : > { %p2545_p11 = scmp.ne.s32.totalorder %s3175_s16, %s2544_s0  ;;  %p2549_p6 = scmp.lt.u32.totalorder %s3175_s16, %s3272_s29 }
 0xaff   : > { %p2550_p8 = scmp.lt.u32.totalorder %s2548_s26, %s2544_s0  ;;  %p2552_p13 = scmp.lt.u32.totalorder %s2544_s0, %s3175_s16 }
 0xb00   : > { %p2546_p1 = pnand %p2545_p11, %p2797_p12 }
 0xb01   : > { %p2551_p10 = por %p2550_p8, %p2549_p6 }
 0xb02   : > { %p2547_p4 = pneg %p2546_p1 }
 0xb03   : > { %p2553_p3 = por %p2552_p13, %p2551_p10 }
 0xb05   : > { %p2554_p7 = pnand %p2553_p3, %p2547_p4 }
 0xb07   : > { %2557 = shalt.err (!%p2554_p7)
}
 0xb08   : > { %2342 = dma.vmem_to_hbm [thread:$0]  (%p2797_p12), %s3177_s15, 128, %s3175_s16, %s2014_s28  }
 0xb09 PF: > { %s3273_s18 = sld [smem:[#allocation14_spill]]  ;;  %s3274_s13 = sld [smem:[#allocation15_spill]] }
 0xb0a   : > { %p3276_p2 = scmp.ge.s32.totalorder %s2604_s21, 2 }
 0xb0f   : > { %s2060_s11 = sand.u32 1, %s3273_s18   ;;  %p3275_p9 = scmp.ne.s32.totalorder %s3274_s13, 0 }
 0xb10   : > { %s2061_s22 = scalar_lea.sflag [#allocation4], %s2060_s11 }
 0xb11   : > { %p2355_p5 = pnand %p3276_p2, %p3275_p9 }
 0xb13   : > { %2583 = dma.done.wait (!%p2355_p5), %s2061_s22, 128  }
 0xb14   : > { %2585 = vsyncadd (!%p2355_p5), %s2061_s22, 4294967168  ;;  %s2070_s17 = scalar_lea.sflag [#allocation9], %s2060_s11 }
 0xb15   : > { %2587 = dma.done.wait (!%p2355_p5), %s2070_s17, 512  }
 0xb16   : > { %2589 = vsyncadd (!%p2355_p5), %s2070_s17, 4294966784  ;;  %s3277_s21 = sld [smem:[#allocation16_spill]]  ;;  %s3278_s18 = smov %s2596_s19 }
 0xb17   : > { %s3279_s19 = smov %s2600_s20  ;;  %s3280_s20 = smov %s2793_s25 }
 0xb1c   : > { %p33_p12 = scmp.ge.s32.totalorder %s3277_s21, 4  }
 0xb1e   :  { %35 = sbr.rel (!%p33_p12) target bundleno = 16 (0x10), region = 145 }
 0xb25   :  { %2075 = vsyncpa [#allocation3], 1 }
 0xb26   :  { %2077 = vsyncpa [#allocation3 + $0x1], 1 }
 0xb27   :  { %2078 = vsyncpa [#allocation6], 1 }
 0xb28   :  { %2079 = vsyncpa [#allocation4], 1 }
 0xb29   :  { %2081 = vsyncpa [#allocation4 + $0x1], 1 }
 0xb2a   :  { %2082 = vsyncpa [#allocation9], 1 }
 0xb2b   :  { %2084 = vsyncpa [#allocation9 + $0x1], 1 }

// kernel: tpu_custom_call.1
= control target key start
LH: loop header
LB: loop body
LE: loop exit
PB: predicated region body
PF: predicated region fallthrough
CT: control target
= control target key end

     0   :  { %s3220_s0 = inlined_call_operand.vmem [shape: f32[2,8,32], index: 0, kind: input, shape index: {}]   ;;  %s3221_s1 = inlined_call_operand.hbm [shape: bf16[2,8,8], index: 1, kind: input, shape index: {}]   ;;  %s3222_s2 = inlined_call_operand.vmem [shape: bf16[32,96], index: 2, kind: input, shape index: {}]   ;;  %s3223_s3 = inlined_call_operand.vmem [shape: f32[1,96], index: 3, kind: input, shape index: {}]   ;;  %s3224_s4 = inlined_call_operand.vmem [shape: bf16[32,32], index: 4, kind: input, shape index: {}]   ;;  %s3225_s5 = inlined_call_operand.vmem [shape: f32[1,32], index: 5, kind: input, shape index: {}]   ;;  %s3226_s6 = inlined_call_operand.vmem [shape: f32[1,32], index: 6, kind: input, shape index: {}]   ;;  %s3227_s7 = inlined_call_operand.vmem [shape: f32[1,32], index: 7, kind: input, shape index: {}]   ;;  %s3228_s8 = inlined_call_operand.hbm [shape: bf16[32,64], index: 8, kind: input, shape index: {}]   ;;  %s3229_s9 = inlined_call_operand.vmem [shape: f32[1,64], index: 9, kind: input, shape index: {}]   ;;  %s3230_s10 = inlined_call_operand.vmem [shape: bf16[64,32], index: 10, kind: input, shape index: {}]   ;;  %s3231_s11 = inlined_call_operand.vmem [shape: f32[1,32], index: 11, kind: input, shape index: {}]   ;;  %s3232_s12 = inlined_call_operand.vmem [shape: f32[1,32], index: 12, kind: input, shape index: {}]   ;;  %s3233_s13 = inlined_call_operand.vmem [shape: f32[1,32], index: 13, kind: input, shape index: {}]   ;;  %s3234_s14 = inlined_call_operand.hbm [shape: f32[2,8,32], index: 14, kind: output, shape index: {0}]   ;;  %s3235_s15 = inlined_call_operand.hbm [shape: f32[2,4,8,8], index: 15, kind: output, shape index: {1}]  }
   0x1   :  { %3245 = sst [smem:[#allocation17_spill]] %s3220_s0 }
   0x2   :  { %3246 = sst [smem:[#allocation18_spill]] %s3221_s1 }
   0x3   :  { %3247 = sst [smem:[#allocation19_spill]] %s3231_s11 }
   0x4   :  { %3248 = sst [smem:[#allocation20_spill]] %s3232_s12 }
   0x5   :  { %3249 = sst [smem:[#allocation21_spill]] %s3233_s13 }
   0x6   :  { %3250 = sst [smem:[#allocation22_spill]] %s3234_s14 }
   0x7   :  { %3251 = sst [smem:[#allocation23_spill]] %s3235_s15 }
   0x8   :  { %21 = vsyncpa [#allocation3], 0 }
   0x9   :  { %23 = vsyncpa [#allocation3 + $0x1], 0 }
   0xa   :  { %24 = vsyncpa [#allocation6], 0 }
   0xb   :  { %25 = vsyncpa [#allocation4], 0 }
   0xc   :  { %27 = vsyncpa [#allocation4 + $0x1], 0 }
   0xd   :  { %28 = vsyncpa [#allocation9], 0 }
   0xe   :  { %30 = vsyncpa [#allocation9 + $0x1], 0  ;;  %s2706_s18 = smov 0   ;;  %s2708_s19 = smov 0  }
   0xf   :  { %s2710_s20 = smov 0   ;;  %s2712_s21 = smov 0  }
  0x10 LB: > { %3252 = sst [smem:[#allocation14_spill]] %s2592_s18  ;;  %s2727_s22 = sadd.s32 4294967295, %s2604_s21   ;;  %s2604_s21 = sphi %s2712_s21, %s3277_s21   ;;  %s2600_s20 = sphi %s2710_s20, %s3280_s20   ;;  %s2596_s19 = sphi %s2708_s19, %s3279_s19   ;;  %s2592_s18 = sphi %s2706_s18, %s3278_s18  }
  0x11   : > { %s2172_s23 = sadd.s32 4294967294, %s2604_s21   ;;  %p82_p0 = scmp.ne.s32.totalorder %s2596_s19, %s2592_s18 }
  0x12   : > { %p3241_p1 = scmp.eq.s32.totalorder %s2727_s22, 0  ;;  %p364_p3 = scmp.eq.s32.totalorder %s2172_s23, 1 }
  0x13   : > { %p2173_p5 = scmp.ge.s32.totalorder %s2604_s21, 1  ;;  %p397_p7 = scmp.lt.s32.totalorder %s2604_s21, 3 }
  0x14   : > { %p2736_p4 = por %p3241_p1, %p82_p0  ;;  %p2741_p6 = por %p364_p3, %p82_p0 }
  0x15   : > { %p2746_p8 = pnand %p2173_p5, %p397_p7  ;;  %s2606_s27 = smov [#allocation5]  }
  0x16   : > { %s3253_s24 = scalar_select %p2736_p4, 1, 0 }
  0x17   : > { %s3254_s25 = scalar_select %p2741_p6, 1, 0 }
  0x18   : > { %s3256_s26 = scalar_select %p2746_p8, 1, 0 }
  0x19   : > { %3255 = sst [smem:[#allocation15_spill]] %s3254_s25  ;;  %s427_s28 = sshll.u32 %s2606_s27, 4  ;;  %s2750_s28 = int_to_ptr.vmem [resolvable:$true] %s427_s28 }
  0x1a   : > { %p2346_p9 = pneg %p2746_p8  ;;  %s2762_s30 = sadd.s32 1, %s2604_s21  }
  0x1b   : > { %3258 = sst [smem:[#allocation16_spill]] %s2762_s30  ;;  %s69_s16 = sadd.s32 1, %s2600_s20 }
  0x1c   : > { %p2757_p11 = pnand %p2346_p9, %p3241_p1  ;;  %s66_s17 = ssub.s32 %s2604_s21, %s2762_s30 }
  0x1d   : > { %s2444_s27 = scalar_lea.hbm %s3228_s8, 256 }
  0x1e   : > { %p2445_p12 = scmp.ne.s32.totalorder %s3228_s8, %s2444_s27  ;;  %p2446_p13 = pneg %p2757_p11 }
  0x1f   : > { %p2451_p5 = scmp.lt.u32.totalorder %s2444_s27, %s3228_s8 }
  0x20   : > { %p2447_p0 = pnand %p2446_p13, %p2445_p12 }
  0x22   : > { %p2448_p3 = pneg %p2447_p0 }
  0x24   : > { %p2453_p7 = pnand %p2451_p5, %p2448_p3 }
  0x26   : > { %2456 = shalt.err (!%p2453_p7)
}
  0x27   : > { %s2457_s30 = scalar_lea.vmem %s2750_s28, 256  ;;  %p2465_p2 = scmp.lt.s32.totalorder %s2750_s28, %s2750_s28 }
  0x28   : > { %p2458_p9 = scmp.ne.s32.totalorder %s2750_s28, %s2457_s30  ;;  %p2466_p6 = scmp.lt.s32.totalorder %s2457_s30, %s2457_s30 }
  0x2a   : > { %p2460_p10 = pnand %p2458_p9, %p2446_p13  ;;  %p2467_p4 = por %p2466_p6, %p2465_p2 }
  0x2c   : > { %p2461_p1 = pneg %p2460_p10 }
  0x2e   : > { %p2468_p8 = pnand %p2467_p4, %p2461_p1 }
  0x30   : > { %2471 = shalt.err (!%p2468_p8)
}
  0x31   : > { %s2607_s14 = smov 64   ;;  %s2608_s12 = smov 4  }
  0x32   : > { %2349 = dma.hbm_to_vmem [thread:$0]  (!%p2757_p11), %s3228_s8, 256, %s2750_s28, [#allocation6], %s2607_s14, %s2607_s14, %s2608_s12  }
  0x33   : > { %p67_p2 = scmp.eq.s32.totalorder %s66_s17, 0  ;;  %p76_p1 = scmp.ne.s32.totalorder %s2600_s20, %s2596_s19 }
  0x34   : > { %p77_p4 = scmp.eq.s32.totalorder %s2604_s21, 0  ;;  %p2362_p6 = scmp.lt.s32.totalorder %s2604_s21, 2 }
  0x35   : > { %s2793_s25 = scalar_select %p67_p2, %s2600_s20, %s69_s16  }
  0x36   : > { %p78_p8 = por %p77_p4, %p76_p1  ;;  %p3259_p10 = scmp.eq.s32.totalorder %s2727_s22, 1 }
  0x37   : > { %s463_s23 = sand.u32 1, %s2600_s20   ;;  %s2177_s27 = sshll.u32 %s2604_s21, 6 }
  0x38   : > { %p2797_p12 = por %p3259_p10, %p76_p1  ;;  %s2176_s15 = sshll.u32 %s463_s23, 2 }
  0x39   : > { %s3261_s1 = sld [smem:[#allocation18_spill]]  ;;  %s467_s28 = scalar_lea.vmem [#allocation2], %s2176_s15 }
  0x3a   : > { %s474_s16 = sshll.u32 %s467_s28, 4  ;;  %p2808_p11 = pnand %p2362_p6, %p78_p8  ;;  %s2812_s16 = int_to_ptr.vmem [resolvable:$true] %s474_s16 }
  0x3b   : > { %s464_s14 = scalar_lea.sflag [#allocation3], %s463_s23 }
  0x3c   : > { %p2474_p0 = pneg %p2808_p11 }
  0x3f   : > { %s2806_s13 = scalar_lea.hbm %s3261_s1, %s2177_s27  ;;  %s2477_s18 = scalar_lea.hbm %s3261_s1, 128 }
  0x40   : > { %s2472_s12 = scalar_lea.hbm %s2806_s13, 64  ;;  %p2478_p7 = scmp.lt.u32.totalorder %s2806_s13, %s3261_s1 }
  0x41   : > { %p2473_p13 = scmp.ne.s32.totalorder %s2806_s13, %s2472_s12  ;;  %p2479_p9 = scmp.lt.u32.totalorder %s2477_s18, %s2472_s12 }
  0x42   : > { %p2481_p1 = scmp.lt.u32.totalorder %s2472_s12, %s2806_s13 }
  0x43   : > { %p2475_p3 = pnand %p2474_p0, %p2473_p13  ;;  %p2480_p2 = por %p2479_p9, %p2478_p7 }
  0x45   : > { %p2476_p5 = pneg %p2475_p3  ;;  %p2482_p4 = por %p2481_p1, %p2480_p2 }
  0x47   : > { %p2483_p6 = pnand %p2482_p4, %p2476_p5 }
  0x49   : > { %2486 = shalt.err (!%p2483_p6)
}
  0x4a   : > { %s2487_s23 = scalar_lea.vmem %s2812_s16, 64  ;;  %s2609_s28 = smov [#allocation2]  }
  0x4b   : > { %p2488_p8 = scmp.ne.s32.totalorder %s2812_s16, %s2487_s23  ;;  %s2492_s11 = sshll.u32 %s2609_s28, 4  ;;  %s2493_s11 = int_to_ptr.vmem [resolvable:$false] %s2492_s11 }
  0x4c   : > { %s2494_s15 = scalar_lea.vmem %s2493_s11, 128  ;;  %p2495_p3 = scmp.lt.s32.totalorder %s2812_s16, %s2493_s11 }
  0x4d   : > { %p2490_p10 = pnand %p2488_p8, %p2474_p0  ;;  %p2496_p7 = scmp.lt.s32.totalorder %s2494_s15, %s2487_s23 }
  0x4f   : > { %p2491_p13 = pneg %p2490_p10  ;;  %p2497_p9 = por %p2496_p7, %p2495_p3 }
  0x51   : > { %p2498_p2 = pnand %p2497_p9, %p2491_p13 }
  0x53   : > { %2501 = shalt.err (!%p2498_p2)
}
  0x54   : > { %2353 = dma.hbm_to_vmem [thread:$0]  (!%p2808_p11), %s2806_s13, 64, %s2812_s16, %s464_s14  }
  0x55   : > { %p3263_p5 = scmp.ne.s32.totalorder %s3256_s26, 0 }
  0x56   : > { %s2842_s12 = sand.u32 (!%p3263_p5), 1, %s2596_s19   ;;  %p3264_p0 = scmp.ne.s32.totalorder (!%p3263_p5), %s3253_s24, 0 }
  0x57   : > { %483 = sbr.rel (%p3263_p5) target bundleno = 2825 (0xb09), region = 76  ;;  %s2179_s18 = sshll.u32 (!%p3263_p5), %s2842_s12, 2 }
  0x58   : > { %s486_s27 = scalar_lea.sflag (!%p3263_p5), [#allocation3], %s2842_s12  ;;  %s2846_s29 = scalar_lea.vmem (!%p3263_p5), [#allocation2], %s2179_s18 }
  0x5e   : > { %2575 = dma.done.wait (%p3264_p0), %s486_s27, 64  }
  0x5f   : > { %2577 = vsyncadd (%p3264_p0), %s486_s27, 4294967232  ;;  %p3265_p11 = scmp.eq.s32.totalorder %s2727_s22, 0 }
  0x61   : > { %2579 = dma.done.wait (%p3265_p11), [#allocation6], 256   ;;  %p3266_p1 = pmov %p3265_p11 }
  0x62   : > { %p549_p4 = scmp.lt.s32.totalorder %s2727_s22, 1  ;;  %v2610_v0 = vmov 0.0   ;;  %vm2611_vm0 = vmmov 0   ;;  %s3267_s0 = sld [smem:[#allocation17_spill]]  ;;  %v2414_v1 = vld [vmem:[%s3222_s2] sm:$0xff]   ;;  %v2415_v2 = vld [vmem:[%s3222_s2 + $0x8] sm:$0xff]   ;;  %v637_v17 = vlaneseq }
  0x63   : > { %2581 = vsyncadd (%p3266_p1), [#allocation6], 4294967040  ;;  %2252 = vmatprep.subr.bf16.mxu0 %v2610_v0  ;;  %2256 = vmatprep.mubr.msk.bf16.mxu0 %vm2611_vm0, %v2610_v0  ;;  %vm582_vm1 = vcmask 261120   ;;  %v2184_v5 = vld [vmem:[%s3223_s3] ss:$0 sm:$0xff]  ;;  %s2612_s27 = smov 104  }
  0x64   : > { %s550_s26 = scalar_select %p549_p4, %s2727_s22, 1  ;;  %2260 = vmatprep.subr.bf16.mxu1 %v2610_v0  ;;  %2262 = vmatprep.mubr.msk.bf16.mxu1 %vm2611_vm0, %v2610_v0  ;;  %v2616_v15 = vmov 1983009808   ;;  %v638_v19 = vshrl.u32 %v637_v17, 7  ;;  %v2617_v20 = vmov 1934713408  }
  0x65   : > { %2253 = vmatpush3.bf16.msra.mxu0 %v2414_v1  ;;  %s2615_s13 = smov 112   ;;  %v635_v16 = vunpack.c.l.s4 %v2616_v15  ;;  %v652_v21 = vunpack.c.l.s4 %v2617_v20  ;;  %v2618_v39 = vmov 0   ;;  %vm1135_vm2 = vcmask 64512   ;;  %s2182_s16 = sshll.u32 %s2842_s12, 5 }
  0x66   : > { %s2183_s24 = sshll.u32 %s550_s26, 3  ;;  %2254 = vmatprep.subr.bf16.mxu0 %v2610_v0  ;;  %s2613_s26 = smov 120   ;;  %vm1375_vm3 = vcmask 1043456   ;;  %vm1728_vm4 = vcmask 130048   ;;  %vm1731_vm5 = vcmask 195584   ;;  %vm1938_vm6 = vcmask 523264  }
  0x67   : > { %v636_v18 = vunpack.c.0.s8 %v635_v16  ;;  %v653_v24 = vunpack.c.0.s8 %v652_v21  ;;  %s2620_s15 = smov 8   ;;  %s2621_s18 = smov 16  }
  0x68   : > { %s552_s17 = scalar_lea.vmem %s3267_s0, %s2183_s24  ;;  %s2614_s24 = smov 96  }
  0x69   : > { %v2873_v3 = vld [vmem:[%s552_s17] sm:$0xff]  ;;  %2255 = vmatpush3.bf16.msra.mxu0 %v2415_v2  ;;  %v2900_v22 = vsub.s32 %v636_v18, %v638_v19  ;;  %v2910_v28 = vsub.s32 %v653_v24, %v638_v19  ;;  %s3018_s17 = scalar_lea.vmem [#allocation8], %s2182_s16  ;;  %s3268_s28 = sld [smem:[#allocation19_spill]] }
  0x6a   : > { %v558_v4 = vpack.c.bf16 %v2873_v3, %v2873_v3  ;;  %2266 = vmatprep.subr.bf16.mxu0 %v2610_v0  ;;  %s2221_s11 = sshll.u32 %s2727_s22, 9  ;;  %s2623_s14 = smov [#allocation8]  }
  0x6b   : > { %s2506_s23 = sshll.u32 %s2623_s14, 4  ;;  %s2507_s23 = int_to_ptr.vmem [resolvable:$false] %s2506_s23 }
  0x6c   : > { %2257 = vmatmul.mubr.msk.bf16.vlgmr.msra.gmra.mrb[0].mxu0 %vm582_vm1, %v558_v4 }
  0x6d   : > { %2268 = vmatprep.mubr.msk.bf16.mxu0 %vm2611_vm0, %v2610_v0 }
 0x13f   : > { %v620_v6 = vpop.f32.mrb[0].mxu0 }
 0x140   : > { %v621_v7 = vadd.f32 %v2184_v5, %v620_v6  ;;  %v2258_v8 = vpop.f32.mrb[1].mxu0 }
 0x141   : > { %v623_v9 = vpop.f32.mrb[2].mxu0 }
 0x142   : > { %v2885_v10 = vpack.c.bf16 %v621_v7, %v621_v7  ;;  %v2259_v11 = vpop.f32.mrb[3].mxu0 }
 0x144   : > { %632 = vrot.lane.b32.xlu1 %v2885_v10, %s2612_s27  ;;  %628 = vrot.lane.b32.xlu0 %v2885_v10, %s2613_s26  ;;  %v640_v27 = vrot.slane %v2885_v10, %v2900_v22  ;;  %s2622_s27 = smov 24  }
 0x148   : > { %795 = vrot.lane.b32.xlu1 %v2885_v10, %s2614_s24  ;;  %630 = vrot.lane.b32.xlu0 %v2885_v10, %s2615_s13 }
 0x1b6   : > { %v2891_v12 = vpop.permute.xlu0 %628  ;;  %v2894_v13 = vpop.permute.xlu1 %632 }
 0x1b7   : > { %797 = vrot.lane.b32.xlu0 %v2891_v12, %s2614_s24  ;;  %v682_v23 = vrot.slane %v2894_v13, %v2900_v22  ;;  %v674_v25 = vrot.slane %v2891_v12, %v2900_v22 }
 0x1b9   : > { %v683_v29 = vcombine.low %v674_v25, %v682_v23  ;;  %v684_v32 = vcombine.high %v674_v25, %v682_v23 }
 0x1ba   : > { %v2896_v14 = vpop.permute.xlu0 %630  ;;  %v796_v38 = vpop.permute.xlu1 %795 }
 0x1bb   : > { %801 = vrot.lane.b32.xlu0 %v2894_v13, %s2614_s24  ;;  %799 = vrot.lane.b32.xlu1 %v2896_v14, %s2614_s24  ;;  %v648_v26 = vrot.slane %v2896_v14, %v2900_v22  ;;  %v2913_v33 = vrot.slane %v683_v29, %v2910_v28  ;;  %v2922_v36 = vrot.slane %v684_v32, %v2910_v28  ;;  %s3269_s24 = sld [smem:[#allocation23_spill]] }
 0x1bc   : > { %v810_v45 = vrot.slane %v796_v38, %v2900_v22 }
 0x1bd   : > { %v649_v30 = vcombine.low %v640_v27, %v648_v26  ;;  %v650_v31 = vcombine.high %v640_v27, %v648_v26  ;;  %v699_v40 = vcombine.high %v2913_v33, %v2618_v39  ;;  %v700_v43 = vcombine.high %v2922_v36, %v2618_v39 }
 0x1be   : > { %v706_v44 = vshrl.u32 %v2913_v33, 16  ;;  %v722_v48 = vshrl.u32 %v2922_v36, 16 }
 0x1bf   : > { %v2916_v34 = vrot.slane %v649_v30, %v2910_v28  ;;  %v2919_v35 = vrot.slane %v650_v31, %v2910_v28  ;;  %v714_v53 = vshrl.u32 %v699_v40, 16  ;;  %v730_v57 = vshrl.u32 %v700_v43, 16 }
 0x1c1   : > { %v665_v41 = vcombine.high %v2916_v34, %v2618_v39  ;;  %v666_v42 = vcombine.high %v2919_v35, %v2618_v39  ;;  %v705_v46 = vshrl.u32 %v2916_v34, 16  ;;  %v721_v49 = vshrl.u32 %v2919_v35, 16  ;;  %s3135_s13 = scalar_lea.hbm %s3269_s24, %s2221_s11 }
 0x1c2   : > { %v703_v58 = vpack.i.b16 %v2913_v33, %v2916_v34  ;;  %v719_v33 = vpack.i.b16 %v2922_v36, %v2919_v35 }
 0x1c3   : > { %v713_v54 = vshrl.u32 %v665_v41, 16  ;;  %v729_v55 = vshrl.u32 %v666_v42, 16  ;;  %v707_v61 = vpack.i.b16 %v706_v44, %v705_v46  ;;  %v711_v62 = vpack.i.b16 %v699_v40, %v665_v41 }
 0x1c4   : > { %v723_v2 = vpack.i.b16 %v722_v48, %v721_v49  ;;  %v727_v4 = vpack.i.b16 %v700_v43, %v666_v42  ;;  %v733_v48 = vcombine.low %v703_v58, %v719_v33 }
 0x1c5   : > { %v715_v7 = vpack.i.b16 %v714_v53, %v713_v54  ;;  %v731_v8 = vpack.i.b16 %v730_v57, %v729_v55 }
 0x1c6   : > { %v741_v43 = vcombine.low %v711_v62, %v727_v4  ;;  %v758_v46 = vcombine.low %v707_v61, %v723_v2  ;;  %v740_v57 = vrot.slane %v733_v48, %v2900_v22 }
 0x1c7   : > { %v766_v42 = vcombine.low %v715_v7, %v731_v8 }
 0x1c8   : > { %v748_v53 = vrot.slane %v741_v43, %v2900_v22  ;;  %v765_v55 = vrot.slane %v758_v46, %v2900_v22 }
 0x1c9   : > { %v773_v36 = vrot.slane %v766_v42, %v2900_v22 }
 0x229   : > { %v798_v37 = vpop.permute.xlu0 %797 }
 0x22a   : > { %v844_v50 = vrot.slane %v798_v37, %v2900_v22 }
 0x22d   : > { %v802_v47 = vpop.permute.xlu0 %801  ;;  %v800_v51 = vpop.permute.xlu1 %799 }
 0x22e   : > { %v852_v52 = vrot.slane %v802_v47, %v2900_v22  ;;  %v818_v56 = vrot.slane %v800_v51, %v2900_v22 }
 0x230   : > { %v853_v59 = vcombine.low %v844_v50, %v852_v52  ;;  %v854_v60 = vcombine.high %v844_v50, %v852_v52  ;;  %v819_v63 = vcombine.low %v810_v45, %v818_v56  ;;  %v820_v1 = vcombine.high %v810_v45, %v818_v56 }
 0x232   : > { %v861_v5 = vrot.slane %v853_v59, %v2910_v28  ;;  %v868_v6 = vrot.slane %v854_v60, %v2910_v28  ;;  %v827_v9 = vrot.slane %v819_v63, %v2910_v28  ;;  %v834_v11 = vrot.slane %v820_v1, %v2910_v28 }
 0x233   : > { %v774_v59 = vcombine.low %v765_v55, %v773_v36  ;;  %v749_v60 = vcombine.low %v740_v57, %v748_v53 }
 0x234   : > { %v869_v15 = vcombine.high %v861_v5, %v2618_v39  ;;  %v870_v16 = vcombine.high %v868_v6, %v2618_v39  ;;  %v876_v17 = vshrl.u32 %v861_v5, 16  ;;  %v892_v18 = vshrl.u32 %v868_v6, 16 }
 0x235   : > { %v835_v19 = vcombine.high %v827_v9, %v2618_v39  ;;  %v836_v20 = vcombine.high %v834_v11, %v2618_v39  ;;  %v875_v21 = vshrl.u32 %v827_v9, 16  ;;  %v891_v23 = vshrl.u32 %v834_v11, 16 }
 0x236   : > { %v873_v24 = vpack.i.b16 %v861_v5, %v827_v9  ;;  %v884_v25 = vshrl.u32 %v869_v15, 16  ;;  %v889_v26 = vpack.i.b16 %v868_v6, %v834_v11  ;;  %v900_v27 = vshrl.u32 %v870_v16, 16 }
 0x237   : > { %v883_v29 = vshrl.u32 %v835_v19, 16  ;;  %v899_v30 = vshrl.u32 %v836_v20, 16  ;;  %v877_v31 = vpack.i.b16 %v876_v17, %v875_v21  ;;  %v881_v32 = vpack.i.b16 %v869_v15, %v835_v19 }
 0x238   : > { %v893_v34 = vpack.i.b16 %v892_v18, %v891_v23  ;;  %v897_v37 = vpack.i.b16 %v870_v16, %v836_v20  ;;  %v903_v38 = vcombine.low %v873_v24, %v889_v26  ;;  %v781_v5 = vrot.slane %v774_v59, %v2910_v28 }
 0x239   : > { %v885_v40 = vpack.i.b16 %v884_v25, %v883_v29  ;;  %v901_v41 = vpack.i.b16 %v900_v27, %v899_v30  ;;  %v756_v8 = vrot.slane %v749_v60, %v2910_v28 }
 0x23a   : > { %v911_v44 = vcombine.low %v881_v32, %v897_v37  ;;  %v928_v45 = vcombine.low %v877_v31, %v893_v34  ;;  %v910_v49 = vrot.slane %v903_v38, %v2900_v22  ;;  %v787_v15 = vshrl.u32 %v781_v5, 16  ;;  %v555_v31 = vld [vmem:[%s2846_s29] sm:$0xf]  ;;  %s2619_s29 = smov 64  }
 0x23b   : > { %v936_v47 = vcombine.low %v885_v40, %v901_v41  ;;  %v785_v17 = vpack.i.b16 %v781_v5, %v756_v8  ;;  %v786_v18 = vshrl.u32 %v756_v8, 16  ;;  %v782_v23 = vcombine.high %v781_v5, %v2618_v39 }
 0x23c   : > { %v918_v50 = vrot.slane %v911_v44, %v2900_v22  ;;  %v935_v51 = vrot.slane %v928_v45, %v2900_v22  ;;  %v757_v25 = vcombine.high %v756_v8, %v2618_v39  ;;  %v556_v32 = vunpack.c.l.bf16 %v555_v31 }
 0x23d   : > { %v943_v35 = vrot.slane %v936_v47, %v2900_v22  ;;  %v788_v21 = vpack.i.b16 %v787_v15, %v786_v18  ;;  %v793_v26 = vshrl.u32 %v782_v23, 16 }
 0x23e   : > { %v919_v52 = vcombine.low %v910_v49, %v918_v50  ;;  %v791_v27 = vpack.i.b16 %v782_v23, %v757_v25  ;;  %v792_v29 = vshrl.u32 %v757_v25, 16  ;;  %v557_v33 = vmul.f32 -1e+09, %v556_v32 }
 0x23f   : > { %v944_v54 = vcombine.low %v935_v51, %v943_v35 }
 0x240   : > { %v926_v56 = vrot.slane %v919_v52, %v2910_v28  ;;  %v794_v30 = vpack.i.b16 %v793_v26, %v792_v29 }
 0x241   : > { %v951_v58 = vrot.slane %v944_v54, %v2910_v28 }
 0x242   : > { %v956_v62 = vshrl.u32 %v926_v56, 16  ;;  %v927_v6 = vcombine.high %v926_v56, %v2618_v39 }
 0x243   : > { %v955_v61 = vpack.i.b16 %v951_v58, %v926_v56  ;;  %v957_v63 = vshrl.u32 %v951_v58, 16  ;;  %v952_v1 = vcombine.high %v951_v58, %v2618_v39 }
 0x244   : > { %v962_v16 = vshrl.u32 %v927_v6, 16 }
 0x245   : > { %v1140_v2 = vsel %vm1135_vm2, %v955_v61, 0  ;;  %v958_v4 = vpack.i.b16 %v957_v63, %v956_v62  ;;  %v963_v9 = vshrl.u32 %v952_v1, 16  ;;  %v961_v11 = vpack.i.b16 %v952_v1, %v927_v6 }
 0x246   : > { %2261 = vmatpush3.bf16.xpose.msra.mxu1 %v1140_v2 }
 0x247   : > { %v1186_v7 = vsel %vm1135_vm2, %v958_v4, 0  ;;  %2272 = vmatprep.subr.bf16.mxu1 %v2610_v0  ;;  %v964_v19 = vpack.i.b16 %v963_v9, %v962_v16  ;;  %v1232_v20 = vsel %vm1135_vm2, %v961_v11, 0 }
 0x248   : > { %2267 = vmatpush3.bf16.xpose.msra.mxu0 %v1186_v7 }
 0x249   : > { %2278 = vmatprep.subr.bf16.mxu0 %v2610_v0  ;;  %v1278_v24 = vsel %vm1135_vm2, %v964_v19, 0 }
 0x24d   : > { %2263 = vmatmul.mubr.msk.bf16.vlgmr.msra.gmra.mrb[0].mxu1 %vm1135_vm2, %v785_v17 }
 0x24e   : > { %2273 = vmatpush3.bf16.xpose.msra.mxu1 %v1232_v20  ;;  %2274 = vmatprep.mubr.msk.bf16.mxu1 %vm2611_vm0, %v2610_v0 }
 0x24f   : > { %2269 = vmatmul.mubr.msk.bf16.vlgmr.msra.gmra.mrb[4].mxu0 %vm1135_vm2, %v788_v21  ;;  %2284 = vmatprep.subr.bf16.mxu1 %v2610_v0 }
 0x250   : > { %2279 = vmatpush3.bf16.xpose.msra.mxu0 %v1278_v24  ;;  %2280 = vmatprep.mubr.msk.bf16.mxu0 %vm2611_vm0, %v2610_v0 }
 0x251   : > { %2290 = vmatprep.subr.bf16.mxu0 %v2610_v0 }
 0x255   : > { %2275 = vmatmul.mubr.msk.bf16.vlgmr.msra.gmra.mrb[4].mxu1 %vm1135_vm2, %v791_v27 }
 0x256   : > { %2286 = vmatprep.mubr.msk.bf16.mxu1 %vm2611_vm0, %v2610_v0 }
 0x257   : > { %2281 = vmatmul.mubr.msk.bf16.vlgmr.msra.gmra.mrb[8].mxu0 %vm1135_vm2, %v794_v30 }
 0x258   : > { %2292 = vmatprep.mubr.msk.bf16.mxu0 %vm2611_vm0, %v2610_v0 }
 0x320   : > { %v1176_v34 = vpop.f32.mrb[0].mxu1 }
 0x321   : > { %v1177_v37 = vadd.f32 %v1176_v34, %v557_v33  ;;  %v2264_v38 = vpop.f32.mrb[1].mxu1 }
 0x322   : > { %v1179_v40 = vpop.f32.mrb[2].mxu1  ;;  %v1222_v41 = vpop.f32.mrb[4].mxu0 }
 0x323   : > { %v1223_v42 = vadd.f32 %v1222_v41, %v557_v33  ;;  %v2265_v43 = vpop.f32.mrb[3].mxu1  ;;  %v2270_v44 = vpop.f32.mrb[5].mxu0  ;;  %v1320_v45 = vsel %vm1135_vm2, %v1177_v37, -inf }
 0x324   : > { %1321 = vmax.xlane.f32.xlu1 %v1320_v45  ;;  %v1225_v46 = vpop.f32.mrb[6].mxu0 }
 0x325   : > { %v2271_v47 = vpop.f32.mrb[7].mxu0  ;;  %v1323_v48 = vsel %vm1135_vm2, %v1223_v42, -inf }
 0x326   : > { %1324 = vmax.xlane.f32.xlu0 %v1323_v48 }
 0x328   : > { %v1268_v49 = vpop.f32.mrb[4].mxu1 }
 0x329   : > { %v1269_v50 = vadd.f32 %v1268_v49, %v557_v33  ;;  %v2276_v51 = vpop.f32.mrb[5].mxu1 }
 0x32a   : > { %v1271_v35 = vpop.f32.mrb[6].mxu1  ;;  %v1314_v36 = vpop.f32.mrb[8].mxu0 }
 0x32b   : > { %v1315_v52 = vadd.f32 %v1314_v36, %v557_v33  ;;  %v2277_v53 = vpop.f32.mrb[7].mxu1  ;;  %v2282_v54 = vpop.f32.mrb[9].mxu0  ;;  %v1326_v55 = vsel %vm1135_vm2, %v1269_v50, -inf }
 0x32c   : > { %1327 = vmax.xlane.f32.xlu0 %v1326_v55  ;;  %v1317_v56 = vpop.f32.mrb[10].mxu0 }
 0x32d   : > { %v2283_v57 = vpop.f32.mrb[11].mxu0  ;;  %v1329_v58 = vsel %vm1135_vm2, %v1315_v52, -inf }
 0x32e   : > { %1330 = vmax.xlane.f32.xlu1 %v1329_v58 }
 0x33f   : > { %967 = vrot.lane.b32.xlu1 %v2891_v12, %s2619_s29 }
 0x342   : > { %965 = vrot.lane.b32.xlu0 %v2885_v10, %s2619_s29 }
 0x3b1   : > { %v1322_v59 = vpop.xlane.xlu1 %1321 }
 0x3b2   : > { %v1332_v60 = vsub.f32 %v1177_v37, %v1322_v59 }
 0x3b3   : > { %v1325_v61 = vpop.xlane.xlu0 %1324 }
 0x3b4   : > { %v1336_v62 = vmul.f32 1.442695, %v1332_v60  ;;  %v1333_v63 = vsub.f32 %v1223_v42, %v1325_v61 }
 0x3b6   : > { %2424 = vpow2.f32 %v1336_v62  ;;  %v1338_v1 = vmul.f32 1.442695, %v1333_v63 }
 0x3b8   : > { %2426 = vpow2.f32 %v1338_v1 }
 0x3b9   : > { %v1328_v12 = vpop.xlane.xlu0 %1327 }
 0x3ba   : > { %v1334_v8 = vsub.f32 %v1269_v50, %v1328_v12 }
 0x3bb   : > { %v1331_v10 = vpop.xlane.xlu1 %1330 }
 0x3bc   : > { %v1335_v7 = vsub.f32 %v1315_v52, %v1331_v10  ;;  %v1340_v11 = vmul.f32 1.442695, %v1334_v8 }
 0x3be   : > { %v1342_v9 = vmul.f32 1.442695, %v1335_v7 }
 0x3bf   : > { %v968_v18 = vpop.permute.xlu1 %967 }
 0x3c0   : > { %v2425_v2 = vpop.eup %2424  ;;  %2428 = vpow2.f32 %v1342_v9  ;;  %v1014_v23 = vrot.slane %v968_v18, %v2900_v22 }
 0x3c1   : > { %v1344_v4 = vsel %vm1135_vm2, %v2425_v2, 0.0  ;;  %2430 = vpow2.f32 %v1340_v11 }
 0x3c2   : > { %v2427_v5 = vpop.eup %2426  ;;  %1345 = vadd.xlane.f32.xlu0 %v1344_v4 }
 0x3c3   : > { %v1347_v6 = vsel %vm1135_vm2, %v2427_v5, 0.0 }
 0x3c4   : > { %1348 = vadd.xlane.f32.xlu1 %v1347_v6 }
 0x3ca   : > { %v2999_v15 = vpop.eup %2428 }
 0x3cb   : > { %v3001_v16 = vpop.eup %2430  ;;  %v1353_v17 = vsel %vm1135_vm2, %v2999_v15, 0.0 }
 0x3d5   : > { %969 = vrot.lane.b32.xlu1 %v2896_v14, %s2619_s29  ;;  %v1350_v14 = vsel %vm1135_vm2, %v3001_v16, 0.0 }
 0x3d8   : > { %971 = vrot.lane.b32.xlu0 %v2894_v13, %s2619_s29  ;;  %v966_v13 = vpop.permute.xlu0 %965  ;;  %s2019_s29 = scalar_lea.sflag [#allocation9], %s2842_s12 }
 0x3d9   : > { %v980_v26 = vrot.slane %v966_v13, %v2900_v22 }
 0x3f7   : > { %1354 = vadd.xlane.f32.xlu0 %v1353_v17 }
 0x3f9   : > { %1351 = vadd.xlane.f32.xlu1 %v1350_v14 }
 0x44f   : > { %v1346_v19 = vpop.xlane.xlu0 %1345 }
 0x450   : > { %2432 = vrcp.f32 %v1346_v19 }
 0x451   : > { %v1349_v20 = vpop.xlane.xlu1 %1348 }
 0x452   : > { %2434 = vrcp.f32 %v1349_v20 }
 0x453   : > { %v972_v21 = vpop.permute.xlu0 %971 }
 0x454   : > { %v1022_v24 = vrot.slane %v972_v21, %v2900_v22 }
 0x455   : > { %v970_v25 = vpop.permute.xlu1 %969 }
 0x456   : > { %v1023_v27 = vcombine.low %v1014_v23, %v1022_v24  ;;  %v1024_v29 = vcombine.high %v1014_v23, %v1022_v24  ;;  %v988_v30 = vrot.slane %v970_v25, %v2900_v22 }
 0x458   : > { %v1031_v31 = vrot.slane %v1023_v27, %v2910_v28  ;;  %v1038_v32 = vrot.slane %v1024_v29, %v2910_v28  ;;  %v989_v33 = vcombine.low %v980_v26, %v988_v30  ;;  %v990_v34 = vcombine.high %v980_v26, %v988_v30 }
 0x45a   : > { %v2433_v37 = vpop.eup %2432  ;;  %v1039_v38 = vcombine.high %v1031_v31, %v2618_v39  ;;  %v1040_v40 = vcombine.high %v1038_v32, %v2618_v39  ;;  %v997_v42 = vrot.slane %v989_v33, %v2910_v28  ;;  %v1004_v43 = vrot.slane %v990_v34, %v2910_v28 }
 0x45b   : > { %v1360_v41 = vmul.f32 %v2433_v37, %v2425_v2  ;;  %v1046_v45 = vshrl.u32 %v1031_v31, 16  ;;  %v1062_v47 = vshrl.u32 %v1038_v32, 16 }
 0x45c   : > { %v2435_v44 = vpop.eup %2434  ;;  %v1054_v46 = vshrl.u32 %v1039_v38, 16  ;;  %v1005_v49 = vcombine.high %v997_v42, %v2618_v39  ;;  %v1006_v50 = vcombine.high %v1004_v43, %v2618_v39  ;;  %v1043_v51 = vpack.i.b16 %v1031_v31, %v997_v42 }
 0x45d   : > { %1364 = vst.msk [vmem:[%s3018_s17] sm:$0xff] %vm1135_vm2, %v1360_v41  ;;  %v1361_v48 = vmul.f32 %v2435_v44, %v2427_v5  ;;  %v1070_v35 = vshrl.u32 %v1040_v40, 16  ;;  %v1045_v36 = vshrl.u32 %v997_v42, 16  ;;  %v1059_v52 = vpack.i.b16 %v1038_v32, %v1004_v43 }
 0x45e   : > { %v1061_v53 = vshrl.u32 %v1004_v43, 16  ;;  %v1051_v54 = vpack.i.b16 %v1039_v38, %v1005_v49  ;;  %v1053_v55 = vshrl.u32 %v1005_v49, 16  ;;  %v1067_v56 = vpack.i.b16 %v1040_v40, %v1006_v50 }
 0x45f   : > { %1365 = vst.msk [vmem:[%s3018_s17 + $0x8] sm:$0xff] %vm1135_vm2, %v1361_v48  ;;  %v1069_v57 = vshrl.u32 %v1006_v50, 16  ;;  %v1047_v58 = vpack.i.b16 %v1046_v45, %v1045_v36  ;;  %v1073_v60 = vcombine.low %v1043_v51, %v1059_v52  ;;  %v1368_v26 = vpack.c.bf16 %v1360_v41, %v1360_v41 }
 0x460   : > { %v1063_v59 = vpack.i.b16 %v1062_v47, %v1061_v53  ;;  %v1055_v61 = vpack.i.b16 %v1054_v46, %v1053_v55  ;;  %v1081_v63 = vcombine.low %v1051_v54, %v1067_v56  ;;  %v1369_v30 = vpack.c.bf16 %v1361_v48, %v1361_v48 }
 0x461   : > { %v1071_v62 = vpack.i.b16 %v1070_v35, %v1069_v57  ;;  %v1080_v2 = vrot.slane %v1073_v60, %v2900_v22 }
 0x462   : > { %v1098_v1 = vcombine.low %v1047_v58, %v1063_v59  ;;  %v1088_v5 = vrot.slane %v1081_v63, %v2900_v22 }
 0x463   : > { %v1106_v4 = vcombine.low %v1055_v61, %v1071_v62 }
 0x464   : > { %v1089_v6 = vcombine.low %v1080_v2, %v1088_v5  ;;  %v1105_v10 = vrot.slane %v1098_v1, %v2900_v22 }
 0x465   : > { %v1113_v12 = vrot.slane %v1106_v4, %v2900_v22 }
 0x466   : > { %v1096_v7 = vrot.slane %v1089_v6, %v2910_v28 }
 0x467   : > { %v1114_v8 = vcombine.low %v1105_v10, %v1113_v12 }
 0x468   : > { %v1097_v11 = vcombine.high %v1096_v7, %v2618_v39  ;;  %v1126_v14 = vshrl.u32 %v1096_v7, 16 }
 0x469   : > { %v1121_v9 = vrot.slane %v1114_v8, %v2910_v28 }
 0x46a   : > { %v1132_v19 = vshrl.u32 %v1097_v11, 16 }
 0x46b   : > { %v1125_v17 = vpack.i.b16 %v1121_v9, %v1096_v7  ;;  %v1127_v13 = vshrl.u32 %v1121_v9, 16  ;;  %v1122_v18 = vcombine.high %v1121_v9, %v2618_v39 }
 0x46d   : > { %v1377_v20 = vsel %vm1375_vm3, %v1125_v17, 0  ;;  %v1128_v21 = vpack.i.b16 %v1127_v13, %v1126_v14  ;;  %v1131_v23 = vpack.i.b16 %v1122_v18, %v1097_v11  ;;  %v1133_v24 = vshrl.u32 %v1122_v18, 16 }
 0x46e   : > { %2285 = vmatpush3.bf16.msra.mxu1 %v1377_v20 }
 0x46f   : > { %v1423_v25 = vsel %vm1375_vm3, %v1128_v21, 0  ;;  %2296 = vmatprep.subr.bf16.mxu1 %v2610_v0  ;;  %v1134_v27 = vpack.i.b16 %v1133_v24, %v1132_v19  ;;  %v1469_v29 = vsel %vm1375_vm3, %v1131_v23, 0 }
 0x470   : > { %2291 = vmatpush3.bf16.msra.mxu0 %v1423_v25 }
 0x471   : > { %2287 = vmatmul.mubr.msk.bf16.vlgmr.msra.gmra.mrb[8].mxu1 %vm1135_vm2, %v1368_v26  ;;  %2302 = vmatprep.subr.bf16.mxu0 %v2610_v0  ;;  %v1515_v31 = vsel %vm1375_vm3, %v1134_v27, 0 }
 0x472   : > { %2297 = vmatpush3.bf16.msra.mxu1 %v1469_v29  ;;  %2298 = vmatprep.mubr.msk.bf16.mxu1 %vm2611_vm0, %v2610_v0 }
 0x473   : > { %2293 = vmatmul.mubr.msk.bf16.vlgmr.msra.gmra.mrb[12].mxu0 %vm1135_vm2, %v1369_v30  ;;  %2308 = vmatprep.subr.bf16.mxu1 %v2610_v0 }
 0x474   : > { %2303 = vmatpush3.bf16.msra.mxu0 %v1515_v31  ;;  %2304 = vmatprep.mubr.msk.bf16.mxu0 %vm2611_vm0, %v2610_v0 }
 0x475   : > { %2316 = vmatprep.subr.bf16.mxu0 %v2610_v0 }
 0x484   : > { %v1355_v32 = vpop.xlane.xlu0 %1354 }
 0x485   : > { %2436 = vrcp.f32 %v1355_v32 }
 0x486   : > { %v1352_v33 = vpop.xlane.xlu1 %1351 }
 0x487   : > { %2438 = vrcp.f32 %v1352_v33 }
 0x48f   : > { %v2437_v34 = vpop.eup %2436 }
 0x490   : > { %v1363_v37 = vmul.f32 %v2437_v34, %v2999_v15  ;;  %v2416_v15 = vld [vmem:[%s3224_s4] sm:$0xff]  }
 0x491   : > { %v2439_v38 = vpop.eup %2438 }
 0x492   : > { %1367 = vst.msk [vmem:[%s3018_s17 + $0x18] sm:$0xff] %vm1135_vm2, %v1363_v37  ;;  %v1362_v40 = vmul.f32 %v2439_v38, %v3001_v16  ;;  %v1371_v41 = vpack.c.bf16 %v1363_v37, %v1363_v37 }
 0x494   : > { %1366 = vst.msk [vmem:[%s3018_s17 + $0x10] sm:$0xff] %vm1135_vm2, %v1362_v40  ;;  %2305 = vmatmul.mubr.msk.bf16.vlgmr.msra.gmra.mrb[16].mxu0 %vm1135_vm2, %v1371_v41  ;;  %v1370_v42 = vpack.c.bf16 %v1362_v40, %v1362_v40 }
 0x495   : > { %2320 = vmatprep.mubr.msk.bf16.mxu0 %vm2611_vm0, %v2610_v0 }
 0x496   : > { %2299 = vmatmul.mubr.msk.bf16.vlgmr.msra.gmra.mrb[12].mxu1 %vm1135_vm2, %v1370_v42  ;;  %v2417_v42 = vld [vmem:[%s3224_s4 + $0x8] sm:$0xff]  }
 0x497   : > { %2312 = vmatprep.mubr.msk.bf16.mxu1 %vm2611_vm0, %v2610_v0  ;;  %2309 = vmatpush3.bf16.msra.mxu1 %v2416_v15 }
 0x498   : > { %2310 = vmatprep.subr.bf16.mxu1 %v2610_v0 }
 0x49b   : > { %2311 = vmatpush3.bf16.msra.mxu1 %v2417_v42 }
 0x49c   : > { %2324 = vmatprep.subr.bf16.mxu1 %v2610_v0 }
 0x544   : > { %v1413_v16 = vpop.f32.mrb[8].mxu1 }
 0x545   : > { %v2288_v43 = vpop.f32.mrb[9].mxu1  ;;  %v1557_v35 = vpack.c.bf16 %v1413_v16, %v1413_v16 }
 0x546   : > { %v1416_v44 = vpop.f32.mrb[10].mxu1  ;;  %v1459_v45 = vpop.f32.mrb[12].mxu0 }
 0x547   : > { %v2289_v46 = vpop.f32.mrb[11].mxu1  ;;  %v2294_v47 = vpop.f32.mrb[13].mxu0  ;;  %v1591_v50 = vpack.c.bf16 %v1459_v45, %v1459_v45  ;;  %v1564_v61 = vrot.slane %v1557_v35, %v2900_v22 }
 0x548   : > { %v1462_v48 = vpop.f32.mrb[14].mxu0 }
 0x549   : > { %v2295_v49 = vpop.f32.mrb[15].mxu0  ;;  %v1598_v55 = vrot.slane %v1591_v50, %v2900_v22 }
 0x567   : > { %v1551_v51 = vpop.f32.mrb[16].mxu0 }
 0x568   : > { %v1599_v36 = vpack.c.bf16 %v1551_v51, %v1551_v51  ;;  %v2306_v52 = vpop.f32.mrb[17].mxu0 }
 0x569   : > { %v1505_v53 = vpop.f32.mrb[12].mxu1  ;;  %v1554_v54 = vpop.f32.mrb[18].mxu0 }
 0x56a   : > { %v1606_v56 = vrot.slane %v1599_v36, %v2900_v22  ;;  %v1565_v57 = vpack.c.bf16 %v1505_v53, %v1505_v53  ;;  %v2300_v58 = vpop.f32.mrb[13].mxu1  ;;  %v2307_v59 = vpop.f32.mrb[19].mxu0 }
 0x56b   : > { %v1508_v60 = vpop.f32.mrb[14].mxu1  ;;  %v2196_v59 = vld [vmem:[%s3225_s5] ss:$0 sm:$0xff] }
 0x56c   : > { %v1607_v62 = vcombine.low %v1598_v55, %v1606_v56  ;;  %v1608_v63 = vcombine.high %v1598_v55, %v1606_v56  ;;  %v1572_v1 = vrot.slane %v1565_v57, %v2900_v22  ;;  %v2301_v2 = vpop.f32.mrb[15].mxu1 }
 0x56e   : > { %v1615_v4 = vrot.slane %v1607_v62, %v2910_v28  ;;  %v1622_v5 = vrot.slane %v1608_v63, %v2910_v28  ;;  %v1573_v6 = vcombine.low %v1564_v61, %v1572_v1  ;;  %v1574_v10 = vcombine.high %v1564_v61, %v1572_v1 }
 0x570   : > { %v1623_v12 = vcombine.high %v1615_v4, %v2618_v39  ;;  %v1581_v7 = vrot.slane %v1573_v6, %v2910_v28  ;;  %v1588_v8 = vrot.slane %v1574_v10, %v2910_v28  ;;  %v1624_v9 = vcombine.high %v1622_v5, %v2618_v39 }
 0x571   : > { %v1630_v11 = vshrl.u32 %v1615_v4, 16  ;;  %v1646_v20 = vshrl.u32 %v1622_v5, 16 }
 0x572   : > { %v1589_v17 = vcombine.high %v1581_v7, %v2618_v39  ;;  %v1590_v14 = vcombine.high %v1588_v8, %v2618_v39  ;;  %v1627_v13 = vpack.i.b16 %v1615_v4, %v1581_v7  ;;  %v1629_v18 = vshrl.u32 %v1581_v7, 16 }
 0x573   : > { %v1638_v19 = vshrl.u32 %v1623_v12, 16  ;;  %v1643_v21 = vpack.i.b16 %v1622_v5, %v1588_v8  ;;  %v1645_v23 = vshrl.u32 %v1588_v8, 16  ;;  %v1654_v29 = vshrl.u32 %v1624_v9, 16  ;;  %v2418_v8 = vld [vmem:[#allocation5] sm:$0xff]  }
 0x574   : > { %v1631_v24 = vpack.i.b16 %v1630_v11, %v1629_v18  ;;  %v1635_v25 = vpack.i.b16 %v1623_v12, %v1589_v17  ;;  %v1637_v26 = vshrl.u32 %v1589_v17, 16  ;;  %v1651_v27 = vpack.i.b16 %v1624_v9, %v1590_v14  ;;  %2317 = vmatpush3.bf16.msra.mxu0 %v2418_v8  ;;  %v2419_v9 = vld [vmem:[#allocation5 + $0x8] sm:$0xff]   ;;  %v2421_v11 = vld [vmem:[%s3230_s10 + $0x8] sm:$0xff]  }
 0x575   : > { %v1647_v30 = vpack.i.b16 %v1646_v20, %v1645_v23  ;;  %v1653_v31 = vshrl.u32 %v1590_v14, 16  ;;  %v1657_v32 = vcombine.low %v1627_v13, %v1643_v21  ;;  %2318 = vmatprep.subr.bf16.mxu0 %v2610_v0  ;;  %v2201_v21 = vld [vmem:[%s3227_s7] ss:$0 sm:$0xff] }
 0x576   : > { %v1639_v33 = vpack.i.b16 %v1638_v19, %v1637_v26  ;;  %v1665_v34 = vcombine.low %v1635_v25, %v1651_v27  ;;  %v2200_v19 = vld [vmem:[%s3226_s6] ss:$0 sm:$0xff]  ;;  %v2422_v26 = vld [vmem:[%s3230_s10 + $0x10] sm:$0xff]   ;;  %v2423_v27 = vld [vmem:[%s3230_s10 + $0x18] sm:$0xff]  }
 0x577   : > { %v1655_v37 = vpack.i.b16 %v1654_v29, %v1653_v31  ;;  %v1682_v38 = vcombine.low %v1631_v24, %v1647_v30  ;;  %v1664_v40 = vrot.slane %v1657_v32, %v2900_v22  ;;  %v2202_v29 = vld [vmem:[%s3229_s9] ss:$0 sm:$0xff] }
 0x578   : > { %v1672_v41 = vrot.slane %v1665_v34, %v2900_v22  ;;  %2319 = vmatpush3.bf16.msra.mxu0 %v2419_v9 }
 0x579   : > { %v1690_v15 = vcombine.low %v1639_v33, %v1655_v37  ;;  %v1689_v43 = vrot.slane %v1682_v38, %v2900_v22 }
 0x57a   : > { %v1673_v16 = vcombine.low %v1664_v40, %v1672_v41 }
 0x57b   : > { %v1697_v44 = vrot.slane %v1690_v15, %v2900_v22 }
 0x57c   : > { %v1680_v45 = vrot.slane %v1673_v16, %v2910_v28 }
 0x57d   : > { %v1698_v46 = vcombine.low %v1689_v43, %v1697_v44 }
 0x57e   : > { %v1681_v48 = vcombine.high %v1680_v45, %v2618_v39  ;;  %v1710_v49 = vshrl.u32 %v1680_v45, 16 }
 0x57f   : > { %v1705_v47 = vrot.slane %v1698_v46, %v2910_v28 }
 0x580   : > { %v1716_v53 = vshrl.u32 %v1681_v48, 16 }
 0x581   : > { %v1711_v50 = vshrl.u32 %v1705_v47, 16  ;;  %v1706_v51 = vcombine.high %v1705_v47, %v2618_v39  ;;  %v1709_v35 = vpack.i.b16 %v1705_v47, %v1680_v45 }
 0x583   : > { %v1712_v36 = vpack.i.b16 %v1711_v50, %v1710_v49  ;;  %v1715_v52 = vpack.i.b16 %v1706_v51, %v1681_v48  ;;  %v1717_v54 = vshrl.u32 %v1706_v51, 16 }
 0x585   : > { %1719 = vrot.lane.b32.xlu0 %v1712_v36, %s2620_s15  ;;  %1721 = vrot.lane.b32.xlu1 %v1715_v52, %s2621_s18  ;;  %v1718_v22 = vpack.i.b16 %v1717_v54, %v1716_v53  ;;  %s2045_s18 = sshll.u32 %s3018_s17, 4  ;;  %s2508_s17 = scalar_lea.vmem %s2507_s23, 1024  ;;  %s3137_s18 = int_to_ptr.vmem [resolvable:$true] %s2045_s18 }
 0x586   : > { %s2502_s16 = scalar_lea.vmem %s3137_s18, 512  ;;  %p2509_p13 = scmp.lt.s32.totalorder %s3137_s18, %s2507_s23 }
 0x587   : > { %p2503_p6 = scmp.ne.s32.totalorder %s3137_s18, %s2502_s16  ;;  %p2510_p3 = scmp.lt.s32.totalorder %s2508_s17, %s2502_s16 }
 0x589   : > { %1723 = vrot.lane.b32.xlu1 %v1718_v22, %s2622_s27  ;;  %p2504_p8 = pnand %p2503_p6, %p2797_p12  ;;  %p2511_p7 = por %p2510_p3, %p2509_p13 }
 0x58b   : > { %p2505_p10 = pneg %p2504_p8 }
 0x58d   : > { %p2512_p9 = pnand %p2511_p7, %p2505_p10 }
 0x5f7   : > { %v1720_v28 = vpop.permute.xlu0 %1719  ;;  %v1722_v55 = vpop.permute.xlu1 %1721 }
 0x5f8   : > { %v1727_v56 = vsel %vm1135_vm2, %v1709_v35, %v1720_v28 }
 0x5f9   : > { %v1730_v39 = vsel %vm1728_vm4, %v1727_v56, %v1722_v55 }
 0x5fb   : > { %v1724_v57 = vpop.permute.xlu1 %1723 }
 0x5fc   : > { %v1733_v58 = vsel %vm1731_vm5, %v1730_v39, %v1724_v57 }
 0x5fd   : > { %2313 = vmatmul.mubr.msk.bf16.vlgmr.msra.gmra.mrb[16].mxu1 %vm582_vm1, %v1733_v58 }
 0x5fe   : > { %2332 = vmatprep.mubr.msk.bf16.mxu1 %vm2611_vm0, %v2610_v0 }
 0x6d0   : > { %v1793_v60 = vpop.f32.mrb[16].mxu1 }
 0x6d1   : > { %v1794_v61 = vadd.f32 %v2196_v59, %v1793_v60  ;;  %v2314_v62 = vpop.f32.mrb[17].mxu1 }
 0x6d2   : > { %v1796_v63 = vpop.f32.mrb[18].mxu1 }
 0x6d3   : > { %v2315_v1 = vpop.f32.mrb[19].mxu1  ;;  %v1799_v2 = vadd.f32 %v1794_v61, %v2873_v3  ;;  %v2420_v3 = vld [vmem:[%s3230_s10] sm:$0xff]  }
 0x6d4   : > { %2325 = vmatpush3.bf16.msra.mxu1 %v2420_v3 }
 0x6d5   : > { %v1802_v4 = vsel %vm582_vm1, %v1799_v2, 0.0  ;;  %2326 = vmatprep.subr.bf16.mxu1 %v2610_v0 }
 0x6d6   : > { %1803 = vadd.xlane.f32.xlu0 %v1802_v4 }
 0x6d8   : > { %2327 = vmatpush3.bf16.msra.mxu1 %v2421_v11 }
 0x6d9   : > { %2328 = vmatprep.subr.bf16.mxu1 %v2610_v0 }
 0x6dc   : > { %2329 = vmatpush3.bf16.msra.mxu1 %v2422_v26 }
 0x6dd   : > { %2330 = vmatprep.subr.bf16.mxu1 %v2610_v0  ;;  %v2206_v0 = vld [vmem:[%s3268_s28] ss:$0 sm:$0xff] }
 0x6e0   : > { %2331 = vmatpush3.bf16.msra.mxu1 %v2423_v27 }
 0x763   : > { %v1804_v5 = vpop.xlane.xlu0 %1803 }
 0x764   : > { %v1806_v6 = vmul.f32 0.03125, %v1804_v5 }
 0x766   : > { %v1807_v10 = vsub.f32 %v1799_v2, %v1806_v6 }
 0x768   : > { %v1808_v12 = vmul.f32 %v1807_v10, %v1807_v10 }
 0x76a   : > { %v1809_v7 = vsel %vm582_vm1, %v1808_v12, 0.0 }
 0x76b   : > { %1810 = vadd.xlane.f32.xlu1 %v1809_v7 }
 0x7f8   : > { %v1811_v17 = vpop.xlane.xlu1 %1810 }
 0x7f9   : > { %v1812_v14 = vmul.f32 0.03125, %v1811_v17 }
 0x7fb   : > { %v1813_v13 = vadd.f32 1e-05, %v1812_v14 }
 0x7fd   : > { %2440 = vrsqrt.f32 %v1813_v13 }
 0x807   : > { %v2441_v18 = vpop.eup %2440 }
 0x808   : > { %v1815_v20 = vmul.f32 %v2441_v18, %v1807_v10 }
 0x80a   : > { %v1822_v23 = vmul.f32 %v2200_v19, %v1815_v20 }
 0x80c   : > { %v1829_v24 = vadd.f32 %v2201_v21, %v1822_v23 }
 0x80e   : > { %v1830_v25 = vpack.c.bf16 %v1829_v24, %v1829_v24 }
 0x810   : > { %2321 = vmatmul.mubr.msk.bf16.vlgmr.msra.gmra.mrb[20].mxu0 %vm582_vm1, %v1830_v25 }
 0x8e3   : > { %v1891_v30 = vpop.f32.mrb[20].mxu0 }
 0x8e4   : > { %v1892_v31 = vadd.f32 %v2202_v29, %v1891_v30  ;;  %v2322_v32 = vpop.f32.mrb[21].mxu0 }
 0x8e5   : > { %v1894_v33 = vpop.f32.mrb[22].mxu0 }
 0x8e6   : > { %v1897_v34 = vmax.f32 %v1892_v31, 0.0  ;;  %v2323_v37 = vpop.f32.mrb[23].mxu0 }
 0x8e8   : > { %v1898_v38 = vpack.c.bf16 %v1897_v34, %v1897_v34 }
 0x8ea   : > { %2333 = vmatmul.mubr.msk.bf16.vlgmr.msra.gmra.mrb[20].mxu1 %vm1938_vm6, %v1898_v38 }
 0x9bd   : > { %v1976_v40 = vpop.f32.mrb[20].mxu1 }
 0x9be   : > { %v1977_v41 = vadd.f32 %v2206_v0, %v1976_v40  ;;  %v2334_v42 = vpop.f32.mrb[21].mxu1 }
 0x9bf   : > { %v1979_v15 = vpop.f32.mrb[22].mxu1 }
 0x9c0   : > { %v2335_v16 = vpop.f32.mrb[23].mxu1  ;;  %v1982_v43 = vadd.f32 %v1977_v41, %v1829_v24 }
 0x9c2   : > { %v1985_v44 = vsel %vm582_vm1, %v1982_v43, 0.0 }
 0x9c3   : > { %1986 = vadd.xlane.f32.xlu0 %v1985_v44 }
 0xa50   : > { %v1987_v45 = vpop.xlane.xlu0 %1986 }
 0xa51   : > { %v1988_v46 = vmul.f32 0.03125, %v1987_v45 }
 0xa53   : > { %v1989_v47 = vsub.f32 %v1982_v43, %v1988_v46 }
 0xa55   : > { %v1990_v48 = vmul.f32 %v1989_v47, %v1989_v47 }
 0xa57   : > { %v1991_v49 = vsel %vm582_vm1, %v1990_v48, 0.0 }
 0xa58   : > { %1992 = vadd.xlane.f32.xlu0 %v1991_v49 }
 0xa59   : > { %2515 = shalt.err (!%p2512_p9)
}
 0xa5a   : > { %s2516_s28 = scalar_lea.hbm %s3135_s13, 512  ;;  %s2520_s26 = scalar_lea.hbm %s3269_s24, 1024 }
 0xa5b   : > { %p2517_p2 = scmp.ne.s32.totalorder %s3135_s13, %s2516_s28  ;;  %p2521_p11 = scmp.lt.u32.totalorder %s3135_s13, %s3269_s24 }
 0xa5c   : > { %p2522_p1 = scmp.lt.u32.totalorder %s2520_s26, %s2516_s28  ;;  %p2524_p6 = scmp.lt.u32.totalorder %s2516_s28, %s3135_s13 }
 0xa5d   : > { %p2518_p5 = pnand %p2517_p2, %p2797_p12 }
 0xa5e   : > { %p2523_p4 = por %p2522_p1, %p2521_p11 }
 0xa5f   : > { %p2519_p0 = pneg %p2518_p5 }
 0xa60   : > { %p2525_p8 = por %p2524_p6, %p2523_p4 }
 0xa62   : > { %p2526_p10 = pnand %p2525_p8, %p2519_p0 }
 0xa64   : > { %2529 = shalt.err (!%p2526_p10)
}
 0xa65   : > { %s2624_s16 = smov 128   ;;  %s2181_s17 = sshll.u32 %s2842_s12, 3 }
 0xa66   : > { %2343 = dma.vmem_to_hbm [thread:$0]  (%p2797_p12), %s3137_s18, 512, %s3135_s13, %s2019_s29, %s2624_s16, %s2624_s16, %s2620_s15  }
 0xa67   : > { %s3270_s27 = sld [smem:[#allocation20_spill]]  ;;  %s3271_s23 = sld [smem:[#allocation21_spill]] }
 0xa68   : > { %s2216_s0 = sshll.u32 %s2727_s22, 7  ;;  %s541_s1 = scalar_lea.vmem [#allocation7], %s2181_s17 }
 0xa69   : > { %s2032_s15 = sshll.u32 %s541_s1, 4  ;;  %s3272_s29 = sld [smem:[#allocation22_spill]]  ;;  %s3177_s15 = int_to_ptr.vmem [resolvable:$true] %s2032_s15 }
 0xa6a   : > { %s2014_s28 = scalar_lea.sflag [#allocation4], %s2842_s12  ;;  %s2530_s11 = scalar_lea.vmem %s3177_s15, 128 }
 0xa6b   : > { %p2531_p13 = scmp.ne.s32.totalorder %s3177_s15, %s2530_s11  ;;  %s2625_s22 = smov [#allocation7]  }
 0xa6c   : > { %s2534_s17 = sshll.u32 %s2625_s22, 4  ;;  %s2535_s17 = int_to_ptr.vmem [resolvable:$false] %s2534_s17 }
 0xa6d   : > { %v2212_v52 = vld [vmem:[%s3270_s27] ss:$0 sm:$0xff]  ;;  %p2532_p3 = pnand %p2531_p13, %p2797_p12  ;;  %s2536_s27 = scalar_lea.vmem %s2535_s17, 256 }
 0xa6e   : > { %v2213_v54 = vld [vmem:[%s3271_s23] ss:$0 sm:$0xff]  ;;  %p2537_p9 = scmp.lt.s32.totalorder %s3177_s15, %s2535_s17  ;;  %p2538_p2 = scmp.lt.s32.totalorder %s2536_s27, %s2530_s11 }
 0xa6f   : > { %s3175_s16 = scalar_lea.hbm %s3272_s29, %s2216_s0  ;;  %p2533_p7 = pneg %p2532_p3 }
 0xa70   : > { %p2539_p5 = por %p2538_p2, %p2537_p9 }
 0xa72   : > { %p2540_p0 = pnand %p2539_p5, %p2533_p7 }
 0xae5   : > { %v1993_v50 = vpop.xlane.xlu0 %1992 }
 0xae6   : > { %v1994_v51 = vmul.f32 0.03125, %v1993_v50 }
 0xae8   : > { %v1995_v35 = vadd.f32 1e-05, %v1994_v51 }
 0xaea   : > { %2442 = vrsqrt.f32 %v1995_v35 }
 0xaf4   : > { %v2443_v36 = vpop.eup %2442 }
 0xaf5   : > { %v1997_v53 = vmul.f32 %v2443_v36, %v1989_v47 }
 0xaf7   : > { %v2004_v22 = vmul.f32 %v2212_v52, %v1997_v53 }
 0xaf9   : > { %v2011_v28 = vadd.f32 %v2213_v54, %v2004_v22 }
 0xafb   : > { %2012 = vst.msk [vmem:[%s541_s1] sm:$0xff] %vm582_vm1, %v2011_v28 }
 0xafc   : > { %2543 = shalt.err (!%p2540_p0)
}
 0xafd   : > { %s2544_s0 = scalar_lea.hbm %s3175_s16, 128  ;;  %s2548_s26 = scalar_lea.hbm %s3272_s29, 256 }
 0xafe   : > { %p2545_p11 = scmp.ne.s32.totalorder %s3175_s16, %s2544_s0  ;;  %p2549_p6 = scmp.lt.u32.totalorder %s3175_s16, %s3272_s29 }
 0xaff   : > { %p2550_p8 = scmp.lt.u32.totalorder %s2548_s26, %s2544_s0  ;;  %p2552_p13 = scmp.lt.u32.totalorder %s2544_s0, %s3175_s16 }
 0xb00   : > { %p2546_p1 = pnand %p2545_p11, %p2797_p12 }
 0xb01   : > { %p2551_p10 = por %p2550_p8, %p2549_p6 }
 0xb02   : > { %p2547_p4 = pneg %p2546_p1 }
 0xb03   : > { %p2553_p3 = por %p2552_p13, %p2551_p10 }
 0xb05   : > { %p2554_p7 = pnand %p2553_p3, %p2547_p4 }
 0xb07   : > { %2557 = shalt.err (!%p2554_p7)
}
 0xb08   : > { %2342 = dma.vmem_to_hbm [thread:$0]  (%p2797_p12), %s3177_s15, 128, %s3175_s16, %s2014_s28  }
 0xb09 PF: > { %s3273_s18 = sld [smem:[#allocation14_spill]]  ;;  %s3274_s13 = sld [smem:[#allocation15_spill]] }
 0xb0a   : > { %p3276_p2 = scmp.ge.s32.totalorder %s2604_s21, 2 }
 0xb0f   : > { %s2060_s11 = sand.u32 1, %s3273_s18   ;;  %p3275_p9 = scmp.ne.s32.totalorder %s3274_s13, 0 }
 0xb10   : > { %s2061_s22 = scalar_lea.sflag [#allocation4], %s2060_s11 }
 0xb11   : > { %p2355_p5 = pnand %p3276_p2, %p3275_p9 }
 0xb13   : > { %2583 = dma.done.wait (!%p2355_p5), %s2061_s22, 128  }
 0xb14   : > { %2585 = vsyncadd (!%p2355_p5), %s2061_s22, 4294967168  ;;  %s2070_s17 = scalar_lea.sflag [#allocation9], %s2060_s11 }
 0xb15   : > { %2587 = dma.done.wait (!%p2355_p5), %s2070_s17, 512  }
 0xb16   : > { %2589 = vsyncadd (!%p2355_p5), %s2070_s17, 4294966784  ;;  %s3277_s21 = sld [smem:[#allocation16_spill]]  ;;  %s3278_s18 = smov %s2596_s19 }
 0xb17   : > { %s3279_s19 = smov %s2600_s20  ;;  %s3280_s20 = smov %s2793_s25 }
 0xb1c   : > { %p33_p12 = scmp.ge.s32.totalorder %s3277_s21, 4  }
 0xb1e   :  { %35 = sbr.rel (!%p33_p12) target bundleno = 16 (0x10), region = 145 }
 0xb25   :  { %2075 = vsyncpa [#allocation3], 1 }
 0xb26   :  { %2077 = vsyncpa [#allocation3 + $0x1], 1 }
 0xb27   :  { %2078 = vsyncpa [#allocation6], 1 }
 0xb28   :  { %2079 = vsyncpa [#allocation4], 1 }
 0xb29   :  { %2081 = vsyncpa [#allocation4 + $0x1], 1 }
 0xb2a   :  { %2082 = vsyncpa [#allocation9], 1 }
 0xb2b   :  { %2084 = vsyncpa [#allocation9 + $0x1], 1 }

</bundles_post_ra>
